<compile_context>
chip_gen: v7x
topology: tpu7x:2x2x1
jax: 0.10.0
libtpu: 0.0.40
codegen_flags: <defaults>
</compile_context>

<pallas_src>
import jax
import jax.numpy as jnp
from jax.experimental import pallas as pl
from jax.experimental.pallas import tpu as pltpu

_MXU_DTYPE = jnp.bfloat16                    # MXU operand dtype; accum stays f32
_NEG = float(jnp.finfo(jnp.float32).min)     # max-pool padding value


# ----------------------------------------------------------------------------
# Fused Inception kernel (one batch element per grid step)
# ----------------------------------------------------------------------------
def _inception_kernel(x_ref, w1_ref, b1_ref, w2_ref, b2_ref, o_ref, xpad, mid):
    # x_ref : (1, H, W, Cin)      f32   input tile (one batch element)
    # w1_ref: (2, Cin, C1tot)     bf16  fused 1x1 weights; [0] hits x, [1] pool(x)
    # b1_ref: (1, C1tot)          f32
    # w2_ref: (25, C1tot, C2tot)  bf16  per-tap fused 3x3 / 5x5 / identity weights
    # b2_ref: (1, C2tot)          f32
    # o_ref : (1, H, W, C2tot)    f32   final [b1 | b2 | b3 | b4]
    # xpad  : (H+2, W+2, Cin)     f32   VMEM scratch, -inf padded input
    # mid   : (H+4, W+4, C1tot)   f32   VMEM scratch, zero padded stage-1 act
    H, W, cin = x_ref.shape[1], x_ref.shape[2], x_ref.shape[3]
    c1tot = w1_ref.shape[2]
    c2tot = o_ref.shape[3]

    x_img = x_ref[0]                                    # (H, W, Cin)

    # ---- branch 4 pooling: 3x3 / s1 / p1 max-pool built entirely in VMEM ----
    xpad[...] = jnp.full(xpad.shape, _NEG, jnp.float32)
    xpad[1:H + 1, 1:W + 1, :] = x_img
    pooled = x_img                                      # centre tap
    for dy in range(3):
        for dx in range(3):
            if dy == 1 and dx == 1:
                continue
            pooled = jnp.maximum(pooled, xpad[dy:dy + H, dx:dx + W, :])

    # ---- stage 1: all four 1x1 convs as two MXU matmuls + bias + ReLU -------
    x_flat = x_img.reshape(H * W, cin).astype(_MXU_DTYPE)
    p_flat = pooled.reshape(H * W, cin).astype(_MXU_DTYPE)
    acc1 = jnp.dot(x_flat, w1_ref[0], preferred_element_type=jnp.float32)
    acc1 = acc1 + jnp.dot(p_flat, w1_ref[1], preferred_element_type=jnp.float32)
    act1 = jnp.maximum(acc1 + b1_ref[...], 0.0)         # (H*W, C1tot) f32

    # ---- stage 2: fused 3x3 + 5x5 convs + identity passthrough --------------
    # Zero-padded stage-1 activations stay in VMEM; 25-tap accumulation means
    # im2col is never materialized and the activations are read exactly once
    # per tap from on-chip memory.
    mid[...] = jnp.zeros(mid.shape, jnp.float32)
    mid[2:H + 2, 2:W + 2, :] = act1.reshape(H, W, c1tot)
    acc2 = jnp.zeros((H * W, c2tot), jnp.float32)
    for dy in range(5):
        for dx in range(5):
            tap = mid[dy:dy + H, dx:dx + W, :].reshape(H * W, c1tot)
            acc2 = acc2 + jnp.dot(tap.astype(_MXU_DTYPE), w2_ref[dy * 5 + dx],
                                  preferred_element_type=jnp.float32)
    o_ref[...] = jnp.maximum(acc2 + b2_ref[...], 0.0).reshape(o_ref.shape)


# ----------------------------------------------------------------------------
# Weight fusion (pure-JAX glue, traced under jit; negligible cost)
# ----------------------------------------------------------------------------
def _fuse_stage1_params(params):
    """Fused 1x1 weights: (2, Cin, C1tot); [0] hits x, [1] hits pooled x."""
    cin, c1 = params["b1_w"].shape[2], params["b1_w"].shape[3]
    c2_0 = params["b2a_w"].shape[3]
    c3_0 = params["b3a_w"].shape[3]
    c4 = params["b4_w"].shape[3]
    c1tot = c1 + c2_0 + c3_0 + c4
    w = jnp.zeros((2, cin, c1tot), jnp.float32)
    w = w.at[0, :, :c1].set(params["b1_w"].reshape(cin, c1))
    w = w.at[0, :, c1:c1 + c2_0].set(params["b2a_w"].reshape(cin, c2_0))
    w = w.at[0, :, c1 + c2_0:c1 + c2_0 + c3_0].set(
        params["b3a_w"].reshape(cin, c3_0))
    w = w.at[1, :, c1 + c2_0 + c3_0:].set(params["b4_w"].reshape(cin, c4))
    b = jnp.concatenate([params["b1_b"], params["b2a_b"],
                         params["b3a_b"], params["b4_b"]])
    return w.astype(_MXU_DTYPE), b.reshape(1, c1tot)


def _fuse_stage2_params(params):
    """Per-tap fused weights (25, C1tot, C2tot): branch-2 3x3 centred inside a
    5x5 (pad=1 semantics), branch-3 5x5 (pad=2), plus identity blocks on the
    centre tap passing branch-1 / branch-4 straight into the output layout."""
    c1 = params["b1_w"].shape[3]
    c2_0, c2_1 = params["b2b_w"].shape[2], params["b2b_w"].shape[3]
    c3_0, c3_1 = params["b3b_w"].shape[2], params["b3b_w"].shape[3]
    c4 = params["b4_w"].shape[3]
    c1tot = c1 + c2_0 + c3_0 + c4
    c2tot = c1 + c2_1 + c3_1 + c4
    w = jnp.zeros((5, 5, c1tot, c2tot), jnp.float32)
    w = w.at[1:4, 1:4, c1:c1 + c2_0, c1:c1 + c2_1].set(params["b2b_w"])
    w = w.at[:, :, c1 + c2_0:c1 + c2_0 + c3_0,
             c1 + c2_1:c1 + c2_1 + c3_1].set(params["b3b_w"])
    # Passthrough (values are post-ReLU, so the final ReLU is a no-op on them).
    w = w.at[2, 2, :c1, :c1].set(jnp.eye(c1, dtype=jnp.float32))
    w = w.at[2, 2, c1 + c2_0 + c3_0:, c1 + c2_1 + c3_1:].set(
        jnp.eye(c4, dtype=jnp.float32))
    b = jnp.concatenate([jnp.zeros((c1,), jnp.float32), params["b2b_b"],
                         params["b3b_b"], jnp.zeros((c4,), jnp.float32)])
    return (w.reshape(25, c1tot, c2tot).astype(_MXU_DTYPE),
            b.reshape(1, c2tot))


# ----------------------------------------------------------------------------
# Inception module
# ----------------------------------------------------------------------------
def init_inception_params(key, in_channels, c1, c2, c3, c4):
    ks = jax.random.split(key, 12)

    def w(k, kh, kw, ci, co):
        return 0.1 * jax.random.normal(k, (kh, kw, ci, co), jnp.float32)

    def b(k, co):
        return 0.1 * jax.random.normal(k, (co,), jnp.float32)

    return {
        "b1_w": w(ks[0], 1, 1, in_channels, c1),     "b1_b": b(ks[1], c1),
        "b2a_w": w(ks[2], 1, 1, in_channels, c2[0]), "b2a_b": b(ks[3], c2[0]),
        "b2b_w": w(ks[4], 3, 3, c2[0], c2[1]),       "b2b_b": b(ks[5], c2[1]),
        "b3a_w": w(ks[6], 1, 1, in_channels, c3[0]), "b3a_b": b(ks[7], c3[0]),
        "b3b_w": w(ks[8], 5, 5, c3[0], c3[1]),       "b3b_b": b(ks[9], c3[1]),
        "b4_w": w(ks[10], 1, 1, in_channels, c4),    "b4_b": b(ks[11], c4),
    }


def inception_forward(x_nchw, params):
    """Forward pass of the GoogLeNet Inception block. Input/output are NCHW."""
    c1 = params["b1_w"].shape[3]
    c2_0, c2_1 = params["b2b_w"].shape[2], params["b2b_w"].shape[3]
    c3_0, c3_1 = params["b3b_w"].shape[2], params["b3b_w"].shape[3]
    c4 = params["b4_w"].shape[3]
    cin = params["b1_w"].shape[2]
    c1tot = c1 + c2_0 + c3_0 + c4   # stage-1 fused channels [b1|b2a|b3a|b4]
    c2tot = c1 + c2_1 + c3_1 + c4   # final channels [b1|b2|b3|b4]

    x = jnp.transpose(x_nchw, (0, 2, 3, 1))  # NCHW -> NHWC (channels in lanes)
    N, H, W, _ = x.shape

    w1f, b1f = _fuse_stage1_params(params)
    w2f, b2f = _fuse_stage2_params(params)

    out = pl.pallas_call(
        _inception_kernel,
        out_shape=jax.ShapeDtypeStruct((N, H, W, c2tot), jnp.float32),
        grid=(N,),
        in_specs=[
            pl.BlockSpec((1, H, W, cin), lambda n: (n, 0, 0, 0)),
            pl.BlockSpec((2, cin, c1tot), lambda n: (0, 0, 0)),
            pl.BlockSpec((1, c1tot), lambda n: (0, 0)),
            pl.BlockSpec((25, c1tot, c2tot), lambda n: (0, 0, 0)),
            pl.BlockSpec((1, c2tot), lambda n: (0, 0)),
        ],
        out_specs=pl.BlockSpec((1, H, W, c2tot), lambda n: (n, 0, 0, 0)),
        scratch_shapes=[
            pltpu.VMEM((H + 2, W + 2, cin), jnp.float32),    # -inf padded x
            pltpu.VMEM((H + 4, W + 4, c1tot), jnp.float32),  # zero padded act1
        ],
        compiler_params=pltpu.CompilerParams(dimension_semantics=("parallel",)),
    )(x, w1f, b1f, w2f, b2f)

    return jnp.transpose(out, (0, 3, 1, 2))  # NHWC -> NCHW


# ----------------------------------------------------------------------------
# Pure-JAX f32 reference for verification
# ----------------------------------------------------------------------------
def _ref_conv_relu(x_nhwc, w_hwio, bias, padding):
    y = jax.lax.conv_general_dilated(
        x_nhwc, w_hwio, window_strides=(1, 1),
        padding=[(padding, padding), (padding, padding)],
        dimension_numbers=("NHWC", "HWIO", "NHWC"))
    return jnp.maximum(y + bias, 0.0)


def _ref_maxpool(x_nhwc):
    return jax.lax.reduce_window(
        x_nhwc, -jnp.inf, jax.lax.max, (1, 3, 3, 1), (1, 1, 1, 1),
        [(0, 0), (1, 1), (1, 1), (0, 0)])


def inception_reference(x_nchw, params):
    x = jnp.transpose(x_nchw, (0, 2, 3, 1))
    b1 = _ref_conv_relu(x, params["b1_w"], params["b1_b"], 0)
    b2 = _ref_conv_relu(x, params["b2a_w"], params["b2a_b"], 0)
    b2 = _ref_conv_relu(b2, params["b2b_w"], params["b2b_b"], 1)
    b3 = _ref_conv_relu(x, params["b3a_w"], params["b3a_b"], 0)
    b3 = _ref_conv_relu(b3, params["b3b_w"], params["b3b_b"], 2)
    b4 = _ref_conv_relu(_ref_maxpool(x), params["b4_w"], params["b4_b"], 0)
    out = jnp.concatenate([b1, b2, b3, b4], axis=-1)
    return jnp.transpose(out, (0, 3, 1, 2))


if __name__ == "__main__":
    key = jax.random.PRNGKey(0)
    kx, kp = jax.random.split(key)

    in_channels, c1, c2, c3, c4 = 4, 8, (6, 8), (4, 8), 8
    x = jax.random.normal(kx, (2, in_channels, 16, 16), jnp.float32)  # NCHW
    params = init_inception_params(kp, in_channels, c1, c2, c3, c4)

    out = jax.block_until_ready(jax.jit(inception_forward)(x, params))

    expected_channels = c1 + c2[1] + c3[1] + c4
    assert out.shape == (2, expected_channels, 16, 16), out.shape

    ref = jax.block_until_ready(inception_reference(x, params))
    # bf16 MXU operands (f32 accumulation) compared against an all-f32 reference.
    assert jnp.allclose(out, ref, atol=5e-2, rtol=5e-2), \
        float(jnp.abs(out - ref).max())

    print("KERNEL_OK")
</pallas_src>

<mosaic_0001>
module attributes {stable_mosaic.version = 11 : i64} {
  func.func @_inception_kernel(%arg0: i32, %arg1: memref<1x16x16x4xf32, #tpu.memory_space<vmem>>, %arg2: memref<2x4x26xbf16, #tpu.memory_space<vmem>>, %arg3: memref<1x26xf32, #tpu.memory_space<vmem>>, %arg4: memref<25x26x32xbf16, #tpu.memory_space<vmem>>, %arg5: memref<1x32xf32, #tpu.memory_space<vmem>>, %arg6: memref<1x16x16x32xf32, #tpu.memory_space<vmem>>, %arg7: memref<18x18x4xf32, #tpu.memory_space<vmem>>, %arg8: memref<20x20x26xf32, #tpu.memory_space<vmem>>) attributes {dimension_semantics = [#tpu.dimension_semantics<parallel>], iteration_bounds = array<i64: 2>, scalar_prefetch = 0 : i64, scratch_operands = 2 : i64, tpu.core_type = #tpu.core_type<tc>, window_params = [{transform_indices = @transform_0, window_bounds = array<i64: 1, 16, 16, 4>}, {pipeline_mode = #tpu.pipeline_mode<synchronous>, transform_indices = @transform_1, window_bounds = array<i64: 2, 4, 26>}, {pipeline_mode = #tpu.pipeline_mode<synchronous>, transform_indices = @transform_2, window_bounds = array<i64: 1, 26>}, {pipeline_mode = #tpu.pipeline_mode<synchronous>, transform_indices = @transform_3, window_bounds = array<i64: 25, 26, 32>}, {pipeline_mode = #tpu.pipeline_mode<synchronous>, transform_indices = @transform_4, window_bounds = array<i64: 1, 32>}, {transform_indices = @transform_5, window_bounds = array<i64: 1, 16, 16, 32>}]} {
    %c0 = arith.constant 0 : index
    %c0_0 = arith.constant 0 : index
    %c0_1 = arith.constant 0 : index
    %c0_2 = arith.constant 0 : index
    %0 = vector.load %arg1[%c0, %c0_0, %c0_1, %c0_2] : memref<1x16x16x4xf32, #tpu.memory_space<vmem>>, vector<1x16x16x4xf32>
    %1 = vector.shape_cast %0 : vector<1x16x16x4xf32> to vector<16x16x4xf32>
    %cst = arith.constant -3.40282347E+38 : f32
    %2 = vector.broadcast %cst : f32 to vector<18x18x4xf32>
    %c0_3 = arith.constant 0 : index
    %c0_4 = arith.constant 0 : index
    %c0_5 = arith.constant 0 : index
    %3 = vector.load %arg7[%c0_3, %c0_4, %c0_5] : memref<18x18x4xf32, #tpu.memory_space<vmem>>, vector<18x18x4xf32>
    tpu.vector_store %arg7[%c0_3, %c0_4, %c0_5], %2 {strides = array<i32>} : memref<18x18x4xf32, #tpu.memory_space<vmem>>, vector<18x18x4xf32>,
    %c1 = arith.constant 1 : index
    %c1_6 = arith.constant 1 : index
    %c0_7 = arith.constant 0 : index
    %4 = vector.load %arg7[%c1, %c1_6, %c0_7] : memref<18x18x4xf32, #tpu.memory_space<vmem>>, vector<16x16x4xf32>
    tpu.vector_store %arg7[%c1, %c1_6, %c0_7], %1 {strides = array<i32>} : memref<18x18x4xf32, #tpu.memory_space<vmem>>, vector<16x16x4xf32>,
    %c0_8 = arith.constant 0 : index
    %c0_9 = arith.constant 0 : index
    %c0_10 = arith.constant 0 : index
    %5 = vector.load %arg7[%c0_8, %c0_9, %c0_10] : memref<18x18x4xf32, #tpu.memory_space<vmem>>, vector<16x16x4xf32>
    %6 = arith.maximumf %1, %5 : vector<16x16x4xf32>
    %c0_11 = arith.constant 0 : index
    %c1_12 = arith.constant 1 : index
    %c0_13 = arith.constant 0 : index
    %7 = vector.load %arg7[%c0_11, %c1_12, %c0_13] : memref<18x18x4xf32, #tpu.memory_space<vmem>>, vector<16x16x4xf32>
    %8 = arith.maximumf %6, %7 : vector<16x16x4xf32>
    %c0_14 = arith.constant 0 : index
    %c2 = arith.constant 2 : index
    %c0_15 = arith.constant 0 : index
    %9 = vector.load %arg7[%c0_14, %c2, %c0_15] : memref<18x18x4xf32, #tpu.memory_space<vmem>>, vector<16x16x4xf32>
    %10 = arith.maximumf %8, %9 : vector<16x16x4xf32>
    %c1_16 = arith.constant 1 : index
    %c0_17 = arith.constant 0 : index
    %c0_18 = arith.constant 0 : index
    %11 = vector.load %arg7[%c1_16, %c0_17, %c0_18] : memref<18x18x4xf32, #tpu.memory_space<vmem>>, vector<16x16x4xf32>
    %12 = arith.maximumf %10, %11 : vector<16x16x4xf32>
    %c1_19 = arith.constant 1 : index
    %c2_20 = arith.constant 2 : index
    %c0_21 = arith.constant 0 : index
    %13 = vector.load %arg7[%c1_19, %c2_20, %c0_21] : memref<18x18x4xf32, #tpu.memory_space<vmem>>, vector<16x16x4xf32>
    %14 = arith.maximumf %12, %13 : vector<16x16x4xf32>
    %c2_22 = arith.constant 2 : index
    %c0_23 = arith.constant 0 : index
    %c0_24 = arith.constant 0 : index
    %15 = vector.load %arg7[%c2_22, %c0_23, %c0_24] : memref<18x18x4xf32, #tpu.memory_space<vmem>>, vector<16x16x4xf32>
    %16 = arith.maximumf %14, %15 : vector<16x16x4xf32>
    %c2_25 = arith.constant 2 : index
    %c1_26 = arith.constant 1 : index
    %c0_27 = arith.constant 0 : index
    %17 = vector.load %arg7[%c2_25, %c1_26, %c0_27] : memref<18x18x4xf32, #tpu.memory_space<vmem>>, vector<16x16x4xf32>
    %18 = arith.maximumf %16, %17 : vector<16x16x4xf32>
    %c2_28 = arith.constant 2 : index
    %c2_29 = arith.constant 2 : index
    %c0_30 = arith.constant 0 : index
    %19 = vector.load %arg7[%c2_28, %c2_29, %c0_30] : memref<18x18x4xf32, #tpu.memory_space<vmem>>, vector<16x16x4xf32>
    %20 = arith.maximumf %18, %19 : vector<16x16x4xf32>
    %21 = vector.shape_cast %1 : vector<16x16x4xf32> to vector<256x4xf32>
    %22 = arith.truncf %21 : vector<256x4xf32> to vector<256x4xbf16>
    %23 = vector.shape_cast %20 : vector<16x16x4xf32> to vector<256x4xf32>
    %24 = arith.truncf %23 : vector<256x4xf32> to vector<256x4xbf16>
    %c0_31 = arith.constant 0 : index
    %c0_32 = arith.constant 0 : index
    %c0_33 = arith.constant 0 : index
    %25 = vector.load %arg2[%c0_31, %c0_32, %c0_33] : memref<2x4x26xbf16, #tpu.memory_space<vmem>>, vector<1x4x26xbf16>
    %26 = vector.shape_cast %25 : vector<1x4x26xbf16> to vector<4x26xbf16>
    %cst_34 = arith.constant dense<0.000000e+00> : vector<256x26xf32>
    %27 = tpu.matmul %22, %26, %cst_34 {dimension_numbers = #tpu.dot_dimension_numbers<[1], [0], [0], [1], [0, 0, 1, 1], [], []>} : vector<256x4xbf16>, vector<4x26xbf16>, vector<256x26xf32> -> vector<256x26xf32>
    %c1_35 = arith.constant 1 : index
    %c0_36 = arith.constant 0 : index
    %c0_37 = arith.constant 0 : index
    %28 = vector.load %arg2[%c1_35, %c0_36, %c0_37] : memref<2x4x26xbf16, #tpu.memory_space<vmem>>, vector<1x4x26xbf16>
    %29 = vector.shape_cast %28 : vector<1x4x26xbf16> to vector<4x26xbf16>
    %cst_38 = arith.constant dense<0.000000e+00> : vector<256x26xf32>
    %30 = tpu.matmul %24, %29, %cst_38 {dimension_numbers = #tpu.dot_dimension_numbers<[1], [0], [0], [1], [0, 0, 1, 1], [], []>} : vector<256x4xbf16>, vector<4x26xbf16>, vector<256x26xf32> -> vector<256x26xf32>
    %31 = arith.addf %27, %30 : vector<256x26xf32>
    %c0_39 = arith.constant 0 : index
    %c0_40 = arith.constant 0 : index
    %32 = vector.load %arg3[%c0_39, %c0_40] : memref<1x26xf32, #tpu.memory_space<vmem>>, vector<1x26xf32>
    %33 = vector.broadcast %32 : vector<1x26xf32> to vector<256x26xf32>
    %34 = arith.addf %31, %33 : vector<256x26xf32>
    %cst_41 = arith.constant 0.000000e+00 : f32
    %35 = vector.broadcast %cst_41 : f32 to vector<256x26xf32>
    %36 = arith.maximumf %34, %35 : vector<256x26xf32>
    %cst_42 = arith.constant 0.000000e+00 : f32
    %37 = vector.broadcast %cst_42 : f32 to vector<20x20x26xf32>
    %c0_43 = arith.constant 0 : index
    %c0_44 = arith.constant 0 : index
    %c0_45 = arith.constant 0 : index
    %38 = vector.load %arg8[%c0_43, %c0_44, %c0_45] : memref<20x20x26xf32, #tpu.memory_space<vmem>>, vector<20x20x26xf32>
    tpu.vector_store %arg8[%c0_43, %c0_44, %c0_45], %37 {strides = array<i32>} : memref<20x20x26xf32, #tpu.memory_space<vmem>>, vector<20x20x26xf32>,
    %39 = vector.shape_cast %36 : vector<256x26xf32> to vector<16x16x26xf32>
    %c2_46 = arith.constant 2 : index
    %c2_47 = arith.constant 2 : index
    %c0_48 = arith.constant 0 : index
    %40 = vector.load %arg8[%c2_46, %c2_47, %c0_48] : memref<20x20x26xf32, #tpu.memory_space<vmem>>, vector<16x16x26xf32>
    tpu.vector_store %arg8[%c2_46, %c2_47, %c0_48], %39 {strides = array<i32>} : memref<20x20x26xf32, #tpu.memory_space<vmem>>, vector<16x16x26xf32>,
    %cst_49 = arith.constant 0.000000e+00 : f32
    %41 = vector.broadcast %cst_49 : f32 to vector<256x32xf32>
    %c0_50 = arith.constant 0 : index
    %c0_51 = arith.constant 0 : index
    %c0_52 = arith.constant 0 : index
    %42 = vector.load %arg8[%c0_50, %c0_51, %c0_52] : memref<20x20x26xf32, #tpu.memory_space<vmem>>, vector<16x16x26xf32>
    %43 = vector.shape_cast %42 : vector<16x16x26xf32> to vector<256x26xf32>
    %44 = arith.truncf %43 : vector<256x26xf32> to vector<256x26xbf16>
    %c0_53 = arith.constant 0 : index
    %c0_54 = arith.constant 0 : index
    %c0_55 = arith.constant 0 : index
    %45 = vector.load %arg4[%c0_53, %c0_54, %c0_55] : memref<25x26x32xbf16, #tpu.memory_space<vmem>>, vector<1x26x32xbf16>
    %46 = vector.shape_cast %45 : vector<1x26x32xbf16> to vector<26x32xbf16>
    %cst_56 = arith.constant dense<0.000000e+00> : vector<256x32xf32>
    %47 = tpu.matmul %44, %46, %cst_56 {dimension_numbers = #tpu.dot_dimension_numbers<[1], [0], [0], [1], [0, 0, 1, 1], [], []>} : vector<256x26xbf16>, vector<26x32xbf16>, vector<256x32xf32> -> vector<256x32xf32>
    %48 = arith.addf %41, %47 : vector<256x32xf32>
    %c0_57 = arith.constant 0 : index
    %c1_58 = arith.constant 1 : index
    %c0_59 = arith.constant 0 : index
    %49 = vector.load %arg8[%c0_57, %c1_58, %c0_59] : memref<20x20x26xf32, #tpu.memory_space<vmem>>, vector<16x16x26xf32>
    %50 = vector.shape_cast %49 : vector<16x16x26xf32> to vector<256x26xf32>
    %51 = arith.truncf %50 : vector<256x26xf32> to vector<256x26xbf16>
    %c1_60 = arith.constant 1 : index
    %c0_61 = arith.constant 0 : index
    %c0_62 = arith.constant 0 : index
    %52 = vector.load %arg4[%c1_60, %c0_61, %c0_62] : memref<25x26x32xbf16, #tpu.memory_space<vmem>>, vector<1x26x32xbf16>
    %53 = vector.shape_cast %52 : vector<1x26x32xbf16> to vector<26x32xbf16>
    %cst_63 = arith.constant dense<0.000000e+00> : vector<256x32xf32>
    %54 = tpu.matmul %51, %53, %cst_63 {dimension_numbers = #tpu.dot_dimension_numbers<[1], [0], [0], [1], [0, 0, 1, 1], [], []>} : vector<256x26xbf16>, vector<26x32xbf16>, vector<256x32xf32> -> vector<256x32xf32>
    %55 = arith.addf %48, %54 : vector<256x32xf32>
    %c0_64 = arith.constant 0 : index
    %c2_65 = arith.constant 2 : index
    %c0_66 = arith.constant 0 : index
    %56 = vector.load %arg8[%c0_64, %c2_65, %c0_66] : memref<20x20x26xf32, #tpu.memory_space<vmem>>, vector<16x16x26xf32>
    %57 = vector.shape_cast %56 : vector<16x16x26xf32> to vector<256x26xf32>
    %58 = arith.truncf %57 : vector<256x26xf32> to vector<256x26xbf16>
    %c2_67 = arith.constant 2 : index
    %c0_68 = arith.constant 0 : index
    %c0_69 = arith.constant 0 : index
    %59 = vector.load %arg4[%c2_67, %c0_68, %c0_69] : memref<25x26x32xbf16, #tpu.memory_space<vmem>>, vector<1x26x32xbf16>
    %60 = vector.shape_cast %59 : vector<1x26x32xbf16> to vector<26x32xbf16>
    %cst_70 = arith.constant dense<0.000000e+00> : vector<256x32xf32>
    %61 = tpu.matmul %58, %60, %cst_70 {dimension_numbers = #tpu.dot_dimension_numbers<[1], [0], [0], [1], [0, 0, 1, 1], [], []>} : vector<256x26xbf16>, vector<26x32xbf16>, vector<256x32xf32> -> vector<256x32xf32>
    %62 = arith.addf %55, %61 : vector<256x32xf32>
    %c0_71 = arith.constant 0 : index
    %c3 = arith.constant 3 : index
    %c0_72 = arith.constant 0 : index
    %63 = vector.load %arg8[%c0_71, %c3, %c0_72] : memref<20x20x26xf32, #tpu.memory_space<vmem>>, vector<16x16x26xf32>
    %64 = vector.shape_cast %63 : vector<16x16x26xf32> to vector<256x26xf32>
    %65 = arith.truncf %64 : vector<256x26xf32> to vector<256x26xbf16>
    %c3_73 = arith.constant 3 : index
    %c0_74 = arith.constant 0 : index
    %c0_75 = arith.constant 0 : index
    %66 = vector.load %arg4[%c3_73, %c0_74, %c0_75] : memref<25x26x32xbf16, #tpu.memory_space<vmem>>, vector<1x26x32xbf16>
    %67 = vector.shape_cast %66 : vector<1x26x32xbf16> to vector<26x32xbf16>
    %cst_76 = arith.constant dense<0.000000e+00> : vector<256x32xf32>
    %68 = tpu.matmul %65, %67, %cst_76 {dimension_numbers = #tpu.dot_dimension_numbers<[1], [0], [0], [1], [0, 0, 1, 1], [], []>} : vector<256x26xbf16>, vector<26x32xbf16>, vector<256x32xf32> -> vector<256x32xf32>
    %69 = arith.addf %62, %68 : vector<256x32xf32>
    %c0_77 = arith.constant 0 : index
    %c4 = arith.constant 4 : index
    %c0_78 = arith.constant 0 : index
    %70 = vector.load %arg8[%c0_77, %c4, %c0_78] : memref<20x20x26xf32, #tpu.memory_space<vmem>>, vector<16x16x26xf32>
    %71 = vector.shape_cast %70 : vector<16x16x26xf32> to vector<256x26xf32>
    %72 = arith.truncf %71 : vector<256x26xf32> to vector<256x26xbf16>
    %c4_79 = arith.constant 4 : index
    %c0_80 = arith.constant 0 : index
    %c0_81 = arith.constant 0 : index
    %73 = vector.load %arg4[%c4_79, %c0_80, %c0_81] : memref<25x26x32xbf16, #tpu.memory_space<vmem>>, vector<1x26x32xbf16>
    %74 = vector.shape_cast %73 : vector<1x26x32xbf16> to vector<26x32xbf16>
    %cst_82 = arith.constant dense<0.000000e+00> : vector<256x32xf32>
    %75 = tpu.matmul %72, %74, %cst_82 {dimension_numbers = #tpu.dot_dimension_numbers<[1], [0], [0], [1], [0, 0, 1, 1], [], []>} : vector<256x26xbf16>, vector<26x32xbf16>, vector<256x32xf32> -> vector<256x32xf32>
    %76 = arith.addf %69, %75 : vector<256x32xf32>
    %c1_83 = arith.constant 1 : index
    %c0_84 = arith.constant 0 : index
    %c0_85 = arith.constant 0 : index
    %77 = vector.load %arg8[%c1_83, %c0_84, %c0_85] : memref<20x20x26xf32, #tpu.memory_space<vmem>>, vector<16x16x26xf32>
    %78 = vector.shape_cast %77 : vector<16x16x26xf32> to vector<256x26xf32>
    %79 = arith.truncf %78 : vector<256x26xf32> to vector<256x26xbf16>
    %c5 = arith.constant 5 : index
    %c0_86 = arith.constant 0 : index
    %c0_87 = arith.constant 0 : index
    %80 = vector.load %arg4[%c5, %c0_86, %c0_87] : memref<25x26x32xbf16, #tpu.memory_space<vmem>>, vector<1x26x32xbf16>
    %81 = vector.shape_cast %80 : vector<1x26x32xbf16> to vector<26x32xbf16>
    %cst_88 = arith.constant dense<0.000000e+00> : vector<256x32xf32>
    %82 = tpu.matmul %79, %81, %cst_88 {dimension_numbers = #tpu.dot_dimension_numbers<[1], [0], [0], [1], [0, 0, 1, 1], [], []>} : vector<256x26xbf16>, vector<26x32xbf16>, vector<256x32xf32> -> vector<256x32xf32>
    %83 = arith.addf %76, %82 : vector<256x32xf32>
    %c1_89 = arith.constant 1 : index
    %c1_90 = arith.constant 1 : index
    %c0_91 = arith.constant 0 : index
    %84 = vector.load %arg8[%c1_89, %c1_90, %c0_91] : memref<20x20x26xf32, #tpu.memory_space<vmem>>, vector<16x16x26xf32>
    %85 = vector.shape_cast %84 : vector<16x16x26xf32> to vector<256x26xf32>
    %86 = arith.truncf %85 : vector<256x26xf32> to vector<256x26xbf16>
    %c6 = arith.constant 6 : index
    %c0_92 = arith.constant 0 : index
    %c0_93 = arith.constant 0 : index
    %87 = vector.load %arg4[%c6, %c0_92, %c0_93] : memref<25x26x32xbf16, #tpu.memory_space<vmem>>, vector<1x26x32xbf16>
    %88 = vector.shape_cast %87 : vector<1x26x32xbf16> to vector<26x32xbf16>
    %cst_94 = arith.constant dense<0.000000e+00> : vector<256x32xf32>
    %89 = tpu.matmul %86, %88, %cst_94 {dimension_numbers = #tpu.dot_dimension_numbers<[1], [0], [0], [1], [0, 0, 1, 1], [], []>} : vector<256x26xbf16>, vector<26x32xbf16>, vector<256x32xf32> -> vector<256x32xf32>
    %90 = arith.addf %83, %89 : vector<256x32xf32>
    %c1_95 = arith.constant 1 : index
    %c2_96 = arith.constant 2 : index
    %c0_97 = arith.constant 0 : index
    %91 = vector.load %arg8[%c1_95, %c2_96, %c0_97] : memref<20x20x26xf32, #tpu.memory_space<vmem>>, vector<16x16x26xf32>
    %92 = vector.shape_cast %91 : vector<16x16x26xf32> to vector<256x26xf32>
    %93 = arith.truncf %92 : vector<256x26xf32> to vector<256x26xbf16>
    %c7 = arith.constant 7 : index
    %c0_98 = arith.constant 0 : index
    %c0_99 = arith.constant 0 : index
    %94 = vector.load %arg4[%c7, %c0_98, %c0_99] : memref<25x26x32xbf16, #tpu.memory_space<vmem>>, vector<1x26x32xbf16>
    %95 = vector.shape_cast %94 : vector<1x26x32xbf16> to vector<26x32xbf16>
    %cst_100 = arith.constant dense<0.000000e+00> : vector<256x32xf32>
    %96 = tpu.matmul %93, %95, %cst_100 {dimension_numbers = #tpu.dot_dimension_numbers<[1], [0], [0], [1], [0, 0, 1, 1], [], []>} : vector<256x26xbf16>, vector<26x32xbf16>, vector<256x32xf32> -> vector<256x32xf32>
    %97 = arith.addf %90, %96 : vector<256x32xf32>
    %c1_101 = arith.constant 1 : index
    %c3_102 = arith.constant 3 : index
    %c0_103 = arith.constant 0 : index
    %98 = vector.load %arg8[%c1_101, %c3_102, %c0_103] : memref<20x20x26xf32, #tpu.memory_space<vmem>>, vector<16x16x26xf32>
    %99 = vector.shape_cast %98 : vector<16x16x26xf32> to vector<256x26xf32>
    %100 = arith.truncf %99 : vector<256x26xf32> to vector<256x26xbf16>
    %c8 = arith.constant 8 : index
    %c0_104 = arith.constant 0 : index
    %c0_105 = arith.constant 0 : index
    %101 = vector.load %arg4[%c8, %c0_104, %c0_105] : memref<25x26x32xbf16, #tpu.memory_space<vmem>>, vector<1x26x32xbf16>
    %102 = vector.shape_cast %101 : vector<1x26x32xbf16> to vector<26x32xbf16>
    %cst_106 = arith.constant dense<0.000000e+00> : vector<256x32xf32>
    %103 = tpu.matmul %100, %102, %cst_106 {dimension_numbers = #tpu.dot_dimension_numbers<[1], [0], [0], [1], [0, 0, 1, 1], [], []>} : vector<256x26xbf16>, vector<26x32xbf16>, vector<256x32xf32> -> vector<256x32xf32>
    %104 = arith.addf %97, %103 : vector<256x32xf32>
    %c1_107 = arith.constant 1 : index
    %c4_108 = arith.constant 4 : index
    %c0_109 = arith.constant 0 : index
    %105 = vector.load %arg8[%c1_107, %c4_108, %c0_109] : memref<20x20x26xf32, #tpu.memory_space<vmem>>, vector<16x16x26xf32>
    %106 = vector.shape_cast %105 : vector<16x16x26xf32> to vector<256x26xf32>
    %107 = arith.truncf %106 : vector<256x26xf32> to vector<256x26xbf16>
    %c9 = arith.constant 9 : index
    %c0_110 = arith.constant 0 : index
    %c0_111 = arith.constant 0 : index
    %108 = vector.load %arg4[%c9, %c0_110, %c0_111] : memref<25x26x32xbf16, #tpu.memory_space<vmem>>, vector<1x26x32xbf16>
    %109 = vector.shape_cast %108 : vector<1x26x32xbf16> to vector<26x32xbf16>
    %cst_112 = arith.constant dense<0.000000e+00> : vector<256x32xf32>
    %110 = tpu.matmul %107, %109, %cst_112 {dimension_numbers = #tpu.dot_dimension_numbers<[1], [0], [0], [1], [0, 0, 1, 1], [], []>} : vector<256x26xbf16>, vector<26x32xbf16>, vector<256x32xf32> -> vector<256x32xf32>
    %111 = arith.addf %104, %110 : vector<256x32xf32>
    %c2_113 = arith.constant 2 : index
    %c0_114 = arith.constant 0 : index
    %c0_115 = arith.constant 0 : index
    %112 = vector.load %arg8[%c2_113, %c0_114, %c0_115] : memref<20x20x26xf32, #tpu.memory_space<vmem>>, vector<16x16x26xf32>
    %113 = vector.shape_cast %112 : vector<16x16x26xf32> to vector<256x26xf32>
    %114 = arith.truncf %113 : vector<256x26xf32> to vector<256x26xbf16>
    %c10 = arith.constant 10 : index
    %c0_116 = arith.constant 0 : index
    %c0_117 = arith.constant 0 : index
    %115 = vector.load %arg4[%c10, %c0_116, %c0_117] : memref<25x26x32xbf16, #tpu.memory_space<vmem>>, vector<1x26x32xbf16>
    %116 = vector.shape_cast %115 : vector<1x26x32xbf16> to vector<26x32xbf16>
    %cst_118 = arith.constant dense<0.000000e+00> : vector<256x32xf32>
    %117 = tpu.matmul %114, %116, %cst_118 {dimension_numbers = #tpu.dot_dimension_numbers<[1], [0], [0], [1], [0, 0, 1, 1], [], []>} : vector<256x26xbf16>, vector<26x32xbf16>, vector<256x32xf32> -> vector<256x32xf32>
    %118 = arith.addf %111, %117 : vector<256x32xf32>
    %c2_119 = arith.constant 2 : index
    %c1_120 = arith.constant 1 : index
    %c0_121 = arith.constant 0 : index
    %119 = vector.load %arg8[%c2_119, %c1_120, %c0_121] : memref<20x20x26xf32, #tpu.memory_space<vmem>>, vector<16x16x26xf32>
    %120 = vector.shape_cast %119 : vector<16x16x26xf32> to vector<256x26xf32>
    %121 = arith.truncf %120 : vector<256x26xf32> to vector<256x26xbf16>
    %c11 = arith.constant 11 : index
    %c0_122 = arith.constant 0 : index
    %c0_123 = arith.constant 0 : index
    %122 = vector.load %arg4[%c11, %c0_122, %c0_123] : memref<25x26x32xbf16, #tpu.memory_space<vmem>>, vector<1x26x32xbf16>
    %123 = vector.shape_cast %122 : vector<1x26x32xbf16> to vector<26x32xbf16>
    %cst_124 = arith.constant dense<0.000000e+00> : vector<256x32xf32>
    %124 = tpu.matmul %121, %123, %cst_124 {dimension_numbers = #tpu.dot_dimension_numbers<[1], [0], [0], [1], [0, 0, 1, 1], [], []>} : vector<256x26xbf16>, vector<26x32xbf16>, vector<256x32xf32> -> vector<256x32xf32>
    %125 = arith.addf %118, %124 : vector<256x32xf32>
    %c2_125 = arith.constant 2 : index
    %c2_126 = arith.constant 2 : index
    %c0_127 = arith.constant 0 : index
    %126 = vector.load %arg8[%c2_125, %c2_126, %c0_127] : memref<20x20x26xf32, #tpu.memory_space<vmem>>, vector<16x16x26xf32>
    %127 = vector.shape_cast %126 : vector<16x16x26xf32> to vector<256x26xf32>
    %128 = arith.truncf %127 : vector<256x26xf32> to vector<256x26xbf16>
    %c12 = arith.constant 12 : index
    %c0_128 = arith.constant 0 : index
    %c0_129 = arith.constant 0 : index
    %129 = vector.load %arg4[%c12, %c0_128, %c0_129] : memref<25x26x32xbf16, #tpu.memory_space<vmem>>, vector<1x26x32xbf16>
    %130 = vector.shape_cast %129 : vector<1x26x32xbf16> to vector<26x32xbf16>
    %cst_130 = arith.constant dense<0.000000e+00> : vector<256x32xf32>
    %131 = tpu.matmul %128, %130, %cst_130 {dimension_numbers = #tpu.dot_dimension_numbers<[1], [0], [0], [1], [0, 0, 1, 1], [], []>} : vector<256x26xbf16>, vector<26x32xbf16>, vector<256x32xf32> -> vector<256x32xf32>
    %132 = arith.addf %125, %131 : vector<256x32xf32>
    %c2_131 = arith.constant 2 : index
    %c3_132 = arith.constant 3 : index
    %c0_133 = arith.constant 0 : index
    %133 = vector.load %arg8[%c2_131, %c3_132, %c0_133] : memref<20x20x26xf32, #tpu.memory_space<vmem>>, vector<16x16x26xf32>
    %134 = vector.shape_cast %133 : vector<16x16x26xf32> to vector<256x26xf32>
    %135 = arith.truncf %134 : vector<256x26xf32> to vector<256x26xbf16>
    %c13 = arith.constant 13 : index
    %c0_134 = arith.constant 0 : index
    %c0_135 = arith.constant 0 : index
    %136 = vector.load %arg4[%c13, %c0_134, %c0_135] : memref<25x26x32xbf16, #tpu.memory_space<vmem>>, vector<1x26x32xbf16>
    %137 = vector.shape_cast %136 : vector<1x26x32xbf16> to vector<26x32xbf16>
    %cst_136 = arith.constant dense<0.000000e+00> : vector<256x32xf32>
    %138 = tpu.matmul %135, %137, %cst_136 {dimension_numbers = #tpu.dot_dimension_numbers<[1], [0], [0], [1], [0, 0, 1, 1], [], []>} : vector<256x26xbf16>, vector<26x32xbf16>, vector<256x32xf32> -> vector<256x32xf32>
    %139 = arith.addf %132, %138 : vector<256x32xf32>
    %c2_137 = arith.constant 2 : index
    %c4_138 = arith.constant 4 : index
    %c0_139 = arith.constant 0 : index
    %140 = vector.load %arg8[%c2_137, %c4_138, %c0_139] : memref<20x20x26xf32, #tpu.memory_space<vmem>>, vector<16x16x26xf32>
    %141 = vector.shape_cast %140 : vector<16x16x26xf32> to vector<256x26xf32>
    %142 = arith.truncf %141 : vector<256x26xf32> to vector<256x26xbf16>
    %c14 = arith.constant 14 : index
    %c0_140 = arith.constant 0 : index
    %c0_141 = arith.constant 0 : index
    %143 = vector.load %arg4[%c14, %c0_140, %c0_141] : memref<25x26x32xbf16, #tpu.memory_space<vmem>>, vector<1x26x32xbf16>
    %144 = vector.shape_cast %143 : vector<1x26x32xbf16> to vector<26x32xbf16>
    %cst_142 = arith.constant dense<0.000000e+00> : vector<256x32xf32>
    %145 = tpu.matmul %142, %144, %cst_142 {dimension_numbers = #tpu.dot_dimension_numbers<[1], [0], [0], [1], [0, 0, 1, 1], [], []>} : vector<256x26xbf16>, vector<26x32xbf16>, vector<256x32xf32> -> vector<256x32xf32>
    %146 = arith.addf %139, %145 : vector<256x32xf32>
    %c3_143 = arith.constant 3 : index
    %c0_144 = arith.constant 0 : index
    %c0_145 = arith.constant 0 : index
    %147 = vector.load %arg8[%c3_143, %c0_144, %c0_145] : memref<20x20x26xf32, #tpu.memory_space<vmem>>, vector<16x16x26xf32>
    %148 = vector.shape_cast %147 : vector<16x16x26xf32> to vector<256x26xf32>
    %149 = arith.truncf %148 : vector<256x26xf32> to vector<256x26xbf16>
    %c15 = arith.constant 15 : index
    %c0_146 = arith.constant 0 : index
    %c0_147 = arith.constant 0 : index
    %150 = vector.load %arg4[%c15, %c0_146, %c0_147] : memref<25x26x32xbf16, #tpu.memory_space<vmem>>, vector<1x26x32xbf16>
    %151 = vector.shape_cast %150 : vector<1x26x32xbf16> to vector<26x32xbf16>
    %cst_148 = arith.constant dense<0.000000e+00> : vector<256x32xf32>
    %152 = tpu.matmul %149, %151, %cst_148 {dimension_numbers = #tpu.dot_dimension_numbers<[1], [0], [0], [1], [0, 0, 1, 1], [], []>} : vector<256x26xbf16>, vector<26x32xbf16>, vector<256x32xf32> -> vector<256x32xf32>
    %153 = arith.addf %146, %152 : vector<256x32xf32>
    %c3_149 = arith.constant 3 : index
    %c1_150 = arith.constant 1 : index
    %c0_151 = arith.constant 0 : index
    %154 = vector.load %arg8[%c3_149, %c1_150, %c0_151] : memref<20x20x26xf32, #tpu.memory_space<vmem>>, vector<16x16x26xf32>
    %155 = vector.shape_cast %154 : vector<16x16x26xf32> to vector<256x26xf32>
    %156 = arith.truncf %155 : vector<256x26xf32> to vector<256x26xbf16>
    %c16 = arith.constant 16 : index
    %c0_152 = arith.constant 0 : index
    %c0_153 = arith.constant 0 : index
    %157 = vector.load %arg4[%c16, %c0_152, %c0_153] : memref<25x26x32xbf16, #tpu.memory_space<vmem>>, vector<1x26x32xbf16>
    %158 = vector.shape_cast %157 : vector<1x26x32xbf16> to vector<26x32xbf16>
    %cst_154 = arith.constant dense<0.000000e+00> : vector<256x32xf32>
    %159 = tpu.matmul %156, %158, %cst_154 {dimension_numbers = #tpu.dot_dimension_numbers<[1], [0], [0], [1], [0, 0, 1, 1], [], []>} : vector<256x26xbf16>, vector<26x32xbf16>, vector<256x32xf32> -> vector<256x32xf32>
    %160 = arith.addf %153, %159 : vector<256x32xf32>
    %c3_155 = arith.constant 3 : index
    %c2_156 = arith.constant 2 : index
    %c0_157 = arith.constant 0 : index
    %161 = vector.load %arg8[%c3_155, %c2_156, %c0_157] : memref<20x20x26xf32, #tpu.memory_space<vmem>>, vector<16x16x26xf32>
    %162 = vector.shape_cast %161 : vector<16x16x26xf32> to vector<256x26xf32>
    %163 = arith.truncf %162 : vector<256x26xf32> to vector<256x26xbf16>
    %c17 = arith.constant 17 : index
    %c0_158 = arith.constant 0 : index
    %c0_159 = arith.constant 0 : index
    %164 = vector.load %arg4[%c17, %c0_158, %c0_159] : memref<25x26x32xbf16, #tpu.memory_space<vmem>>, vector<1x26x32xbf16>
    %165 = vector.shape_cast %164 : vector<1x26x32xbf16> to vector<26x32xbf16>
    %cst_160 = arith.constant dense<0.000000e+00> : vector<256x32xf32>
    %166 = tpu.matmul %163, %165, %cst_160 {dimension_numbers = #tpu.dot_dimension_numbers<[1], [0], [0], [1], [0, 0, 1, 1], [], []>} : vector<256x26xbf16>, vector<26x32xbf16>, vector<256x32xf32> -> vector<256x32xf32>
    %167 = arith.addf %160, %166 : vector<256x32xf32>
    %c3_161 = arith.constant 3 : index
    %c3_162 = arith.constant 3 : index
    %c0_163 = arith.constant 0 : index
    %168 = vector.load %arg8[%c3_161, %c3_162, %c0_163] : memref<20x20x26xf32, #tpu.memory_space<vmem>>, vector<16x16x26xf32>
    %169 = vector.shape_cast %168 : vector<16x16x26xf32> to vector<256x26xf32>
    %170 = arith.truncf %169 : vector<256x26xf32> to vector<256x26xbf16>
    %c18 = arith.constant 18 : index
    %c0_164 = arith.constant 0 : index
    %c0_165 = arith.constant 0 : index
    %171 = vector.load %arg4[%c18, %c0_164, %c0_165] : memref<25x26x32xbf16, #tpu.memory_space<vmem>>, vector<1x26x32xbf16>
    %172 = vector.shape_cast %171 : vector<1x26x32xbf16> to vector<26x32xbf16>
    %cst_166 = arith.constant dense<0.000000e+00> : vector<256x32xf32>
    %173 = tpu.matmul %170, %172, %cst_166 {dimension_numbers = #tpu.dot_dimension_numbers<[1], [0], [0], [1], [0, 0, 1, 1], [], []>} : vector<256x26xbf16>, vector<26x32xbf16>, vector<256x32xf32> -> vector<256x32xf32>
    %174 = arith.addf %167, %173 : vector<256x32xf32>
    %c3_167 = arith.constant 3 : index
    %c4_168 = arith.constant 4 : index
    %c0_169 = arith.constant 0 : index
    %175 = vector.load %arg8[%c3_167, %c4_168, %c0_169] : memref<20x20x26xf32, #tpu.memory_space<vmem>>, vector<16x16x26xf32>
    %176 = vector.shape_cast %175 : vector<16x16x26xf32> to vector<256x26xf32>
    %177 = arith.truncf %176 : vector<256x26xf32> to vector<256x26xbf16>
    %c19 = arith.constant 19 : index
    %c0_170 = arith.constant 0 : index
    %c0_171 = arith.constant 0 : index
    %178 = vector.load %arg4[%c19, %c0_170, %c0_171] : memref<25x26x32xbf16, #tpu.memory_space<vmem>>, vector<1x26x32xbf16>
    %179 = vector.shape_cast %178 : vector<1x26x32xbf16> to vector<26x32xbf16>
    %cst_172 = arith.constant dense<0.000000e+00> : vector<256x32xf32>
    %180 = tpu.matmul %177, %179, %cst_172 {dimension_numbers = #tpu.dot_dimension_numbers<[1], [0], [0], [1], [0, 0, 1, 1], [], []>} : vector<256x26xbf16>, vector<26x32xbf16>, vector<256x32xf32> -> vector<256x32xf32>
    %181 = arith.addf %174, %180 : vector<256x32xf32>
    %c4_173 = arith.constant 4 : index
    %c0_174 = arith.constant 0 : index
    %c0_175 = arith.constant 0 : index
    %182 = vector.load %arg8[%c4_173, %c0_174, %c0_175] : memref<20x20x26xf32, #tpu.memory_space<vmem>>, vector<16x16x26xf32>
    %183 = vector.shape_cast %182 : vector<16x16x26xf32> to vector<256x26xf32>
    %184 = arith.truncf %183 : vector<256x26xf32> to vector<256x26xbf16>
    %c20 = arith.constant 20 : index
    %c0_176 = arith.constant 0 : index
    %c0_177 = arith.constant 0 : index
    %185 = vector.load %arg4[%c20, %c0_176, %c0_177] : memref<25x26x32xbf16, #tpu.memory_space<vmem>>, vector<1x26x32xbf16>
    %186 = vector.shape_cast %185 : vector<1x26x32xbf16> to vector<26x32xbf16>
    %cst_178 = arith.constant dense<0.000000e+00> : vector<256x32xf32>
    %187 = tpu.matmul %184, %186, %cst_178 {dimension_numbers = #tpu.dot_dimension_numbers<[1], [0], [0], [1], [0, 0, 1, 1], [], []>} : vector<256x26xbf16>, vector<26x32xbf16>, vector<256x32xf32> -> vector<256x32xf32>
    %188 = arith.addf %181, %187 : vector<256x32xf32>
    %c4_179 = arith.constant 4 : index
    %c1_180 = arith.constant 1 : index
    %c0_181 = arith.constant 0 : index
    %189 = vector.load %arg8[%c4_179, %c1_180, %c0_181] : memref<20x20x26xf32, #tpu.memory_space<vmem>>, vector<16x16x26xf32>
    %190 = vector.shape_cast %189 : vector<16x16x26xf32> to vector<256x26xf32>
    %191 = arith.truncf %190 : vector<256x26xf32> to vector<256x26xbf16>
    %c21 = arith.constant 21 : index
    %c0_182 = arith.constant 0 : index
    %c0_183 = arith.constant 0 : index
    %192 = vector.load %arg4[%c21, %c0_182, %c0_183] : memref<25x26x32xbf16, #tpu.memory_space<vmem>>, vector<1x26x32xbf16>
    %193 = vector.shape_cast %192 : vector<1x26x32xbf16> to vector<26x32xbf16>
    %cst_184 = arith.constant dense<0.000000e+00> : vector<256x32xf32>
    %194 = tpu.matmul %191, %193, %cst_184 {dimension_numbers = #tpu.dot_dimension_numbers<[1], [0], [0], [1], [0, 0, 1, 1], [], []>} : vector<256x26xbf16>, vector<26x32xbf16>, vector<256x32xf32> -> vector<256x32xf32>
    %195 = arith.addf %188, %194 : vector<256x32xf32>
    %c4_185 = arith.constant 4 : index
    %c2_186 = arith.constant 2 : index
    %c0_187 = arith.constant 0 : index
    %196 = vector.load %arg8[%c4_185, %c2_186, %c0_187] : memref<20x20x26xf32, #tpu.memory_space<vmem>>, vector<16x16x26xf32>
    %197 = vector.shape_cast %196 : vector<16x16x26xf32> to vector<256x26xf32>
    %198 = arith.truncf %197 : vector<256x26xf32> to vector<256x26xbf16>
    %c22 = arith.constant 22 : index
    %c0_188 = arith.constant 0 : index
    %c0_189 = arith.constant 0 : index
    %199 = vector.load %arg4[%c22, %c0_188, %c0_189] : memref<25x26x32xbf16, #tpu.memory_space<vmem>>, vector<1x26x32xbf16>
    %200 = vector.shape_cast %199 : vector<1x26x32xbf16> to vector<26x32xbf16>
    %cst_190 = arith.constant dense<0.000000e+00> : vector<256x32xf32>
    %201 = tpu.matmul %198, %200, %cst_190 {dimension_numbers = #tpu.dot_dimension_numbers<[1], [0], [0], [1], [0, 0, 1, 1], [], []>} : vector<256x26xbf16>, vector<26x32xbf16>, vector<256x32xf32> -> vector<256x32xf32>
    %202 = arith.addf %195, %201 : vector<256x32xf32>
    %c4_191 = arith.constant 4 : index
    %c3_192 = arith.constant 3 : index
    %c0_193 = arith.constant 0 : index
    %203 = vector.load %arg8[%c4_191, %c3_192, %c0_193] : memref<20x20x26xf32, #tpu.memory_space<vmem>>, vector<16x16x26xf32>
    %204 = vector.shape_cast %203 : vector<16x16x26xf32> to vector<256x26xf32>
    %205 = arith.truncf %204 : vector<256x26xf32> to vector<256x26xbf16>
    %c23 = arith.constant 23 : index
    %c0_194 = arith.constant 0 : index
    %c0_195 = arith.constant 0 : index
    %206 = vector.load %arg4[%c23, %c0_194, %c0_195] : memref<25x26x32xbf16, #tpu.memory_space<vmem>>, vector<1x26x32xbf16>
    %207 = vector.shape_cast %206 : vector<1x26x32xbf16> to vector<26x32xbf16>
    %cst_196 = arith.constant dense<0.000000e+00> : vector<256x32xf32>
    %208 = tpu.matmul %205, %207, %cst_196 {dimension_numbers = #tpu.dot_dimension_numbers<[1], [0], [0], [1], [0, 0, 1, 1], [], []>} : vector<256x26xbf16>, vector<26x32xbf16>, vector<256x32xf32> -> vector<256x32xf32>
    %209 = arith.addf %202, %208 : vector<256x32xf32>
    %c4_197 = arith.constant 4 : index
    %c4_198 = arith.constant 4 : index
    %c0_199 = arith.constant 0 : index
    %210 = vector.load %arg8[%c4_197, %c4_198, %c0_199] : memref<20x20x26xf32, #tpu.memory_space<vmem>>, vector<16x16x26xf32>
    %211 = vector.shape_cast %210 : vector<16x16x26xf32> to vector<256x26xf32>
    %212 = arith.truncf %211 : vector<256x26xf32> to vector<256x26xbf16>
    %c24 = arith.constant 24 : index
    %c0_200 = arith.constant 0 : index
    %c0_201 = arith.constant 0 : index
    %213 = vector.load %arg4[%c24, %c0_200, %c0_201] : memref<25x26x32xbf16, #tpu.memory_space<vmem>>, vector<1x26x32xbf16>
    %214 = vector.shape_cast %213 : vector<1x26x32xbf16> to vector<26x32xbf16>
    %cst_202 = arith.constant dense<0.000000e+00> : vector<256x32xf32>
    %215 = tpu.matmul %212, %214, %cst_202 {dimension_numbers = #tpu.dot_dimension_numbers<[1], [0], [0], [1], [0, 0, 1, 1], [], []>} : vector<256x26xbf16>, vector<26x32xbf16>, vector<256x32xf32> -> vector<256x32xf32>
    %216 = arith.addf %209, %215 : vector<256x32xf32>
    %c0_203 = arith.constant 0 : index
    %c0_204 = arith.constant 0 : index
    %217 = vector.load %arg5[%c0_203, %c0_204] : memref<1x32xf32, #tpu.memory_space<vmem>>, vector<1x32xf32>
    %218 = vector.broadcast %217 : vector<1x32xf32> to vector<256x32xf32>
    %219 = arith.addf %216, %218 : vector<256x32xf32>
    %cst_205 = arith.constant 0.000000e+00 : f32
    %220 = vector.broadcast %cst_205 : f32 to vector<256x32xf32>
    %221 = arith.maximumf %219, %220 : vector<256x32xf32>
    %222 = vector.shape_cast %221 : vector<256x32xf32> to vector<1x16x16x32xf32>
    %c0_206 = arith.constant 0 : index
    %c0_207 = arith.constant 0 : index
    %c0_208 = arith.constant 0 : index
    %c0_209 = arith.constant 0 : index
    %223 = vector.load %arg6[%c0_206, %c0_207, %c0_208, %c0_209] : memref<1x16x16x32xf32, #tpu.memory_space<vmem>>, vector<1x16x16x32xf32>
    tpu.vector_store %arg6[%c0_206, %c0_207, %c0_208, %c0_209], %222 {strides = array<i32>} : memref<1x16x16x32xf32, #tpu.memory_space<vmem>>, vector<1x16x16x32xf32>,
    return
  }
  func.func @transform_0(%arg0: i32) -> (i32, i32, i32, i32) {
    %c0_i32 = arith.constant 0 : i32
    %c0_i32_0 = arith.constant 0 : i32
    %c0_i32_1 = arith.constant 0 : i32
    %c0_i32_2 = arith.constant 0 : i32
    return %arg0, %c0_i32, %c0_i32_0, %c0_i32_1 : i32, i32, i32, i32
  }
  func.func @transform_1(%arg0: i32) -> (i32, i32, i32) {
    %c0_i32 = arith.constant 0 : i32
    %c0_i32_0 = arith.constant 0 : i32
    %c0_i32_1 = arith.constant 0 : i32
    %c0_i32_2 = arith.constant 0 : i32
    return %c0_i32, %c0_i32_0, %c0_i32_1 : i32, i32, i32
  }
  func.func @transform_2(%arg0: i32) -> (i32, i32) {
    %c0_i32 = arith.constant 0 : i32
    %c0_i32_0 = arith.constant 0 : i32
    %c0_i32_1 = arith.constant 0 : i32
    return %c0_i32, %c0_i32_0 : i32, i32
  }
  func.func @transform_3(%arg0: i32) -> (i32, i32, i32) {
    %c0_i32 = arith.constant 0 : i32
    %c0_i32_0 = arith.constant 0 : i32
    %c0_i32_1 = arith.constant 0 : i32
    %c0_i32_2 = arith.constant 0 : i32
    return %c0_i32, %c0_i32_0, %c0_i32_1 : i32, i32, i32
  }
  func.func @transform_4(%arg0: i32) -> (i32, i32) {
    %c0_i32 = arith.constant 0 : i32
    %c0_i32_0 = arith.constant 0 : i32
    %c0_i32_1 = arith.constant 0 : i32
    return %c0_i32, %c0_i32_0 : i32, i32
  }
  func.func @transform_5(%arg0: i32) -> (i32, i32, i32, i32) {
    %c0_i32 = arith.constant 0 : i32
    %c0_i32_0 = arith.constant 0 : i32
    %c0_i32_1 = arith.constant 0 : i32
    %c0_i32_2 = arith.constant 0 : i32
    return %arg0, %c0_i32, %c0_i32_0, %c0_i32_1 : i32, i32, i32, i32
  }
}

</mosaic_0001>

<bundles_post_ra>
// kernel: inception_forward.1
= control target key start
LH: loop header
LB: loop body
LE: loop exit
PB: predicated region body
PF: predicated region fallthrough
CT: control target
= control target key end

     0   :  { %10 = vsyncpa [#allocation5], 0  ;;  %s14423_s0 = inlined_call_operand.vmem [shape: f32[2,16,16,4], index: 0, kind: input, shape index: {}]   ;;  %s14424_s1 = inlined_call_operand.vmem [shape: bf16[2,4,26], index: 1, kind: input, shape index: {}]   ;;  %s14425_s2 = inlined_call_operand.vmem [shape: f32[1,26], index: 2, kind: input, shape index: {}]   ;;  %s14426_s3 = inlined_call_operand.vmem [shape: bf16[25,26,32], index: 3, kind: input, shape index: {}]   ;;  %s14427_s4 = inlined_call_operand.vmem [shape: f32[1,32], index: 4, kind: input, shape index: {}]   ;;  %s14428_s5 = inlined_call_operand.hbm [shape: f32[2,16,16,32], index: 5, kind: output, shape index: {}]  }
   0x1   :  { %12 = vsyncpa [#allocation5 + $0x1], 0  ;;  %s12376_s18 = smov 0   ;;  %s12378_s19 = smov 0  }
   0x2   :  { %s12380_s20 = smov 0   ;;  %s12382_s21 = smov 0  }
   0x3 LB: > { %s12397_s22 = sadd.s32 4294967295, %s12339_s21   ;;  %s9303_s23 = sadd.s32 4294967294, %s12339_s21   ;;  %s12339_s21 = sphi %s12382_s21, %s14464_s21   ;;  %s12335_s20 = sphi %s12380_s20, %s14463_s20   ;;  %s12331_s19 = sphi %s12378_s19, %s14462_s19   ;;  %s12327_s18 = sphi %s12376_s18, %s14461_s18  }
   0x4   : > { %s12401_s24 = sadd.s32 1, %s12339_s21   ;;  %s135_s25 = sadd.s32 1, %s12335_s20 }
   0x5   : > { %s132_s26 = ssub.s32 %s12339_s21, %s12401_s24  ;;  %p145_p0 = scmp.ne.s32.totalorder %s12335_s20, %s12331_s19 }
   0x6   : > { %p133_p1 = scmp.eq.s32.totalorder %s132_s26, 0  ;;  %p146_p2 = scmp.eq.s32.totalorder %s12397_s22, 1 }
   0x7   : > { %p151_p3 = scmp.ne.s32.totalorder %s12331_s19, %s12327_s18  ;;  %p152_p4 = scmp.eq.s32.totalorder %s9303_s23, 1 }
   0x8   : > { %s12412_s27 = scalar_select %p133_p1, %s12335_s20, %s135_s25  }
   0x9   : > { %p12414_p5 = por %p146_p2, %p145_p0  ;;  %p12418_p6 = por %p152_p4, %p151_p3 }
   0xa   : > { %p9306_p7 = scmp.ge.s32.totalorder %s12339_s21, 1  ;;  %p190_p8 = scmp.lt.s32.totalorder %s12339_s21, 3 }
   0xc   : > { %p191_p9 = pnand %p9306_p7, %p190_p8 }
   0xe   : > { %194 = sbr.rel (%p191_p9) target bundleno = 1499 (0x5db), region = 40 }
  0x15   : > { %v9310_v0 = vld [vmem:[%s14424_s1 + $0x2] sm:$0x3]  ;;  %vm941_vm0 = vcmask 1041408   ;;  %p218_p10 = scmp.lt.s32.totalorder %s12397_s22, 1  ;;  %vm256_vm1 = vcmask 31744   ;;  %vm259_vm2 = vcmask 25600  }
  0x16   : > { %12154 = vmatprep.subr.msk.bf16.mxu0 %vm941_vm0, %v9310_v0  ;;  %v943_v1 = vsel %vm941_vm0, %v9310_v0, 0  ;;  %v12433_v2 = vld [vmem:[%s14424_s1] sm:$0x3]  ;;  %v12341_v3 = vmov -3.4028235e+38   ;;  %vm1389_vm3 = vcmask 211968  }
  0x17   : > { %10383 = vmatpush3.bf16.msra.mxu0 %v943_v1  ;;  %s12436_s9 = scalar_select %p218_p10, %s12397_s22, 1  ;;  %257 = vst.msk [vmem:[#allocation2] sm:$0xff] %vm256_vm1, %v12341_v3  ;;  %258 = vst.msk [vmem:[#allocation2 + $0x8] sm:$0xff] %vm256_vm1, %v12341_v3  ;;  %v12616_v59 = vsel %vm941_vm0, %v12433_v2, 0  ;;  %vm1392_vm4 = vcmask 207872   ;;  %vm1648_vm5 = vcmask 1044480  }
  0x18   : > { %260 = vst.msk [vmem:[#allocation2 + $0x10] sm:$0x3] %vm259_vm2, %v12341_v3  ;;  %263 = vst.msk [vmem:[#allocation2 + $0x28] sm:$0x3] %vm259_vm2, %v12341_v3  ;;  %12155 = vmatprep.subr.msk.bf16.mxu0 %vm941_vm0, %v12433_v2  ;;  %s215_s8 = sand.u32 1, %s12331_s19   ;;  %vm9194_vm6 = vcmask 261120  }
  0x19   : > { %261 = vst.msk [vmem:[#allocation2 + $0x18] sm:$0xff] %vm256_vm1, %v12341_v3  ;;  %262 = vst.msk [vmem:[#allocation2 + $0x20] sm:$0xff] %vm256_vm1, %v12341_v3  ;;  %s9896_s10 = sshll.u32 %s12436_s9, 8  ;;  %s9307_s11 = sshll.u32 %s215_s8, 8 }
  0x1a   : > { %264 = vst.msk [vmem:[#allocation2 + $0x30] sm:$0xff] %vm256_vm1, %v12341_v3  ;;  %265 = vst.msk [vmem:[#allocation2 + $0x38] sm:$0xff] %vm256_vm1, %v12341_v3  ;;  %s12498_s13 = scalar_lea.vmem %s14423_s0, %s9896_s10  ;;  %s14257_s12 = scalar_lea.vmem [#allocation4], %s9307_s11 }
  0x1b   : > { %266 = vst.msk [vmem:[#allocation2 + $0x40] sm:$0x3] %vm259_vm2, %v12341_v3  ;;  %269 = vst.msk [vmem:[#allocation2 + $0x58] sm:$0x3] %vm259_vm2, %v12341_v3  ;;  %v12501_v4 = vld [vmem:[%s12498_s13] sm:$0xff]  ;;  %v12504_v5 = vld [vmem:[%s12498_s13 + $0x8] sm:$0xff] }
  0x1c   : > { %267 = vst.msk [vmem:[#allocation2 + $0x48] sm:$0xff] %vm256_vm1, %v12341_v3  ;;  %268 = vst.msk [vmem:[#allocation2 + $0x50] sm:$0xff] %vm256_vm1, %v12341_v3  ;;  %v12507_v6 = vld [vmem:[%s12498_s13 + $0x10] sm:$0xff]  ;;  %v12510_v7 = vld [vmem:[%s12498_s13 + $0x18] sm:$0xff]  ;;  %s9241_s14 = sshll.u32 %s14257_s12, 4  ;;  %s12343_s25 = smov [#allocation4]   ;;  %s14372_s14 = int_to_ptr.vmem [resolvable:$true] %s9241_s14 }
  0x1d   : > { %270 = vst.msk [vmem:[#allocation2 + $0x60] sm:$0xff] %vm256_vm1, %v12341_v3  ;;  %271 = vst.msk [vmem:[#allocation2 + $0x68] sm:$0xff] %vm256_vm1, %v12341_v3  ;;  %v12519_v8 = vld [vmem:[%s12498_s13 + $0x20] sm:$0xff]  ;;  %v12522_v9 = vld [vmem:[%s12498_s13 + $0x28] sm:$0xff]  ;;  %s12277_s23 = scalar_lea.vmem %s14372_s14, 4096  ;;  %s12281_s26 = sshll.u32 %s12343_s25, 4  ;;  %s12282_s26 = int_to_ptr.vmem [resolvable:$false] %s12281_s26 }
  0x1e   : > { %272 = vst.msk [vmem:[#allocation2 + $0x70] sm:$0x3] %vm259_vm2, %v12341_v3  ;;  %275 = vst.msk [vmem:[#allocation2 + $0x88] sm:$0x3] %vm259_vm2, %v12341_v3  ;;  %v12533_v11 = vld [vmem:[%s12498_s13 + $0x30] sm:$0xff]  ;;  %v12536_v12 = vld [vmem:[%s12498_s13 + $0x38] sm:$0xff]  ;;  %p12278_p11 = scmp.ne.s32.totalorder %s14372_s14, %s12277_s23  ;;  %p12284_p0 = scmp.lt.s32.totalorder %s14372_s14, %s12282_s26 }
  0x1f   : > { %273 = vst.msk [vmem:[#allocation2 + $0x78] sm:$0xff] %vm256_vm1, %v12341_v3  ;;  %274 = vst.msk [vmem:[#allocation2 + $0x80] sm:$0xff] %vm256_vm1, %v12341_v3  ;;  %v12539_v13 = vld [vmem:[%s12498_s13 + $0x40] sm:$0xff]  ;;  %v346_v17 = vld [vmem:[#allocation2 + $0x8] sm:$0xff]  ;;  %s12283_s30 = scalar_lea.vmem %s12282_s26, 8192 }
  0x20   : > { %276 = vst.msk [vmem:[#allocation2 + $0x90] sm:$0xff] %vm256_vm1, %v12341_v3  ;;  %277 = vst.msk [vmem:[#allocation2 + $0x98] sm:$0xff] %vm256_vm1, %v12341_v3  ;;  %v345_v16 = vld [vmem:[#allocation2] sm:$0xff]  ;;  %v378_v21 = vmax.f32 %v12504_v5, %v346_v17  ;;  %v410_v22 = vld [vmem:[#allocation2 + $0x9] sm:$0xff]  ;;  %p12279_p12 = pnand %p12278_p11, %p12414_p5  ;;  %p12285_p1 = scmp.lt.s32.totalorder %s12283_s30, %s12277_s23 }
  0x21   : > { %278 = vst.msk [vmem:[#allocation2 + $0xa0] sm:$0x3] %vm259_vm2, %v12341_v3  ;;  %281 = vst.msk [vmem:[#allocation2 + $0xb8] sm:$0x3] %vm259_vm2, %v12341_v3  ;;  %v409_v18 = vld [vmem:[#allocation2 + $0x1] sm:$0xff]  ;;  %v377_v20 = vmax.f32 %v12501_v4, %v345_v16  ;;  %v474_v24 = vld [vmem:[#allocation2 + $0xa] sm:$0xff] }
  0x22   : > { %279 = vst.msk [vmem:[#allocation2 + $0xa8] sm:$0xff] %vm256_vm1, %v12341_v3  ;;  %280 = vst.msk [vmem:[#allocation2 + $0xb0] sm:$0xff] %vm256_vm1, %v12341_v3  ;;  %v473_v23 = vld [vmem:[#allocation2 + $0x2] sm:$0xff]  ;;  %v12559_v26 = vld [vmem:[%s12498_s13 + $0x50] sm:$0xff]  ;;  %v442_v29 = vmax.f32 %v378_v21, %v410_v22  ;;  %p12280_p13 = pneg %p12279_p12  ;;  %p12286_p2 = por %p12285_p1, %p12284_p0 }
  0x23   : > { %282 = vst.msk [vmem:[#allocation2 + $0xc0] sm:$0xff] %vm256_vm1, %v12341_v3  ;;  %283 = vst.msk [vmem:[#allocation2 + $0xc8] sm:$0xff] %vm256_vm1, %v12341_v3  ;;  %v12556_v25 = vld [vmem:[%s12498_s13 + $0x48] sm:$0xff]  ;;  %v12562_v27 = vld [vmem:[%s12498_s13 + $0x58] sm:$0xff]  ;;  %v441_v28 = vmax.f32 %v377_v20, %v409_v18 }
  0x24   : > { %284 = vst.msk [vmem:[#allocation2 + $0xd0] sm:$0x3] %vm259_vm2, %v12341_v3  ;;  %287 = vst.msk [vmem:[#allocation2 + $0xe8] sm:$0x3] %vm259_vm2, %v12341_v3  ;;  %v12571_v30 = vld [vmem:[%s12498_s13 + $0x60] sm:$0xff]  ;;  %v12574_v31 = vld [vmem:[%s12498_s13 + $0x68] sm:$0xff]  ;;  %v506_v40 = vmax.f32 %v442_v29, %v474_v24  ;;  %p12287_p3 = pnand %p12286_p2, %p12280_p13 }
  0x25   : > { %285 = vst.msk [vmem:[#allocation2 + $0xd8] sm:$0xff] %vm256_vm1, %v12341_v3  ;;  %286 = vst.msk [vmem:[#allocation2 + $0xe0] sm:$0xff] %vm256_vm1, %v12341_v3  ;;  %v12577_v32 = vld [vmem:[%s12498_s13 + $0x70] sm:$0xff]  ;;  %v12588_v35 = vld [vmem:[%s12498_s13 + $0x78] sm:$0xff]  ;;  %v505_v39 = vmax.f32 %v441_v28, %v473_v23 }
  0x26   : > { %288 = vst.msk [vmem:[#allocation2 + $0xf0] sm:$0xff] %vm256_vm1, %v12341_v3  ;;  %289 = vst.msk [vmem:[#allocation2 + $0xf8] sm:$0xff] %vm256_vm1, %v12341_v3  ;;  %v12593_v36 = vld [vmem:[%s12498_s13 + $0x80] sm:$0xff]  ;;  %v12596_v37 = vld [vmem:[%s12498_s13 + $0x88] sm:$0xff] }
  0x27   : > { %290 = vst.msk [vmem:[#allocation2 + $0x100] sm:$0x3] %vm259_vm2, %v12341_v3  ;;  %293 = vst.msk [vmem:[#allocation2 + $0x118] sm:$0x3] %vm259_vm2, %v12341_v3 }
  0x28   : > { %291 = vst.msk [vmem:[#allocation2 + $0x108] sm:$0xff] %vm256_vm1, %v12341_v3  ;;  %292 = vst.msk [vmem:[#allocation2 + $0x110] sm:$0xff] %vm256_vm1, %v12341_v3 }
  0x29   : > { %294 = vst.msk [vmem:[#allocation2 + $0x120] sm:$0xff] %vm256_vm1, %v12341_v3  ;;  %295 = vst.msk [vmem:[#allocation2 + $0x128] sm:$0xff] %vm256_vm1, %v12341_v3 }
  0x2a   : > { %296 = vst.msk [vmem:[#allocation2 + $0x130] sm:$0x3] %vm259_vm2, %v12341_v3  ;;  %299 = vst.msk [vmem:[#allocation2 + $0x148] sm:$0x3] %vm259_vm2, %v12341_v3 }
  0x2b   : > { %297 = vst.msk [vmem:[#allocation2 + $0x138] sm:$0xff] %vm256_vm1, %v12341_v3  ;;  %298 = vst.msk [vmem:[#allocation2 + $0x140] sm:$0xff] %vm256_vm1, %v12341_v3 }
  0x2c   : > { %300 = vst.msk [vmem:[#allocation2 + $0x150] sm:$0xff] %vm256_vm1, %v12341_v3  ;;  %301 = vst.msk [vmem:[#allocation2 + $0x158] sm:$0xff] %vm256_vm1, %v12341_v3 }
  0x2d   : > { %302 = vst.msk [vmem:[#allocation2 + $0x160] sm:$0x3] %vm259_vm2, %v12341_v3  ;;  %305 = vst.msk [vmem:[#allocation2 + $0x178] sm:$0x3] %vm259_vm2, %v12341_v3 }
  0x2e   : > { %303 = vst.msk [vmem:[#allocation2 + $0x168] sm:$0xff] %vm256_vm1, %v12341_v3  ;;  %304 = vst.msk [vmem:[#allocation2 + $0x170] sm:$0xff] %vm256_vm1, %v12341_v3 }
  0x2f   : > { %306 = vst.msk [vmem:[#allocation2 + $0x180] sm:$0xff] %vm256_vm1, %v12341_v3  ;;  %307 = vst.msk [vmem:[#allocation2 + $0x188] sm:$0xff] %vm256_vm1, %v12341_v3 }
  0x30   : > { %308 = vst.msk [vmem:[#allocation2 + $0x190] sm:$0x3] %vm259_vm2, %v12341_v3  ;;  %311 = vst.msk [vmem:[#allocation2 + $0x1a8] sm:$0x3] %vm259_vm2, %v12341_v3 }
  0x31   : > { %309 = vst.msk [vmem:[#allocation2 + $0x198] sm:$0xff] %vm256_vm1, %v12341_v3  ;;  %310 = vst.msk [vmem:[#allocation2 + $0x1a0] sm:$0xff] %vm256_vm1, %v12341_v3 }
  0x32   : > { %313 = vst.msk [vmem:[#allocation2 + $0x19] sm:$0xff] %vm256_vm1, %v12501_v4  ;;  %314 = vst.msk [vmem:[#allocation2 + $0x21] sm:$0xff] %vm256_vm1, %v12504_v5 }
  0x33   : > { %315 = vst.msk [vmem:[#allocation2 + $0x31] sm:$0xff] %vm256_vm1, %v12507_v6  ;;  %316 = vst.msk [vmem:[#allocation2 + $0x39] sm:$0xff] %vm256_vm1, %v12510_v7 }
  0x34   : > { %317 = vst.msk [vmem:[#allocation2 + $0x49] sm:$0xff] %vm256_vm1, %v12519_v8  ;;  %318 = vst.msk [vmem:[#allocation2 + $0x51] sm:$0xff] %vm256_vm1, %v12522_v9 }
  0x35   : > { %319 = vst.msk [vmem:[#allocation2 + $0x61] sm:$0xff] %vm256_vm1, %v12533_v11  ;;  %320 = vst.msk [vmem:[#allocation2 + $0x69] sm:$0xff] %vm256_vm1, %v12536_v12 }
  0x36   : > { %321 = vst.msk [vmem:[#allocation2 + $0x79] sm:$0xff] %vm256_vm1, %v12539_v13  ;;  %14438 = vst [vmem:[#allocation7_spill] sm:$0xff] %v12559_v26 }
  0x37   : > { %322 = vst.msk [vmem:[#allocation2 + $0x81] sm:$0xff] %vm256_vm1, %v12556_v25  ;;  %323 = vst.msk [vmem:[#allocation2 + $0x91] sm:$0xff] %vm256_vm1, %v12559_v26 }
  0x38   : > { %324 = vst.msk [vmem:[#allocation2 + $0x99] sm:$0xff] %vm256_vm1, %v12562_v27  ;;  %14439 = vst [vmem:[#allocation8_spill] sm:$0xff] %v12571_v30 }
  0x39   : > { %14440 = vst [vmem:[#allocation9_spill] sm:$0xff] %v12574_v31  ;;  %14441 = vst [vmem:[#allocation10_spill] sm:$0xff] %v12577_v32  ;;  %v537_v41 = vld [vmem:[#allocation2 + $0x18] sm:$0xff]  ;;  %v538_v42 = vld [vmem:[#allocation2 + $0x20] sm:$0xff] }
  0x3a   : > { %325 = vst.msk [vmem:[#allocation2 + $0xa9] sm:$0xff] %vm256_vm1, %v12571_v30  ;;  %326 = vst.msk [vmem:[#allocation2 + $0xb1] sm:$0xff] %vm256_vm1, %v12574_v31  ;;  %v666_v45 = vld [vmem:[#allocation2 + $0x30] sm:$0xff]  ;;  %v667_v46 = vld [vmem:[#allocation2 + $0x38] sm:$0xff]  ;;  %v379_v47 = vmax.f32 %v12507_v6, %v537_v41  ;;  %v380_v48 = vmax.f32 %v12510_v7, %v538_v42  ;;  %v569_v49 = vmax.f32 %v505_v39, %v537_v41 }
  0x3b   : > { %14442 = vst [vmem:[#allocation11_spill] sm:$0xff] %v12588_v35  ;;  %327 = vst.msk [vmem:[#allocation2 + $0xc1] sm:$0xff] %vm256_vm1, %v12577_v32  ;;  %v570_v50 = vmax.f32 %v506_v40, %v538_v42  ;;  %v601_v51 = vld [vmem:[#allocation2 + $0x1a] sm:$0xff]  ;;  %v730_v52 = vld [vmem:[#allocation2 + $0x31] sm:$0xff]  ;;  %v381_v54 = vmax.f32 %v12519_v8, %v666_v45  ;;  %v382_v55 = vmax.f32 %v12522_v9, %v667_v46 }
  0x3c   : > { %14443 = vst [vmem:[#allocation12_spill] sm:$0xff] %v12593_v36  ;;  %14444 = vst [vmem:[#allocation13_spill] sm:$0xff] %v12596_v37  ;;  %v731_v53 = vld [vmem:[#allocation2 + $0x39] sm:$0xff]  ;;  %v602_v56 = vld [vmem:[#allocation2 + $0x22] sm:$0xff]  ;;  %v633_v60 = vmax.f32 %v569_v49, %v601_v51 }
  0x3d   : > { %328 = vst.msk [vmem:[#allocation2 + $0xc9] sm:$0xff] %vm256_vm1, %v12588_v35  ;;  %329 = vst.msk [vmem:[#allocation2 + $0xd9] sm:$0xff] %vm256_vm1, %v12593_v36  ;;  %v411_v57 = vld [vmem:[#allocation2 + $0x19] sm:$0xff]  ;;  %v412_v58 = vld [vmem:[#allocation2 + $0x21] sm:$0xff]  ;;  %v634_v61 = vmax.f32 %v570_v50, %v602_v56  ;;  %v445_v18 = vmax.f32 %v381_v54, %v730_v52  ;;  %v446_v20 = vmax.f32 %v382_v55, %v731_v53 }
  0x3e   : > { %330 = vst.msk [vmem:[#allocation2 + $0xe1] sm:$0xff] %vm256_vm1, %v12596_v37  ;;  %v443_v62 = vmax.f32 %v379_v47, %v411_v57  ;;  %v444_v63 = vmax.f32 %v380_v48, %v412_v58  ;;  %v668_v0 = vld [vmem:[#allocation2 + $0x48] sm:$0xff]  ;;  %v669_v1 = vld [vmem:[#allocation2 + $0x50] sm:$0xff]  ;;  %v698_v23 = vmax.f32 %v633_v60, %v666_v45  ;;  %v795_v28 = vld [vmem:[#allocation2 + $0x3a] sm:$0xff] }
  0x3f   : > { %v732_v3 = vld [vmem:[#allocation2 + $0x49] sm:$0xff]  ;;  %v794_v16 = vld [vmem:[#allocation2 + $0x32] sm:$0xff]  ;;  %v383_v21 = vmax.f32 %v12533_v11, %v668_v0  ;;  %v384_v22 = vmax.f32 %v12536_v12, %v669_v1  ;;  %v699_v24 = vmax.f32 %v634_v61, %v667_v46  ;;  %v510_v42 = vmax.f32 %v446_v20, %v795_v28  ;;  %v670_v55 = vld [vmem:[#allocation2 + $0x60] sm:$0xff] }
  0x40   : > { %v733_v17 = vld [vmem:[#allocation2 + $0x51] sm:$0xff]  ;;  %v507_v2 = vmax.f32 %v443_v62, %v601_v51  ;;  %v508_v29 = vmax.f32 %v444_v63, %v602_v56  ;;  %v509_v41 = vmax.f32 %v445_v18, %v794_v16  ;;  %v762_v49 = vmax.f32 %v698_v23, %v730_v52  ;;  %v671_v58 = vld [vmem:[#allocation2 + $0x68] sm:$0xff] }
  0x41   : > { %v796_v39 = vld [vmem:[#allocation2 + $0x4a] sm:$0xff]  ;;  %v797_v40 = vld [vmem:[#allocation2 + $0x52] sm:$0xff]  ;;  %v447_v47 = vmax.f32 %v383_v21, %v732_v3  ;;  %v448_v48 = vmax.f32 %v384_v22, %v733_v17  ;;  %v763_v50 = vmax.f32 %v699_v24, %v731_v53  ;;  %v574_v43 = vmax.f32 %v510_v42, %v669_v1  ;;  %v798_v62 = vld [vmem:[#allocation2 + $0x62] sm:$0xff] }
  0x42   : > { %v571_v57 = vmax.f32 %v507_v2, %v666_v45  ;;  %v572_v54 = vmax.f32 %v508_v29, %v667_v46  ;;  %v573_v44 = vmax.f32 %v509_v41, %v668_v0  ;;  %v826_v61 = vmax.f32 %v762_v49, %v794_v16  ;;  %v12620_v63 = vld [vmem:[#allocation2 + $0x6a] sm:$0xff]  ;;  %v734_v21 = vld [vmem:[#allocation2 + $0x61] sm:$0xff]  ;;  %v736_v49 = vld [vmem:[#allocation2 + $0x79] sm:$0xff] }
  0x43   : > { %v511_v38 = vmax.f32 %v447_v47, %v796_v39  ;;  %v512_v60 = vmax.f32 %v448_v48, %v797_v40  ;;  %v827_v34 = vmax.f32 %v763_v50, %v795_v28  ;;  %v638_v20 = vmax.f32 %v574_v43, %v797_v40  ;;  %v735_v29 = vld [vmem:[#allocation2 + $0x69] sm:$0xff]  ;;  %v673_v43 = vld [vmem:[#allocation2 + $0x80] sm:$0xff] }
  0x44   : > { %v635_v51 = vmax.f32 %v571_v57, %v794_v16  ;;  %v636_v56 = vmax.f32 %v572_v54, %v795_v28  ;;  %v637_v18 = vmax.f32 %v573_v44, %v796_v39  ;;  %v385_v23 = vmax.f32 %v12539_v13, %v670_v55  ;;  %v672_v44 = vld [vmem:[#allocation2 + $0x78] sm:$0xff]  ;;  %v737_v54 = vld [vmem:[#allocation2 + $0x81] sm:$0xff] }
  0x45   : > { %v575_v52 = vmax.f32 %v511_v38, %v670_v55  ;;  %v576_v53 = vmax.f32 %v512_v60, %v671_v58  ;;  %v874_v45 = vpack.c.bf16 %v827_v34, %v826_v61  ;;  %v703_v2 = vmax.f32 %v638_v20, %v671_v58  ;;  %v12628_v60 = vld [vmem:[#allocation2 + $0x82] sm:$0xff]  ;;  %v12633_v20 = vld [vmem:[#allocation2 + $0x98] sm:$0xff] }
  0x46   : > { %v700_v46 = vmax.f32 %v635_v51, %v668_v0  ;;  %v701_v22 = vmax.f32 %v636_v56, %v669_v1  ;;  %v702_v24 = vmax.f32 %v637_v18, %v670_v55  ;;  %v386_v38 = vmax.f32 %v12556_v25, %v671_v58  ;;  %v12626_v55 = vld [vmem:[#allocation2 + $0x7a] sm:$0xff]  ;;  %v12631_v18 = vld [vmem:[#allocation2 + $0x90] sm:$0xff] }
  0x47   : > { %v639_v41 = vmax.f32 %v575_v52, %v798_v62  ;;  %v640_v16 = vmax.f32 %v576_v53, %v12620_v63  ;;  %10384 = vmatprep.mubr.msk.bf16.mxu0 %vm256_vm1, %v874_v45  ;;  %v449_v47 = vmax.f32 %v385_v23, %v734_v21  ;;  %v767_v0 = vmax.f32 %v703_v2, %v735_v29  ;;  %v12638_v53 = vld [vmem:[#allocation2 + $0x99] sm:$0xff]  ;;  %v12641_v45 = vld [vmem:[#allocation2 + $0xa8] sm:$0xff] }
  0x48   : > { %v764_v28 = vmax.f32 %v700_v46, %v732_v3  ;;  %v765_v42 = vmax.f32 %v701_v22, %v733_v17  ;;  %v766_v34 = vmax.f32 %v702_v24, %v734_v21  ;;  %v450_v61 = vmax.f32 %v386_v38, %v735_v29  ;;  %v12643_v46 = vld [vmem:[#allocation2 + $0xb0] sm:$0xff]  ;;  %v12649_v23 = vld [vmem:[%s12498_s13 + $0x98] sm:$0xff]  ;;  %v12652_v24 = vld [vmem:[%s12498_s13 + $0xa0] sm:$0xff] }
  0x49   : > { %v704_v1 = vmax.f32 %v639_v41, %v672_v44  ;;  %v705_v48 = vmax.f32 %v640_v16, %v673_v43  ;;  %v513_v3 = vmax.f32 %v449_v47, %v798_v62  ;;  %v831_v58 = vmax.f32 %v767_v0, %v12620_v63  ;;  %v12646_v22 = vld [vmem:[%s12498_s13 + $0x90] sm:$0xff]  ;;  %332 = vst.msk [vmem:[#allocation2 + $0xf9] sm:$0xff] %vm256_vm1, %v12649_v23  ;;  %v12666_v16 = vld [vmem:[%s12498_s13 + $0xa8] sm:$0xff] }
  0x4a   : > { %v828_v50 = vmax.f32 %v764_v28, %v796_v39  ;;  %v829_v57 = vmax.f32 %v765_v42, %v797_v40  ;;  %v830_v17 = vmax.f32 %v766_v34, %v798_v62  ;;  %v12635_v39 = vld [vmem:[#allocation2 + $0x91] sm:$0xff]  ;;  %v514_v21 = vmax.f32 %v450_v61, %v12620_v63  ;;  %331 = vst.msk [vmem:[#allocation2 + $0xf1] sm:$0xff] %vm256_vm1, %v12646_v22  ;;  %v12678_v34 = vld [vmem:[#allocation2 + $0xa9] sm:$0xff] }
  0x4b   : > { %v768_v51 = vmax.f32 %v704_v1, %v736_v49  ;;  %v769_v56 = vmax.f32 %v705_v48, %v737_v54  ;;  %v577_v52 = vmax.f32 %v513_v3, %v672_v44  ;;  %v387_v62 = vmax.f32 %v12559_v26, %v672_v44  ;;  %333 = vst.msk [vmem:[#allocation2 + $0x109] sm:$0xff] %vm256_vm1, %v12652_v24  ;;  %v12671_v28 = vld [vmem:[%s12498_s13 + $0xb0] sm:$0xff]  ;;  %v12674_v42 = vld [vmem:[%s12498_s13 + $0xb8] sm:$0xff]  ;;  %v12692_v1 = vld [vmem:[%s12498_s13 + $0xc8] sm:$0xff] }
  0x4c   : > { %v875_v40 = vpack.c.bf16 %v829_v57, %v828_v50  ;;  %v876_v2 = vpack.c.bf16 %v831_v58, %v830_v17  ;;  %v388_v41 = vmax.f32 %v12562_v27, %v673_v43  ;;  %v578_v44 = vmax.f32 %v514_v21, %v673_v43  ;;  %334 = vst.msk [vmem:[#allocation2 + $0x111] sm:$0xff] %vm256_vm1, %v12666_v16  ;;  %v12689_v43 = vld [vmem:[%s12498_s13 + $0xc0] sm:$0xff]  ;;  %v12695_v48 = vld [vmem:[%s12498_s13 + $0xd0] sm:$0xff]  ;;  %v12708_v61 = vld [vmem:[%s12498_s13 + $0xd8] sm:$0xff] }
  0x4d   : > { %v12655_v63 = vmax.f32 %v768_v51, %v12626_v55  ;;  %v12658_v29 = vmax.f32 %v769_v56, %v12628_v60  ;;  %v641_v38 = vmax.f32 %v577_v52, %v12626_v55  ;;  %v451_v47 = vmax.f32 %v387_v62, %v736_v49  ;;  %335 = vst.msk [vmem:[#allocation2 + $0x121] sm:$0xff] %vm256_vm1, %v12671_v28  ;;  %v12716_v3 = vld [vmem:[%s12498_s13 + $0xe8] sm:$0xff]  ;;  %v12721_v51 = vld [vmem:[#allocation2 + $0xb1] sm:$0xff]  ;;  %v803_v62 = vld [vmem:[#allocation2 + $0x9a] sm:$0xff] }
  0x4e   : > { %10385 = vmatmul.mubr.msk.bf16.vlgmr.msra.gmra.mrb[0].mxu0 %vm256_vm1, %v875_v40  ;;  %v389_v0 = vmax.f32 %v12571_v30, %v12631_v18  ;;  %336 = vst.msk [vmem:[#allocation2 + $0x129] sm:$0xff] %vm256_vm1, %v12674_v42  ;;  %v452_v50 = vmax.f32 %v388_v41, %v737_v54  ;;  %v390_v57 = vmax.f32 %v12574_v31, %v12633_v20  ;;  %337 = vst.msk [vmem:[#allocation2 + $0x139] sm:$0xff] %vm256_vm1, %v12689_v43  ;;  %v12731_v40 = vld [vmem:[%s12498_s13 + $0xf0] sm:$0xff]  ;;  %v12734_v21 = vld [vmem:[%s12498_s13 + $0xf8] sm:$0xff] }
  0x4f   : > { %10417 = vmatpush3.bf16.msra.mxu0 %v12616_v59  ;;  %10388 = vmatprep.mubr.msk.bf16.mxu0 %vm256_vm1, %v876_v2  ;;  %v877_v49 = vpack.c.bf16 %v12658_v29, %v12655_v63  ;;  %338 = vst.msk [vmem:[#allocation2 + $0x141] sm:$0xff] %vm256_vm1, %v12692_v1  ;;  %339 = vst.msk [vmem:[#allocation2 + $0x151] sm:$0xff] %vm256_vm1, %v12695_v48  ;;  %v12713_v59 = vld [vmem:[%s12498_s13 + $0xe0] sm:$0xff]  ;;  %v642_v54 = vmax.f32 %v578_v44, %v12628_v60  ;;  %v802_v52 = vld [vmem:[#allocation2 + $0x92] sm:$0xff]  ;;  %s9897_s13 = sshll.u32 %s12397_s22, 12  ;;  %s14382_s22 = scalar_lea.sflag [#allocation5], %s215_s8 }
  0x50   : > { %v706_v17 = vmax.f32 %v641_v38, %v12631_v18  ;;  %v515_v58 = vmax.f32 %v451_v47, %v12626_v55  ;;  %v453_v56 = vmax.f32 %v389_v0, %v12635_v39  ;;  %340 = vst.msk [vmem:[#allocation2 + $0x159] sm:$0xff] %vm256_vm1, %v12708_v61  ;;  %341 = vst.msk [vmem:[#allocation2 + $0x169] sm:$0xff] %vm256_vm1, %v12713_v59  ;;  %v804_v2 = vld [vmem:[#allocation2 + $0xaa] sm:$0xff]  ;;  %v805_v47 = vld [vmem:[#allocation2 + $0xb2] sm:$0xff]  ;;  %s14370_s17 = scalar_lea.hbm %s14428_s5, %s9897_s13 }
  0x51   : > { %342 = vst.msk [vmem:[#allocation2 + $0x171] sm:$0xff] %vm256_vm1, %v12716_v3  ;;  %v516_v55 = vmax.f32 %v452_v50, %v12628_v60  ;;  %v454_v63 = vmax.f32 %v390_v57, %v12638_v53  ;;  %v391_v29 = vmax.f32 %v12577_v32, %v12641_v45  ;;  %v392_v41 = vmax.f32 %v12588_v35, %v12643_v46  ;;  %v678_v50 = vld [vmem:[#allocation2 + $0xc0] sm:$0xff]  ;;  %v679_v35 = vld [vmem:[#allocation2 + $0xc8] sm:$0xff] }
  0x52   : > { %343 = vst.msk [vmem:[#allocation2 + $0x181] sm:$0xff] %vm256_vm1, %v12731_v40  ;;  %344 = vst.msk [vmem:[#allocation2 + $0x189] sm:$0xff] %vm256_vm1, %v12734_v21  ;;  %v707_v44 = vmax.f32 %v642_v54, %v12633_v20  ;;  %v770_v38 = vmax.f32 %v706_v17, %v12635_v39  ;;  %v579_v60 = vmax.f32 %v515_v58, %v12631_v18 }
  0x53   : > { %v517_v0 = vmax.f32 %v453_v56, %v802_v52  ;;  %v580_v57 = vmax.f32 %v516_v55, %v12633_v20  ;;  %v518_v33 = vmax.f32 %v454_v63, %v803_v62  ;;  %v455_v19 = vmax.f32 %v391_v29, %v12678_v34  ;;  %v806_v63 = vld [vmem:[#allocation2 + $0xc2] sm:$0xff]  ;;  %v807_v29 = vld [vmem:[#allocation2 + $0xca] sm:$0xff] }
  0x54   : > { %v456_v15 = vmax.f32 %v392_v41, %v12721_v51  ;;  %v771_v14 = vmax.f32 %v707_v44, %v12638_v53  ;;  %v834_v10 = vmax.f32 %v770_v38, %v802_v52  ;;  %v643_v32 = vmax.f32 %v579_v60, %v802_v52  ;;  %v742_v44 = vld [vmem:[#allocation2 + $0xc1] sm:$0xff]  ;;  %v743_v38 = vld [vmem:[#allocation2 + $0xc9] sm:$0xff] }
  0x55   : > { %v581_v54 = vmax.f32 %v517_v0, %v12641_v45  ;;  %v644_v39 = vmax.f32 %v580_v57, %v803_v62  ;;  %v582_v18 = vmax.f32 %v518_v33, %v12643_v46  ;;  %v519_v17 = vmax.f32 %v455_v19, %v804_v2  ;;  %v680_v57 = vld [vmem:[#allocation2 + $0xd8] sm:$0xff]  ;;  %v814_v30 = vld [vmem:[#allocation2 + $0x122] sm:$0xff] }
  0x56   : > { %v520_v58 = vmax.f32 %v456_v15, %v805_v47  ;;  %10389 = vmatmul.mubr.msk.bf16.gmra.mrb[4].mxu0 %vm256_vm1, %v877_v49  ;;  %v835_v20 = vmax.f32 %v771_v14, %v803_v62  ;;  %v708_v56 = vmax.f32 %v643_v32, %v12641_v45  ;;  %v393_v53 = vmax.f32 %v12593_v36, %v678_v50  ;;  %v750_v26 = vld [vmem:[#allocation2 + $0x121] sm:$0xff] }
  0x57   : > { %v645_v55 = vmax.f32 %v581_v54, %v804_v2  ;;  %v709_v52 = vmax.f32 %v644_v39, %v12643_v46  ;;  %v646_v41 = vmax.f32 %v582_v18, %v805_v47  ;;  %v583_v60 = vmax.f32 %v519_v17, %v678_v50  ;;  %v681_v39 = vld [vmem:[#allocation2 + $0xe0] sm:$0xff] }
  0x58   : > { %v584_v0 = vmax.f32 %v520_v58, %v679_v35  ;;  %v878_v33 = vpack.c.bf16 %v835_v20, %v834_v10  ;;  %v772_v15 = vmax.f32 %v708_v56, %v12678_v34  ;;  %v394_v14 = vmax.f32 %v12596_v37, %v679_v35  ;;  %v687_v37 = vld [vmem:[#allocation2 + $0x128] sm:$0xff] }
  0x59   : > { %v710_v19 = vmax.f32 %v645_v55, %v678_v50  ;;  %v773_v32 = vmax.f32 %v709_v52, %v12721_v51  ;;  %v711_v45 = vmax.f32 %v646_v41, %v679_v35  ;;  %v647_v49 = vmax.f32 %v583_v60, %v806_v63  ;;  %v744_v50 = vld [vmem:[#allocation2 + $0xd9] sm:$0xff]  ;;  %v745_v55 = vld [vmem:[#allocation2 + $0xe1] sm:$0xff]  ;;  %v682_v35 = vld [vmem:[#allocation2 + $0xf0] sm:$0xff] }
  0x5a   : > { %v648_v62 = vmax.f32 %v584_v0, %v807_v29  ;;  %10392 = vmatprep.mubr.msk.bf16.mxu0 %vm256_vm1, %v878_v33  ;;  %v836_v46 = vmax.f32 %v772_v15, %v804_v2  ;;  %v457_v18 = vmax.f32 %v393_v53, %v742_v44  ;;  %v458_v17 = vmax.f32 %v394_v14, %v743_v38  ;;  %v808_v33 = vld [vmem:[#allocation2 + $0xda] sm:$0xff]  ;;  %v809_v15 = vld [vmem:[#allocation2 + $0xe2] sm:$0xff] }
  0x5b   : > { %v774_v54 = vmax.f32 %v710_v19, %v742_v44  ;;  %v837_v58 = vmax.f32 %v773_v32, %v805_v47  ;;  %v775_v10 = vmax.f32 %v711_v45, %v743_v38  ;;  %v712_v20 = vmax.f32 %v647_v49, %v680_v57  ;;  %v683_v47 = vld [vmem:[#allocation2 + $0xf8] sm:$0xff]  ;;  %v684_v32 = vld [vmem:[#allocation2 + $0x108] sm:$0xff] }
  0x5c   : > { %v713_v34 = vmax.f32 %v648_v62, %v681_v39  ;;  %v521_v36 = vmax.f32 %v457_v18, %v806_v63  ;;  %v522_v51 = vmax.f32 %v458_v17, %v807_v29  ;;  %v395_v52 = vmax.f32 %v12646_v22, %v680_v57  ;;  %v746_v38 = vld [vmem:[#allocation2 + $0xf1] sm:$0xff]  ;;  %v747_v62 = vld [vmem:[#allocation2 + $0xf9] sm:$0xff] }
  0x5d   : > { %v838_v56 = vmax.f32 %v774_v54, %v806_v63  ;;  %v879_v41 = vpack.c.bf16 %v837_v58, %v836_v46  ;;  %v839_v60 = vmax.f32 %v775_v10, %v807_v29  ;;  %v776_v0 = vmax.f32 %v712_v20, %v744_v50  ;;  %v810_v18 = vld [vmem:[#allocation2 + $0xf2] sm:$0xff]  ;;  %v748_v58 = vld [vmem:[#allocation2 + $0x109] sm:$0xff]  ;;  %v811_v10 = vld [vmem:[#allocation2 + $0xfa] sm:$0xff] }
  0x5e   : > { %v777_v2 = vmax.f32 %v713_v34, %v745_v55  ;;  %v585_v53 = vmax.f32 %v521_v36, %v680_v57  ;;  %v586_v44 = vmax.f32 %v522_v51, %v681_v39  ;;  %v396_v19 = vmax.f32 %v12649_v23, %v681_v39  ;;  %v685_v57 = vld [vmem:[#allocation2 + $0x110] sm:$0xff] }
  0x5f   : > { %v459_v14 = vmax.f32 %v395_v52, %v744_v50  ;;  %10393 = vmatmul.mubr.msk.bf16.gmra.mrb[8].mxu0 %vm256_vm1, %v879_v41  ;;  %v880_v63 = vpack.c.bf16 %v839_v60, %v838_v56  ;;  %v840_v45 = vmax.f32 %v776_v0, %v808_v33  ;;  %v397_v29 = vmax.f32 %v12652_v24, %v682_v35  ;;  %v749_v20 = vld [vmem:[#allocation2 + $0x111] sm:$0xff] }
  0x60   : > { %v841_v49 = vmax.f32 %v777_v2, %v809_v15  ;;  %v649_v46 = vmax.f32 %v585_v53, %v808_v33  ;;  %v650_v54 = vmax.f32 %v586_v44, %v809_v15  ;;  %v460_v17 = vmax.f32 %v396_v19, %v745_v55  ;;  %v812_v34 = vld [vmem:[#allocation2 + $0x10a] sm:$0xff]  ;;  %v813_v2 = vld [vmem:[#allocation2 + $0x112] sm:$0xff]  ;;  %v686_v55 = vld [vmem:[#allocation2 + $0x120] sm:$0xff] }
  0x61   : > { %v523_v36 = vmax.f32 %v459_v14, %v808_v33  ;;  %10396 = vmatprep.mubr.msk.bf16.mxu0 %vm256_vm1, %v880_v63  ;;  %v398_v50 = vmax.f32 %v12666_v16, %v683_v47  ;;  %v461_v56 = vmax.f32 %v397_v29, %v746_v38  ;;  %v399_v51 = vmax.f32 %v12671_v28, %v684_v32 }
  0x62   : > { %v881_v39 = vpack.c.bf16 %v841_v49, %v840_v45  ;;  %v714_v52 = vmax.f32 %v649_v46, %v682_v35  ;;  %v715_v41 = vmax.f32 %v650_v54, %v683_v47  ;;  %v524_v60 = vmax.f32 %v460_v17, %v809_v15 }
  0x63   : > { %v587_v0 = vmax.f32 %v523_v36, %v682_v35  ;;  %v462_v33 = vmax.f32 %v398_v50, %v747_v62  ;;  %v525_v53 = vmax.f32 %v461_v56, %v810_v18  ;;  %v400_v44 = vmax.f32 %v12674_v42, %v685_v57  ;;  %v815_v50 = vld [vmem:[#allocation2 + $0x12a] sm:$0xff] }
  0x64   : > { %v463_v19 = vmax.f32 %v399_v51, %v748_v58  ;;  %v778_v14 = vmax.f32 %v714_v52, %v746_v38  ;;  %v779_v63 = vmax.f32 %v715_v41, %v747_v62  ;;  %v588_v45 = vmax.f32 %v524_v60, %v683_v47  ;;  %v751_v38 = vld [vmem:[#allocation2 + $0x129] sm:$0xff]  ;;  %v688_v52 = vld [vmem:[#allocation2 + $0x138] sm:$0xff] }
  0x65   : > { %v651_v49 = vmax.f32 %v587_v0, %v810_v18  ;;  %v526_v29 = vmax.f32 %v462_v33, %v811_v10  ;;  %v589_v31 = vmax.f32 %v525_v53, %v684_v32  ;;  %v464_v46 = vmax.f32 %v400_v44, %v749_v20 }
  0x66   : > { %v527_v54 = vmax.f32 %v463_v19, %v812_v34  ;;  %v842_v15 = vmax.f32 %v778_v14, %v810_v18  ;;  %v843_v35 = vmax.f32 %v779_v63, %v811_v10  ;;  %v652_v17 = vmax.f32 %v588_v45, %v811_v10  ;;  %v689_v10 = vld [vmem:[#allocation2 + $0x140] sm:$0xff] }
  0x67   : > { %v716_v36 = vmax.f32 %v651_v49, %v684_v32  ;;  %10397 = vmatmul.mubr.msk.bf16.gmra.mrb[12].mxu0 %vm256_vm1, %v881_v39  ;;  %v590_v56 = vmax.f32 %v526_v29, %v685_v57  ;;  %v653_v51 = vmax.f32 %v589_v31, %v812_v34  ;;  %v528_v62 = vmax.f32 %v464_v46, %v813_v2  ;;  %v752_v14 = vld [vmem:[#allocation2 + $0x139] sm:$0xff]  ;;  %v690_v46 = vld [vmem:[#allocation2 + $0x150] sm:$0xff] }
  0x68   : > { %v591_v47 = vmax.f32 %v527_v54, %v686_v55  ;;  %v882_v41 = vpack.c.bf16 %v843_v35, %v842_v15  ;;  %v717_v60 = vmax.f32 %v652_v17, %v685_v57  ;;  %v401_v33 = vmax.f32 %v12689_v43, %v686_v55  ;;  %v816_v15 = vld [vmem:[#allocation2 + $0x13a] sm:$0xff] }
  0x69   : > { %v780_v0 = vmax.f32 %v716_v36, %v748_v58  ;;  %v654_v53 = vmax.f32 %v590_v56, %v813_v2  ;;  %v718_v44 = vmax.f32 %v653_v51, %v686_v55  ;;  %v592_v18 = vmax.f32 %v528_v62, %v687_v37  ;;  %v753_v58 = vld [vmem:[#allocation2 + $0x141] sm:$0xff]  ;;  %v691_v17 = vld [vmem:[#allocation2 + $0x158] sm:$0xff] }
  0x6a   : > { %v655_v19 = vmax.f32 %v591_v47, %v814_v30  ;;  %10400 = vmatprep.mubr.msk.bf16.mxu0 %vm256_vm1, %v882_v41  ;;  %v781_v32 = vmax.f32 %v717_v60, %v749_v20  ;;  %v402_v31 = vmax.f32 %v12692_v1, %v687_v37  ;;  %v465_v63 = vmax.f32 %v401_v33, %v750_v26  ;;  %v817_v62 = vld [vmem:[#allocation2 + $0x142] sm:$0xff]  ;;  %v754_v47 = vld [vmem:[#allocation2 + $0x151] sm:$0xff]  ;;  %v755_v60 = vld [vmem:[#allocation2 + $0x159] sm:$0xff] }
  0x6b   : > { %v844_v39 = vmax.f32 %v780_v0, %v812_v34  ;;  %v719_v45 = vmax.f32 %v654_v53, %v687_v37  ;;  %v782_v49 = vmax.f32 %v718_v44, %v750_v26  ;;  %v656_v29 = vmax.f32 %v592_v18, %v815_v50  ;;  %v692_v33 = vld [vmem:[#allocation2 + $0x168] sm:$0xff] }
  0x6c   : > { %v720_v57 = vmax.f32 %v655_v19, %v688_v52  ;;  %v845_v54 = vmax.f32 %v781_v32, %v813_v2  ;;  %v466_v55 = vmax.f32 %v402_v31, %v751_v38  ;;  %v529_v35 = vmax.f32 %v465_v63, %v814_v30  ;;  %v693_v31 = vld [vmem:[#allocation2 + $0x170] sm:$0xff] }
  0x6d   : > { %v403_v36 = vmax.f32 %v12695_v48, %v688_v52  ;;  %v783_v56 = vmax.f32 %v719_v45, %v751_v38  ;;  %v846_v20 = vmax.f32 %v782_v49, %v814_v30  ;;  %v721_v34 = vmax.f32 %v656_v29, %v689_v10  ;;  %v818_v30 = vld [vmem:[#allocation2 + $0x152] sm:$0xff]  ;;  %v756_v63 = vld [vmem:[#allocation2 + $0x169] sm:$0xff]  ;;  %v819_v49 = vld [vmem:[#allocation2 + $0x15a] sm:$0xff] }
  0x6e   : > { %v784_v51 = vmax.f32 %v720_v57, %v752_v14  ;;  %v883_v41 = vpack.c.bf16 %v845_v54, %v844_v39  ;;  %v530_v37 = vmax.f32 %v466_v55, %v815_v50  ;;  %v593_v26 = vmax.f32 %v529_v35, %v688_v52  ;;  %v820_v35 = vld [vmem:[#allocation2 + $0x16a] sm:$0xff] }
  0x6f   : > { %v404_v0 = vmax.f32 %v12708_v61, %v689_v10  ;;  %v847_v2 = vmax.f32 %v783_v56, %v815_v50  ;;  %v785_v53 = vmax.f32 %v721_v34, %v753_v58  ;;  %v467_v18 = vmax.f32 %v403_v36, %v752_v14  ;;  %v757_v14 = vld [vmem:[#allocation2 + $0x171] sm:$0xff] }
  0x70   : > { %v848_v44 = vmax.f32 %v784_v51, %v816_v15  ;;  %10401 = vmatmul.mubr.msk.bf16.gmra.mrb[16].mxu0 %vm256_vm1, %v883_v41  ;;  %v594_v19 = vmax.f32 %v530_v37, %v689_v10  ;;  %v657_v38 = vmax.f32 %v593_v26, %v816_v15  ;;  %v405_v39 = vmax.f32 %v12713_v59, %v690_v46  ;;  %v821_v37 = vld [vmem:[#allocation2 + $0x172] sm:$0xff]  ;;  %v694_v26 = vld [vmem:[#allocation2 + $0x180] sm:$0xff] }
  0x71   : > { %v468_v32 = vmax.f32 %v404_v0, %v753_v58  ;;  %v884_v45 = vpack.c.bf16 %v847_v2, %v846_v20  ;;  %v849_v52 = vmax.f32 %v785_v53, %v817_v62  ;;  %v531_v29 = vmax.f32 %v467_v18, %v816_v15 }
  0x72   : > { %v406_v57 = vmax.f32 %v12716_v3, %v691_v17  ;;  %v658_v50 = vmax.f32 %v594_v19, %v817_v62  ;;  %v722_v54 = vmax.f32 %v657_v38, %v690_v46  ;;  %v469_v36 = vmax.f32 %v405_v39, %v754_v47 }
  0x73   : > { %v532_v55 = vmax.f32 %v468_v32, %v817_v62  ;;  %10404 = vmatprep.mubr.msk.bf16.mxu0 %vm256_vm1, %v884_v45  ;;  %v885_v10 = vpack.c.bf16 %v849_v52, %v848_v44  ;;  %v595_v58 = vmax.f32 %v531_v29, %v690_v46  ;;  %v407_v34 = vmax.f32 %v12731_v40, %v692_v33  ;;  %v695_v44 = vld [vmem:[#allocation2 + $0x188] sm:$0xff] }
  0x74   : > { %v470_v56 = vmax.f32 %v406_v57, %v755_v60  ;;  %v723_v51 = vmax.f32 %v658_v50, %v691_v17  ;;  %v786_v20 = vmax.f32 %v722_v54, %v754_v47  ;;  %v533_v15 = vmax.f32 %v469_v36, %v818_v30  ;;  %v822_v46 = vld [vmem:[#allocation2 + $0x182] sm:$0xff]  ;;  %v696_v36 = vld [vmem:[#allocation2 + $0x198] sm:$0xff] }
  0x75   : > { %v596_v41 = vmax.f32 %v532_v55, %v691_v17  ;;  %v659_v0 = vmax.f32 %v595_v58, %v818_v30  ;;  %v408_v62 = vmax.f32 %v12734_v21, %v693_v31  ;;  %v471_v53 = vmax.f32 %v407_v34, %v756_v63  ;;  %v758_v52 = vld [vmem:[#allocation2 + $0x181] sm:$0xff]  ;;  %v759_v54 = vld [vmem:[#allocation2 + $0x189] sm:$0xff] }
  0x76   : > { %v534_v2 = vmax.f32 %v470_v56, %v819_v49  ;;  %v787_v18 = vmax.f32 %v723_v51, %v755_v60  ;;  %v850_v19 = vmax.f32 %v786_v20, %v818_v30  ;;  %v597_v32 = vmax.f32 %v533_v15, %v692_v33  ;;  %v823_v55 = vld [vmem:[#allocation2 + $0x18a] sm:$0xff]  ;;  %v760_v15 = vld [vmem:[#allocation2 + $0x199] sm:$0xff] }
  0x77   : > { %v660_v38 = vmax.f32 %v596_v41, %v819_v49  ;;  %v724_v39 = vmax.f32 %v659_v0, %v692_v33  ;;  %v472_v29 = vmax.f32 %v408_v62, %v757_v14  ;;  %v535_v47 = vmax.f32 %v471_v53, %v820_v35  ;;  %v697_v41 = vld [vmem:[#allocation2 + $0x1a0] sm:$0xff] }
  0x78   : > { %v598_v45 = vmax.f32 %v534_v2, %v693_v31  ;;  %10405 = vmatmul.mubr.msk.bf16.gmra.mrb[20].mxu0 %vm256_vm1, %v885_v10  ;;  %v851_v17 = vmax.f32 %v787_v18, %v819_v49  ;;  %v661_v50 = vmax.f32 %v597_v32, %v820_v35  ;;  %v867_v60 = vpack.c.bf16 %v12649_v23, %v12646_v22  ;;  %v761_v23 = vld [vmem:[#allocation2 + $0x1a1] sm:$0xff] }
  0x79   : > { %v725_v57 = vmax.f32 %v660_v38, %v693_v31  ;;  %v788_v30 = vmax.f32 %v724_v39, %v756_v63  ;;  %v536_v56 = vmax.f32 %v472_v29, %v821_v37  ;;  %v599_v34 = vmax.f32 %v535_v47, %v694_v26  ;;  %v12226_v29 = vld [vmem:[%s14426_s3 + $0x18] sm:$0x1f]  }
  0x7a   : > { %v662_v58 = vmax.f32 %v598_v45, %v821_v37  ;;  %v886_v33 = vpack.c.bf16 %v851_v17, %v850_v19  ;;  %v726_v20 = vmax.f32 %v661_v50, %v694_v26  ;;  %v868_v49 = vpack.c.bf16 %v12666_v16, %v12652_v24  ;;  %v824_v19 = vld [vmem:[#allocation2 + $0x19a] sm:$0xff]  ;;  %v14456_v45 = vld [vmem:[#allocation10_spill] sm:$0xff] }
  0x7b   : > { %v789_v51 = vmax.f32 %v725_v57, %v757_v14  ;;  %v852_v31 = vmax.f32 %v788_v30, %v820_v35  ;;  %v600_v0 = vmax.f32 %v536_v56, %v695_v44  ;;  %v663_v2 = vmax.f32 %v599_v34, %v822_v46  ;;  %v12228_v30 = vld [vmem:[%s14426_s3 + $0xb8] sm:$0x1f]   ;;  %v12929_v56 = vld [vmem:[%s14426_s3 + $0xc0] sm:$0xff]  }
  0x7c   : > { %v727_v10 = vmax.f32 %v662_v58, %v695_v44  ;;  %10408 = vmatprep.mubr.msk.bf16.mxu0 %vm256_vm1, %v886_v33  ;;  %v790_v22 = vmax.f32 %v726_v20, %v758_v52  ;;  %v869_v63 = vpack.c.bf16 %v12674_v42, %v12671_v28  ;;  %v870_v14 = vpack.c.bf16 %v12692_v1, %v12689_v43  ;;  %v825_v43 = vld [vmem:[#allocation2 + $0x1a2] sm:$0xff]  ;;  %v14459_v52 = vld [vmem:[#allocation12_spill] sm:$0xff]  ;;  %v12943_v20 = vld [vmem:[%s14425_s2] ss:$0 sm:$0xff] }
  0x7d   : > { %v853_v62 = vmax.f32 %v789_v51, %v821_v37  ;;  %v664_v53 = vmax.f32 %v600_v0, %v823_v55  ;;  %v728_v18 = vmax.f32 %v663_v2, %v696_v36  ;;  %v871_v24 = vpack.c.bf16 %v12708_v61, %v12695_v48  ;;  %v12231_v34 = vld [vmem:[%s14426_s3] sm:$0xff]   ;;  %v12232_v33 = vld [vmem:[%s14426_s3 + $0x8] sm:$0x1f]  }
  0x7e   : > { %v791_v26 = vmax.f32 %v727_v10, %v759_v54  ;;  %v854_v35 = vmax.f32 %v790_v22, %v822_v46  ;;  %v872_v37 = vpack.c.bf16 %v12716_v3, %v12713_v59  ;;  %v873_v38 = vpack.c.bf16 %v12734_v21, %v12731_v40  ;;  %v14453_v46 = vld [vmem:[#allocation8_spill] sm:$0xff]  ;;  %v12950_v0 = vld [vmem:[%s14426_s3 + $0x20] sm:$0xff]  }
  0x7f   : > { %v887_v16 = vpack.c.bf16 %v853_v62, %v852_v31  ;;  %v729_v28 = vmax.f32 %v664_v53, %v697_v41  ;;  %v792_v42 = vmax.f32 %v728_v18, %v760_v15  ;;  %v14445_v59 = vpack.c.bf16 %v12504_v5, %v12501_v4  ;;  %v14450_v5 = vld [vmem:[#allocation7_spill] sm:$0xff] }
  0x80   : > { %v855_v32 = vmax.f32 %v791_v26, %v823_v55  ;;  %v14446_v3 = vpack.c.bf16 %v12510_v7, %v12507_v6  ;;  %v14447_v40 = vpack.c.bf16 %v12522_v9, %v12519_v8  ;;  %v14448_v21 = vpack.c.bf16 %v12536_v12, %v12533_v11  ;;  %v14452_v7 = vld [vmem:[#allocation9_spill] sm:$0xff]  ;;  %v14455_v9 = vld [vmem:[#allocation11_spill] sm:$0xff] }
  0x81   : > { %10409 = vmatmul.mubr.msk.bf16.gmra.mrb[24].mxu0 %vm256_vm1, %v887_v16  ;;  %v793_v44 = vmax.f32 %v729_v28, %v761_v23  ;;  %v856_v39 = vmax.f32 %v792_v42, %v824_v19  ;;  %v14449_v4 = vpack.c.bf16 %v12556_v25, %v12539_v13  ;;  %v14451_v6 = vpack.c.bf16 %v12562_v27, %v14450_v5  ;;  %v14458_v12 = vld [vmem:[#allocation13_spill] sm:$0xff]  ;;  %v12225_v27 = vld [vmem:[%s14426_s3 + $0x10] sm:$0xff]  }
  0x82   : > { %v888_v1 = vpack.c.bf16 %v855_v32, %v854_v35  ;;  %v14454_v8 = vpack.c.bf16 %v14452_v7, %v14453_v46  ;;  %v14457_v11 = vpack.c.bf16 %v14455_v9, %v14456_v45  ;;  %v14460_v13 = vpack.c.bf16 %v14458_v12, %v14459_v52  ;;  %10450 = vmatprep.subr.bf16.mxu0 %v12225_v27 }
  0x83   : > { %v857_v48 = vmax.f32 %v793_v44, %v825_v43  ;;  %v12342_v25 = vmov 0.0   ;;  %v1650_v47 = vsel %vm1648_vm5, %v12226_v29, 0  ;;  %v12923_v58 = vsel %vm1648_vm5, %v12228_v30, 0 }
  0x84   : > { %10412 = vmatprep.mubr.msk.bf16.mxu0 %vm256_vm1, %v888_v1  ;;  %1400 = vst.msk [vmem:[#allocation3 + $0x48] sm:$0xff] %vm1389_vm3, %v12342_v25  ;;  %1401 = vst.msk [vmem:[#allocation3 + $0x50] sm:$0xff] %vm1389_vm3, %v12342_v25  ;;  %v1873_v51 = vsel %vm1648_vm5, %v12232_v33, 0 }
  0x85   : > { %v889_v61 = vpack.c.bf16 %v857_v48, %v856_v39  ;;  %1390 = vst.msk [vmem:[#allocation3] sm:$0xff] %vm1389_vm3, %v12342_v25  ;;  %1391 = vst.msk [vmem:[#allocation3 + $0x8] sm:$0xff] %vm1389_vm3, %v12342_v25 }
  0x86   : > { %1394 = vst.msk [vmem:[#allocation3 + $0x18] sm:$0xff] %vm1389_vm3, %v12342_v25  ;;  %1395 = vst.msk [vmem:[#allocation3 + $0x20] sm:$0xff] %vm1389_vm3, %v12342_v25 }
  0x87   : > { %1397 = vst.msk [vmem:[#allocation3 + $0x30] sm:$0xff] %vm1389_vm3, %v12342_v25  ;;  %1398 = vst.msk [vmem:[#allocation3 + $0x38] sm:$0xff] %vm1389_vm3, %v12342_v25 }
  0x88   : > { %1403 = vst.msk [vmem:[#allocation3 + $0x60] sm:$0xff] %vm1389_vm3, %v12342_v25  ;;  %1404 = vst.msk [vmem:[#allocation3 + $0x68] sm:$0xff] %vm1389_vm3, %v12342_v25 }
  0x89   : > { %10413 = vmatmul.mubr.msk.bf16.gmra.mrb[28].mxu0 %vm256_vm1, %v889_v61  ;;  %1406 = vst.msk [vmem:[#allocation3 + $0x78] sm:$0xff] %vm1389_vm3, %v12342_v25  ;;  %1407 = vst.msk [vmem:[#allocation3 + $0x80] sm:$0xff] %vm1389_vm3, %v12342_v25 }
  0x8a   : > { %10418 = vmatprep.mubr.msk.bf16.mxu0 %vm256_vm1, %v14445_v59  ;;  %1409 = vst.msk [vmem:[#allocation3 + $0x90] sm:$0xff] %vm1389_vm3, %v12342_v25  ;;  %1410 = vst.msk [vmem:[#allocation3 + $0x98] sm:$0xff] %vm1389_vm3, %v12342_v25 }
  0x8b   : > { %1412 = vst.msk [vmem:[#allocation3 + $0xa8] sm:$0xff] %vm1389_vm3, %v12342_v25  ;;  %1413 = vst.msk [vmem:[#allocation3 + $0xb0] sm:$0xff] %vm1389_vm3, %v12342_v25 }
  0x8c   : > { %1415 = vst.msk [vmem:[#allocation3 + $0xc0] sm:$0xff] %vm1389_vm3, %v12342_v25  ;;  %1416 = vst.msk [vmem:[#allocation3 + $0xc8] sm:$0xff] %vm1389_vm3, %v12342_v25  ;;  %v1536_v17 = vld [vmem:[#allocation3 + $0x1] sm:$0xff] }
  0x8d   : > { %1418 = vst.msk [vmem:[#allocation3 + $0xd8] sm:$0xff] %vm1389_vm3, %v12342_v25  ;;  %1419 = vst.msk [vmem:[#allocation3 + $0xe0] sm:$0xff] %vm1389_vm3, %v12342_v25  ;;  %v1538_v54 = vld [vmem:[#allocation3 + $0x19] sm:$0xff] }
  0x8e   : > { %1421 = vst.msk [vmem:[#allocation3 + $0xf0] sm:$0xff] %vm1389_vm3, %v12342_v25  ;;  %1422 = vst.msk [vmem:[#allocation3 + $0xf8] sm:$0xff] %vm1389_vm3, %v12342_v25 }
  0x8f   : > { %1424 = vst.msk [vmem:[#allocation3 + $0x108] sm:$0xff] %vm1389_vm3, %v12342_v25  ;;  %1425 = vst.msk [vmem:[#allocation3 + $0x110] sm:$0xff] %vm1389_vm3, %v12342_v25 }
  0x90   : > { %1427 = vst.msk [vmem:[#allocation3 + $0x120] sm:$0xff] %vm1389_vm3, %v12342_v25  ;;  %1428 = vst.msk [vmem:[#allocation3 + $0x128] sm:$0xff] %vm1389_vm3, %v12342_v25 }
  0x91   : > { %10419 = vmatmul.mubr.msk.bf16.vlgmr.msra.gmra.mrb[0].mxu0 %vm256_vm1, %v14446_v3  ;;  %1430 = vst.msk [vmem:[#allocation3 + $0x138] sm:$0xff] %vm1389_vm3, %v12342_v25  ;;  %1431 = vst.msk [vmem:[#allocation3 + $0x140] sm:$0xff] %vm1389_vm3, %v12342_v25 }
  0x92   : > { %10422 = vmatprep.mubr.msk.bf16.mxu0 %vm256_vm1, %v14447_v40  ;;  %1433 = vst.msk [vmem:[#allocation3 + $0x150] sm:$0xff] %vm1389_vm3, %v12342_v25  ;;  %1434 = vst.msk [vmem:[#allocation3 + $0x158] sm:$0xff] %vm1389_vm3, %v12342_v25  ;;  %10451 = vmatpush3.bf16.msra.mxu0 %v12225_v27 }
  0x93   : > { %1436 = vst.msk [vmem:[#allocation3 + $0x168] sm:$0xff] %vm1389_vm3, %v12342_v25  ;;  %1437 = vst.msk [vmem:[#allocation3 + $0x170] sm:$0xff] %vm1389_vm3, %v12342_v25  ;;  %12156 = vmatprep.subr.msk.bf16.mxu0 %vm1648_vm5, %v12226_v29 }
  0x94   : > { %1439 = vst.msk [vmem:[#allocation3 + $0x180] sm:$0xff] %vm1389_vm3, %v12342_v25  ;;  %1440 = vst.msk [vmem:[#allocation3 + $0x188] sm:$0xff] %vm1389_vm3, %v12342_v25 }
  0x95   : > { %1442 = vst.msk [vmem:[#allocation3 + $0x198] sm:$0xff] %vm1389_vm3, %v12342_v25  ;;  %1443 = vst.msk [vmem:[#allocation3 + $0x1a0] sm:$0xff] %vm1389_vm3, %v12342_v25 }
  0x96   : > { %1445 = vst.msk [vmem:[#allocation3 + $0x1b0] sm:$0xff] %vm1389_vm3, %v12342_v25  ;;  %1446 = vst.msk [vmem:[#allocation3 + $0x1b8] sm:$0xff] %vm1389_vm3, %v12342_v25  ;;  %10453 = vmatpush3.bf16.msra.mxu0 %v1650_v47 }
  0x97   : > { %1448 = vst.msk [vmem:[#allocation3 + $0x1c8] sm:$0xff] %vm1389_vm3, %v12342_v25  ;;  %1449 = vst.msk [vmem:[#allocation3 + $0x1d0] sm:$0xff] %vm1389_vm3, %v12342_v25  ;;  %10486 = vmatprep.subr.bf16.mxu0 %v12231_v34 }
  0x98   : > { %1402 = vst.msk [vmem:[#allocation3 + $0x58] sm:$0xf] %vm1392_vm4, %v12342_v25  ;;  %1393 = vst.msk [vmem:[#allocation3 + $0x10] sm:$0xf] %vm1392_vm4, %v12342_v25 }
  0x99   : > { %10423 = vmatmul.mubr.msk.bf16.gmra.mrb[4].mxu0 %vm256_vm1, %v14448_v21  ;;  %1396 = vst.msk [vmem:[#allocation3 + $0x28] sm:$0xf] %vm1392_vm4, %v12342_v25  ;;  %1399 = vst.msk [vmem:[#allocation3 + $0x40] sm:$0xf] %vm1392_vm4, %v12342_v25 }
  0x9a   : > { %10426 = vmatprep.mubr.msk.bf16.mxu0 %vm256_vm1, %v14449_v4  ;;  %1405 = vst.msk [vmem:[#allocation3 + $0x70] sm:$0xf] %vm1392_vm4, %v12342_v25  ;;  %1408 = vst.msk [vmem:[#allocation3 + $0x88] sm:$0xf] %vm1392_vm4, %v12342_v25 }
  0x9b   : > { %1411 = vst.msk [vmem:[#allocation3 + $0xa0] sm:$0xf] %vm1392_vm4, %v12342_v25  ;;  %1414 = vst.msk [vmem:[#allocation3 + $0xb8] sm:$0xf] %vm1392_vm4, %v12342_v25 }
  0x9c   : > { %1417 = vst.msk [vmem:[#allocation3 + $0xd0] sm:$0xf] %vm1392_vm4, %v12342_v25  ;;  %1420 = vst.msk [vmem:[#allocation3 + $0xe8] sm:$0xf] %vm1392_vm4, %v12342_v25 }
  0x9d   : > { %1423 = vst.msk [vmem:[#allocation3 + $0x100] sm:$0xf] %vm1392_vm4, %v12342_v25  ;;  %1426 = vst.msk [vmem:[#allocation3 + $0x118] sm:$0xf] %vm1392_vm4, %v12342_v25 }
  0x9e   : > { %1429 = vst.msk [vmem:[#allocation3 + $0x130] sm:$0xf] %vm1392_vm4, %v12342_v25  ;;  %1432 = vst.msk [vmem:[#allocation3 + $0x148] sm:$0xf] %vm1392_vm4, %v12342_v25 }
  0x9f   : > { %1435 = vst.msk [vmem:[#allocation3 + $0x160] sm:$0xf] %vm1392_vm4, %v12342_v25  ;;  %1438 = vst.msk [vmem:[#allocation3 + $0x178] sm:$0xf] %vm1392_vm4, %v12342_v25  ;;  %v1537_v57 = vld [vmem:[#allocation3 + $0x9] sm:$0xff] }
  0xa0   : > { %1441 = vst.msk [vmem:[#allocation3 + $0x190] sm:$0xf] %vm1392_vm4, %v12342_v25  ;;  %1444 = vst.msk [vmem:[#allocation3 + $0x1a8] sm:$0xf] %vm1392_vm4, %v12342_v25  ;;  %v1568_v50 = vpack.c.bf16 %v1537_v57, %v1536_v17  ;;  %v1539_v55 = vld [vmem:[#allocation3 + $0x21] sm:$0xff] }
  0xa1   : > { %10427 = vmatmul.mubr.msk.bf16.gmra.mrb[8].mxu0 %vm256_vm1, %v14451_v6  ;;  %1447 = vst.msk [vmem:[#allocation3 + $0x1c0] sm:$0xf] %vm1392_vm4, %v12342_v25  ;;  %1450 = vst.msk [vmem:[#allocation3 + $0x1d8] sm:$0xf] %vm1392_vm4, %v12342_v25  ;;  %v1569_v36 = vpack.c.bf16 %v1539_v55, %v1538_v54 }
  0xa2   : > { %10430 = vmatprep.mubr.msk.bf16.mxu0 %vm256_vm1, %v14454_v8 }
  0xa9   : > { %10431 = vmatmul.mubr.msk.bf16.gmra.mrb[12].mxu0 %vm256_vm1, %v14457_v11 }
  0xaa   : > { %10434 = vmatprep.mubr.msk.bf16.mxu0 %vm256_vm1, %v14460_v13 }
  0xb1   : > { %10435 = vmatmul.mubr.msk.bf16.gmra.mrb[16].mxu0 %vm256_vm1, %v867_v60  ;;  %v12227_v60 = vld [vmem:[%s14426_s3 + $0xb0] sm:$0xff]  }
  0xb2   : > { %10438 = vmatprep.mubr.msk.bf16.mxu0 %vm256_vm1, %v868_v49  ;;  %11350 = vmatprep.subr.bf16.mxu1 %v12227_v60 }
  0xb3   : > { %11352 = vmatpush3.bf16.msra.mxu1 %v12227_v60 }
  0xb4   : > { %12168 = vmatprep.subr.msk.bf16.mxu1 %vm1648_vm5, %v12228_v30 }
  0xb7   : > { %11353 = vmatpush3.bf16.msra.mxu1 %v12923_v58 }
  0xb8   : > { %10882 = vmatprep.subr.bf16.mxu1 %v12929_v56 }
  0xb9   : > { %10439 = vmatmul.mubr.msk.bf16.gmra.mrb[20].mxu0 %vm256_vm1, %v869_v63 }
  0xba   : > { %10442 = vmatprep.mubr.msk.bf16.mxu0 %vm256_vm1, %v870_v14 }
  0xc1   : > { %10443 = vmatmul.mubr.msk.bf16.gmra.mrb[24].mxu0 %vm256_vm1, %v871_v24 }
  0xc2   : > { %10446 = vmatprep.mubr.msk.bf16.mxu0 %vm256_vm1, %v872_v37 }
  0xc9   : > { %10447 = vmatmul.mubr.msk.bf16.gmra.mrb[28].mxu0 %vm256_vm1, %v873_v38 }
  0xca   : > { %10454 = vmatprep.mubr.msk.bf16.mxu0 %vm1389_vm3, %v1568_v50 }
  0xd1   : > { %10455 = vmatmul.mubr.msk.bf16.vlgmr.msra.gmra.mrb[32].mxu0 %vm1389_vm3, %v1569_v36 }
  0xd2   : > { %10487 = vmatpush3.bf16.msra.mxu0 %v12231_v34 }
  0xd3   : > { %12157 = vmatprep.subr.msk.bf16.mxu0 %vm1648_vm5, %v12232_v33 }
  0xd6   : > { %10489 = vmatpush3.bf16.msra.mxu0 %v1873_v51 }
  0xd7   : > { %10522 = vmatprep.subr.bf16.mxu0 %v12950_v0 }
 0x164   : > { %v10420_v41 = vpop.f32.mrb[0].mxu0 }
 0x165   : > { %v1327_v15 = vadd.f32 %v10420_v41, %v12943_v20  ;;  %v1191_v49 = vpop.f32.mrb[1].mxu0 }
 0x166   : > { %v1325_v31 = vadd.f32 %v12943_v20, %v1191_v49  ;;  %v10421_v10 = vpop.f32.mrb[2].mxu0 }
 0x167   : > { %v1359_v2 = vmax.f32 %v1327_v15, 0.0  ;;  %v1328_v62 = vadd.f32 %v10421_v10, %v12943_v20  ;;  %v1194_v22 = vpop.f32.mrb[3].mxu0 }
 0x168   : > { %v1357_v23 = vmax.f32 %v1325_v31, 0.0  ;;  %v1326_v63 = vadd.f32 %v12943_v20, %v1194_v22 }
 0x169   : > { %1454 = vst.msk [vmem:[#allocation3 + $0x4a] sm:$0xff] %vm1389_vm3, %v1359_v2  ;;  %v1360_v14 = vmax.f32 %v1328_v62, 0.0 }
 0x16a   : > { %1452 = vst.msk [vmem:[#allocation3 + $0x32] sm:$0xff] %vm1389_vm3, %v1357_v23  ;;  %v1358_v26 = vmax.f32 %v1326_v63, 0.0 }
 0x16b   : > { %1455 = vst.msk [vmem:[#allocation3 + $0x52] sm:$0xff] %vm1389_vm3, %v1360_v14 }
 0x16c   : > { %1453 = vst.msk [vmem:[#allocation3 + $0x3a] sm:$0xff] %vm1389_vm3, %v1358_v26  ;;  %v10424_v53 = vpop.f32.mrb[4].mxu0 }
 0x16d   : > { %v1331_v18 = vadd.f32 %v10424_v53, %v12943_v20  ;;  %v1207_v24 = vpop.f32.mrb[5].mxu0 }
 0x16e   : > { %v1329_v16 = vadd.f32 %v12943_v20, %v1207_v24  ;;  %v10425_v35 = vpop.f32.mrb[6].mxu0 }
 0x16f   : > { %v1363_v19 = vmax.f32 %v1331_v18, 0.0  ;;  %v1332_v37 = vadd.f32 %v10425_v35, %v12943_v20  ;;  %v1210_v38 = vpop.f32.mrb[7].mxu0 }
 0x170   : > { %v1361_v32 = vmax.f32 %v1329_v16, 0.0  ;;  %v1330_v28 = vadd.f32 %v12943_v20, %v1210_v38  ;;  %v1542_v59 = vld [vmem:[#allocation3 + $0x49] sm:$0xff] }
 0x171   : > { %1458 = vst.msk [vmem:[#allocation3 + $0x7a] sm:$0xff] %vm1389_vm3, %v1363_v19  ;;  %v1364_v42 = vmax.f32 %v1332_v37, 0.0  ;;  %v1540_v44 = vld [vmem:[#allocation3 + $0x31] sm:$0xff] }
 0x172   : > { %1456 = vst.msk [vmem:[#allocation3 + $0x62] sm:$0xff] %vm1389_vm3, %v1361_v32  ;;  %v1362_v43 = vmax.f32 %v1330_v28, 0.0  ;;  %v1543_v1 = vld [vmem:[#allocation3 + $0x51] sm:$0xff] }
 0x173   : > { %1459 = vst.msk [vmem:[#allocation3 + $0x82] sm:$0xff] %vm1389_vm3, %v1364_v42  ;;  %v1541_v39 = vld [vmem:[#allocation3 + $0x39] sm:$0xff]  ;;  %v1571_v21 = vpack.c.bf16 %v1543_v1, %v1542_v59 }
 0x174   : > { %1457 = vst.msk [vmem:[#allocation3 + $0x6a] sm:$0xff] %vm1389_vm3, %v1362_v43  ;;  %v10428_v48 = vpop.f32.mrb[8].mxu0  ;;  %v1570_v61 = vpack.c.bf16 %v1541_v39, %v1540_v44 }
 0x175   : > { %v1335_v3 = vadd.f32 %v10428_v48, %v12943_v20  ;;  %v1223_v40 = vpop.f32.mrb[9].mxu0 }
 0x176   : > { %v1333_v4 = vadd.f32 %v12943_v20, %v1223_v40  ;;  %v10429_v5 = vpop.f32.mrb[10].mxu0  ;;  %10458 = vmatprep.mubr.msk.bf16.mxu0 %vm1389_vm3, %v1570_v61 }
 0x177   : > { %v1367_v6 = vmax.f32 %v1335_v3, 0.0  ;;  %v1336_v7 = vadd.f32 %v10429_v5, %v12943_v20  ;;  %v1226_v46 = vpop.f32.mrb[11].mxu0  ;;  %10459 = vmatmul.mubr.msk.bf16.gmra.mrb[36].mxu0 %vm1389_vm3, %v1571_v21 }
 0x178   : > { %v1365_v8 = vmax.f32 %v1333_v4, 0.0  ;;  %v1334_v9 = vadd.f32 %v12943_v20, %v1226_v46  ;;  %v1546_v29 = vld [vmem:[#allocation3 + $0x79] sm:$0xff] }
 0x179   : > { %1462 = vst.msk [vmem:[#allocation3 + $0xaa] sm:$0xff] %vm1389_vm3, %v1367_v6  ;;  %v1368_v45 = vmax.f32 %v1336_v7, 0.0  ;;  %v1544_v52 = vld [vmem:[#allocation3 + $0x61] sm:$0xff] }
 0x17a   : > { %1460 = vst.msk [vmem:[#allocation3 + $0x92] sm:$0xff] %vm1389_vm3, %v1365_v8  ;;  %v1366_v11 = vmax.f32 %v1334_v9, 0.0  ;;  %v1547_v12 = vld [vmem:[#allocation3 + $0x81] sm:$0xff] }
 0x17b   : > { %1463 = vst.msk [vmem:[#allocation3 + $0xb2] sm:$0xff] %vm1389_vm3, %v1368_v45  ;;  %v1545_v13 = vld [vmem:[#allocation3 + $0x69] sm:$0xff]  ;;  %v1573_v57 = vpack.c.bf16 %v1547_v12, %v1546_v29 }
 0x17c   : > { %1461 = vst.msk [vmem:[#allocation3 + $0x9a] sm:$0xff] %vm1389_vm3, %v1366_v11  ;;  %v10432_v25 = vpop.f32.mrb[12].mxu0  ;;  %v1572_v27 = vpack.c.bf16 %v1545_v13, %v1544_v52 }
 0x17d   : > { %v1339_v47 = vadd.f32 %v10432_v25, %v12943_v20  ;;  %v1239_v17 = vpop.f32.mrb[13].mxu0  ;;  %v12230_v25 = vld [vmem:[%s14426_s3 + $0xc8] sm:$0x1f]  }
 0x17e   : > { %v1337_v50 = vadd.f32 %v12943_v20, %v1239_v17  ;;  %v10433_v54 = vpop.f32.mrb[14].mxu0  ;;  %10462 = vmatprep.mubr.msk.bf16.mxu0 %vm1389_vm3, %v1572_v27 }
 0x17f   : > { %v1371_v55 = vmax.f32 %v1339_v47, 0.0  ;;  %v1340_v36 = vadd.f32 %v10433_v54, %v12943_v20  ;;  %v1242_v60 = vpop.f32.mrb[15].mxu0  ;;  %10463 = vmatmul.mubr.msk.bf16.gmra.mrb[40].mxu0 %vm1389_vm3, %v1573_v57 }
 0x180   : > { %v1369_v30 = vmax.f32 %v1337_v50, 0.0  ;;  %v1338_v34 = vadd.f32 %v12943_v20, %v1242_v60  ;;  %v1550_v2 = vld [vmem:[#allocation3 + $0xa9] sm:$0xff]  ;;  %v13025_v60 = vld [vmem:[%s14426_s3 + $0xd0] sm:$0xff]  }
 0x181   : > { %1466 = vst.msk [vmem:[#allocation3 + $0xda] sm:$0xff] %vm1389_vm3, %v1371_v55  ;;  %v1372_v33 = vmax.f32 %v1340_v36, 0.0  ;;  %v1548_v15 = vld [vmem:[#allocation3 + $0x91] sm:$0xff]  ;;  %v5230_v36 = vsel %vm1648_vm5, %v12230_v25, 0 }
 0x182   : > { %1464 = vst.msk [vmem:[#allocation3 + $0xc2] sm:$0xff] %vm1389_vm3, %v1369_v30  ;;  %v1370_v51 = vmax.f32 %v1338_v34, 0.0  ;;  %v1551_v41 = vld [vmem:[#allocation3 + $0xb1] sm:$0xff] }
 0x183   : > { %1467 = vst.msk [vmem:[#allocation3 + $0xe2] sm:$0xff] %vm1389_vm3, %v1372_v33  ;;  %v1549_v49 = vld [vmem:[#allocation3 + $0x99] sm:$0xff]  ;;  %v1575_v23 = vpack.c.bf16 %v1551_v41, %v1550_v2 }
 0x184   : > { %1465 = vst.msk [vmem:[#allocation3 + $0xca] sm:$0xff] %vm1389_vm3, %v1370_v51  ;;  %v10436_v31 = vpop.f32.mrb[16].mxu0  ;;  %v1574_v10 = vpack.c.bf16 %v1549_v49, %v1548_v15 }
 0x185   : > { %v1343_v62 = vadd.f32 %v10436_v31, %v12943_v20  ;;  %v1255_v22 = vpop.f32.mrb[17].mxu0 }
 0x186   : > { %v1341_v63 = vadd.f32 %v12943_v20, %v1255_v22  ;;  %v10437_v14 = vpop.f32.mrb[18].mxu0  ;;  %10466 = vmatprep.mubr.msk.bf16.mxu0 %vm1389_vm3, %v1574_v10 }
 0x187   : > { %v1375_v26 = vmax.f32 %v1343_v62, 0.0  ;;  %v1344_v53 = vadd.f32 %v10437_v14, %v12943_v20  ;;  %v1258_v18 = vpop.f32.mrb[19].mxu0  ;;  %10467 = vmatmul.mubr.msk.bf16.gmra.mrb[44].mxu0 %vm1389_vm3, %v1575_v23 }
 0x188   : > { %v1373_v24 = vmax.f32 %v1341_v63, 0.0  ;;  %v1342_v16 = vadd.f32 %v12943_v20, %v1258_v18  ;;  %v1554_v43 = vld [vmem:[#allocation3 + $0xd9] sm:$0xff] }
 0x189   : > { %1470 = vst.msk [vmem:[#allocation3 + $0x10a] sm:$0xff] %vm1389_vm3, %v1375_v26  ;;  %v1376_v35 = vmax.f32 %v1344_v53, 0.0  ;;  %v1552_v38 = vld [vmem:[#allocation3 + $0xc1] sm:$0xff] }
 0x18a   : > { %1468 = vst.msk [vmem:[#allocation3 + $0xf2] sm:$0xff] %vm1389_vm3, %v1373_v24  ;;  %v1374_v19 = vmax.f32 %v1342_v16, 0.0  ;;  %v1555_v37 = vld [vmem:[#allocation3 + $0xe1] sm:$0xff] }
 0x18b   : > { %1471 = vst.msk [vmem:[#allocation3 + $0x112] sm:$0xff] %vm1389_vm3, %v1376_v35  ;;  %v1553_v32 = vld [vmem:[#allocation3 + $0xc9] sm:$0xff]  ;;  %v1577_v39 = vpack.c.bf16 %v1555_v37, %v1554_v43  ;;  %v1484_v18 = vld [vmem:[#allocation3] sm:$0xff] }
 0x18c   : > { %1469 = vst.msk [vmem:[#allocation3 + $0xfa] sm:$0xff] %vm1389_vm3, %v1374_v19  ;;  %v10440_v28 = vpop.f32.mrb[20].mxu0  ;;  %v1576_v42 = vpack.c.bf16 %v1553_v32, %v1552_v38  ;;  %v1485_v24 = vld [vmem:[#allocation3 + $0x8] sm:$0xff]  ;;  %v1487_v43 = vld [vmem:[#allocation3 + $0x20] sm:$0xff] }
 0x18d   : > { %v1347_v1 = vadd.f32 %v10440_v28, %v12943_v20  ;;  %v1271_v44 = vpop.f32.mrb[21].mxu0  ;;  %v1516_v28 = vpack.c.bf16 %v1485_v24, %v1484_v18  ;;  %v1500_v18 = vld [vmem:[#allocation3 + $0xc0] sm:$0xff] }
 0x18e   : > { %v1345_v48 = vadd.f32 %v12943_v20, %v1271_v44  ;;  %v10441_v61 = vpop.f32.mrb[22].mxu0  ;;  %10470 = vmatprep.mubr.msk.bf16.mxu0 %vm1389_vm3, %v1576_v42  ;;  %v1489_v44 = vld [vmem:[#allocation3 + $0x38] sm:$0xff]  ;;  %v5129_v24 = vld [vmem:[#allocation3 + $0xc2] sm:$0xff] }
 0x18f   : > { %v1379_v59 = vmax.f32 %v1347_v1, 0.0  ;;  %v1348_v3 = vadd.f32 %v10441_v61, %v12943_v20  ;;  %v1274_v40 = vpop.f32.mrb[23].mxu0  ;;  %10471 = vmatmul.mubr.msk.bf16.gmra.mrb[48].mxu0 %vm1389_vm3, %v1577_v39 }
 0x190   : > { %v1377_v21 = vmax.f32 %v1345_v48, 0.0  ;;  %v1346_v4 = vadd.f32 %v12943_v20, %v1274_v40  ;;  %v1558_v11 = vld [vmem:[#allocation3 + $0x109] sm:$0xff] }
 0x191   : > { %1474 = vst.msk [vmem:[#allocation3 + $0x13a] sm:$0xff] %vm1389_vm3, %v1379_v59  ;;  %v1380_v5 = vmax.f32 %v1348_v3, 0.0  ;;  %v1556_v46 = vld [vmem:[#allocation3 + $0xf1] sm:$0xff]  ;;  %v5118_v59 = vld [vmem:[#allocation3 + $0x3a] sm:$0xff] }
 0x192   : > { %1472 = vst.msk [vmem:[#allocation3 + $0x122] sm:$0xff] %vm1389_vm3, %v1377_v21  ;;  %v1378_v6 = vmax.f32 %v1346_v4, 0.0  ;;  %v1559_v7 = vld [vmem:[#allocation3 + $0x111] sm:$0xff] }
 0x193   : > { %1475 = vst.msk [vmem:[#allocation3 + $0x142] sm:$0xff] %vm1389_vm3, %v1380_v5  ;;  %v1557_v8 = vld [vmem:[#allocation3 + $0xf9] sm:$0xff]  ;;  %v1579_v13 = vpack.c.bf16 %v1559_v7, %v1558_v11  ;;  %v1488_v4 = vld [vmem:[#allocation3 + $0x30] sm:$0xff] }
 0x194   : > { %1473 = vst.msk [vmem:[#allocation3 + $0x12a] sm:$0xff] %vm1389_vm3, %v1378_v6  ;;  %v10444_v9 = vpop.f32.mrb[24].mxu0  ;;  %v1578_v45 = vpack.c.bf16 %v1557_v8, %v1556_v46  ;;  %v5117_v5 = vld [vmem:[#allocation3 + $0x32] sm:$0xff]  ;;  %v1518_v6 = vpack.c.bf16 %v1489_v44, %v1488_v4  ;;  %v13065_v11 = vld [vmem:[%s14426_s3 + $0x30] sm:$0xff]   ;;  %v5135_v4 = vld [vmem:[#allocation3 + $0x10a] sm:$0xff] }
 0x195   : > { %v1351_v12 = vadd.f32 %v10444_v9, %v12943_v20  ;;  %v1287_v52 = vpop.f32.mrb[25].mxu0  ;;  %v13049_v7 = vpack.c.bf16 %v5118_v59, %v5117_v5  ;;  %v12236_v46 = vld [vmem:[%s14426_s3 + $0x28] sm:$0x1f]   ;;  %v1491_v8 = vld [vmem:[#allocation3 + $0x50] sm:$0xff] }
 0x196   : > { %v1349_v27 = vadd.f32 %v12943_v20, %v1287_v52  ;;  %v10445_v29 = vpop.f32.mrb[26].mxu0  ;;  %10474 = vmatprep.mubr.msk.bf16.mxu0 %vm1389_vm3, %v1578_v45  ;;  %10866 = vmatprep.mubr.msk.bf16.mxu1 %vm1389_vm3, %v1578_v45  ;;  %v5120_v9 = vld [vmem:[#allocation3 + $0x52] sm:$0xff]  ;;  %v2149_v45 = vsel %vm1648_vm5, %v12236_v46, 0  ;;  %v1490_v52 = vld [vmem:[#allocation3 + $0x48] sm:$0xff] }
 0x197   : > { %v1383_v47 = vmax.f32 %v1351_v12, 0.0  ;;  %v1352_v17 = vadd.f32 %v10445_v29, %v12943_v20  ;;  %v1290_v57 = vpop.f32.mrb[27].mxu0  ;;  %10475 = vmatmul.mubr.msk.bf16.gmra.mrb[52].mxu0 %vm1389_vm3, %v1579_v13  ;;  %10867 = vmatmul.mubr.msk.bf16.vlgmr.msra.gmra.mrb[0].mxu1 %vm1389_vm3, %v1579_v13  ;;  %v1493_v12 = vld [vmem:[#allocation3 + $0x68] sm:$0xff]  ;;  %v5133_v44 = vld [vmem:[#allocation3 + $0xf2] sm:$0xff] }
 0x198   : > { %v1381_v50 = vmax.f32 %v1349_v27, 0.0  ;;  %v1350_v54 = vadd.f32 %v12943_v20, %v1290_v57  ;;  %10883 = vmatpush3.bf16.msra.mxu1 %v12929_v56  ;;  %v1562_v15 = vld [vmem:[#allocation3 + $0x139] sm:$0xff]  ;;  %v5119_v13 = vld [vmem:[#allocation3 + $0x4a] sm:$0xff]  ;;  %v13067_v27 = vpack.c.bf16 %v1491_v8, %v1490_v52  ;;  %v5121_v57 = vld [vmem:[#allocation3 + $0x62] sm:$0xff] }
 0x199   : > { %1478 = vst.msk [vmem:[#allocation3 + $0x16a] sm:$0xff] %vm1389_vm3, %v1383_v47  ;;  %v1384_v55 = vmax.f32 %v1352_v17, 0.0  ;;  %12169 = vmatprep.subr.msk.bf16.mxu1 %vm1648_vm5, %v12230_v25  ;;  %v1560_v33 = vld [vmem:[#allocation3 + $0x121] sm:$0xff]  ;;  %v5122_v25 = vld [vmem:[#allocation3 + $0x6a] sm:$0xff]  ;;  %v13069_v29 = vpack.c.bf16 %v5120_v9, %v5119_v13  ;;  %v5136_v59 = vld [vmem:[#allocation3 + $0x112] sm:$0xff] }
 0x19a   : > { %1476 = vst.msk [vmem:[#allocation3 + $0x152] sm:$0xff] %vm1389_vm3, %v1381_v50  ;;  %v1382_v30 = vmax.f32 %v1350_v54, 0.0  ;;  %v1563_v34 = vld [vmem:[#allocation3 + $0x141] sm:$0xff]  ;;  %v13081_v50 = vpack.c.bf16 %v5122_v25, %v5121_v57 }
 0x19b   : > { %1479 = vst.msk [vmem:[#allocation3 + $0x172] sm:$0xff] %vm1389_vm3, %v1384_v55  ;;  %v1561_v56 = vld [vmem:[#allocation3 + $0x129] sm:$0xff]  ;;  %v1581_v10 = vpack.c.bf16 %v1563_v34, %v1562_v15  ;;  %v1497_v34 = vld [vmem:[#allocation3 + $0x98] sm:$0xff] }
 0x19c   : > { %1477 = vst.msk [vmem:[#allocation3 + $0x15a] sm:$0xff] %vm1389_vm3, %v1382_v30  ;;  %v10448_v51 = vpop.f32.mrb[28].mxu0  ;;  %v1580_v41 = vpack.c.bf16 %v1561_v56, %v1560_v33  ;;  %10885 = vmatpush3.bf16.msra.mxu1 %v5230_v36  ;;  %v12234_v47 = vld [vmem:[%s14426_s3 + $0xd8] sm:$0x1f]   ;;  %v13093_v55 = vld [vmem:[%s14426_s3 + $0xe0] sm:$0xff]   ;;  %v1495_v36 = vld [vmem:[#allocation3 + $0x80] sm:$0xff] }
 0x19d   : > { %v1355_v49 = vadd.f32 %v10448_v51, %v12943_v20  ;;  %v1303_v31 = vpop.f32.mrb[29].mxu0  ;;  %10918 = vmatprep.subr.bf16.mxu1 %v13025_v60  ;;  %v5538_v54 = vsel %vm1648_vm5, %v12234_v47, 0  ;;  %v5124_v30 = vld [vmem:[#allocation3 + $0x82] sm:$0xff]  ;;  %v5126_v33 = vld [vmem:[#allocation3 + $0x9a] sm:$0xff]  ;;  %v1496_v15 = vld [vmem:[#allocation3 + $0x90] sm:$0xff] }
 0x19e   : > { %v1353_v2 = vadd.f32 %v12943_v20, %v1303_v31  ;;  %v10449_v62 = vpop.f32.mrb[30].mxu0  ;;  %10478 = vmatprep.mubr.msk.bf16.mxu0 %vm1389_vm3, %v1580_v41  ;;  %10870 = vmatprep.mubr.msk.bf16.mxu1 %vm1389_vm3, %v1580_v41  ;;  %v5123_v56 = vld [vmem:[#allocation3 + $0x7a] sm:$0xff]  ;;  %v13100_v31 = vpack.c.bf16 %v1497_v34, %v1496_v15  ;;  %v5137_v8 = vld [vmem:[#allocation3 + $0x122] sm:$0xff] }
 0x19f   : > { %v1387_v22 = vmax.f32 %v1355_v49, 0.0  ;;  %v1356_v23 = vadd.f32 %v10449_v62, %v12943_v20  ;;  %v1306_v63 = vpop.f32.mrb[31].mxu0  ;;  %10479 = vmatmul.mubr.msk.bf16.gmra.mrb[56].mxu0 %vm1389_vm3, %v1581_v10  ;;  %10871 = vmatmul.mubr.msk.bf16.gmra.mrb[4].mxu1 %vm1389_vm3, %v1581_v10  ;;  %v13097_v41 = vpack.c.bf16 %v5124_v30, %v5123_v56  ;;  %v5125_v49 = vld [vmem:[#allocation3 + $0x92] sm:$0xff]  ;;  %v5140_v52 = vld [vmem:[#allocation3 + $0x142] sm:$0xff]  ;;  %v2037_v56 = vld [vmem:[#allocation3 + $0xa] sm:$0xff] }
 0x1a0   : > { %v1385_v14 = vmax.f32 %v1353_v2, 0.0  ;;  %v1354_v26 = vadd.f32 %v12943_v20, %v1306_v63  ;;  %v1566_v32 = vld [vmem:[#allocation3 + $0x169] sm:$0xff]  ;;  %v1486_v20 = vld [vmem:[#allocation3 + $0x18] sm:$0xff]  ;;  %v13102_v10 = vpack.c.bf16 %v5126_v33, %v5125_v49 }
 0x1a1   : > { %1482 = vst.msk [vmem:[#allocation3 + $0x19a] sm:$0xff] %vm1389_vm3, %v1387_v22  ;;  %v1388_v53 = vmax.f32 %v1356_v23, 0.0  ;;  %v1564_v19 = vld [vmem:[#allocation3 + $0x151] sm:$0xff]  ;;  %v1517_v61 = vpack.c.bf16 %v1487_v43, %v1486_v20  ;;  %v1501_v22 = vld [vmem:[#allocation3 + $0xc8] sm:$0xff] }
 0x1a2   : > { %1480 = vst.msk [vmem:[#allocation3 + $0x182] sm:$0xff] %vm1389_vm3, %v1385_v14  ;;  %v1386_v16 = vmax.f32 %v1354_v26, 0.0  ;;  %v1567_v35 = vld [vmem:[#allocation3 + $0x171] sm:$0xff]  ;;  %v1498_v63 = vld [vmem:[#allocation3 + $0xa8] sm:$0xff] }
 0x1a3   : > { %1483 = vst.msk [vmem:[#allocation3 + $0x1a2] sm:$0xff] %vm1389_vm3, %v1388_v53  ;;  %v1565_v37 = vld [vmem:[#allocation3 + $0x159] sm:$0xff]  ;;  %v1583_v42 = vpack.c.bf16 %v1567_v35, %v1566_v32  ;;  %v1499_v2 = vld [vmem:[#allocation3 + $0xb0] sm:$0xff] }
 0x1a4   : > { %1481 = vst.msk [vmem:[#allocation3 + $0x18a] sm:$0xff] %vm1389_vm3, %v1386_v16  ;;  %v1582_v38 = vpack.c.bf16 %v1565_v37, %v1564_v19  ;;  %v5128_v62 = vld [vmem:[#allocation3 + $0xb2] sm:$0xff]  ;;  %v5130_v23 = vld [vmem:[#allocation3 + $0xca] sm:$0xff]  ;;  %v13112_v26 = vpack.c.bf16 %v1499_v2, %v1498_v63  ;;  %v13116_v16 = vpack.c.bf16 %v1501_v22, %v1500_v18  ;;  %v1503_v19 = vld [vmem:[#allocation3 + $0xe0] sm:$0xff] }
 0x1a5   : > { %v5127_v14 = vld [vmem:[#allocation3 + $0xaa] sm:$0xff]  ;;  %v13118_v35 = vpack.c.bf16 %v5130_v23, %v5129_v24  ;;  %v5132_v37 = vld [vmem:[#allocation3 + $0xe2] sm:$0xff]  ;;  %v5134_v32 = vld [vmem:[#allocation3 + $0xfa] sm:$0xff] }
 0x1a6   : > { %10482 = vmatprep.mubr.msk.bf16.mxu0 %vm1389_vm3, %v1582_v38  ;;  %10874 = vmatprep.mubr.msk.bf16.mxu1 %vm1389_vm3, %v1582_v38  ;;  %v13114_v53 = vpack.c.bf16 %v5128_v62, %v5127_v14  ;;  %v1505_v38 = vld [vmem:[#allocation3 + $0xf8] sm:$0xff]  ;;  %v1515_v15 = vld [vmem:[#allocation3 + $0x170] sm:$0xff]  ;;  %v1514_v62 = vld [vmem:[#allocation3 + $0x168] sm:$0xff] }
 0x1a7   : > { %10483 = vmatmul.mubr.msk.bf16.gmra.mrb[60].mxu0 %vm1389_vm3, %v1583_v42  ;;  %10875 = vmatmul.mubr.msk.bf16.gmra.mrb[8].mxu1 %vm1389_vm3, %v1583_v42  ;;  %v5131_v42 = vld [vmem:[#allocation3 + $0xda] sm:$0xff]  ;;  %v5141_v30 = vld [vmem:[#allocation3 + $0x152] sm:$0xff]  ;;  %v5143_v22 = vld [vmem:[#allocation3 + $0x16a] sm:$0xff]  ;;  %v13176_v63 = vpack.c.bf16 %v1515_v15, %v1514_v62 }
 0x1a8   : > { %10490 = vmatprep.mubr.msk.bf16.mxu0 %vm1389_vm3, %v1516_v28  ;;  %v4839_v40 = vld [vmem:[#allocation3 + $0x199] sm:$0xff]  ;;  %v13130_v43 = vpack.c.bf16 %v5132_v37, %v5131_v42  ;;  %v2039_v37 = vld [vmem:[#allocation3 + $0x22] sm:$0xff] }
 0x1a9   : > { %v4837_v39 = vld [vmem:[#allocation3 + $0x181] sm:$0xff]  ;;  %v1502_v28 = vld [vmem:[#allocation3 + $0xd8] sm:$0xff] }
 0x1aa   : > { %v4840_v1 = vld [vmem:[#allocation3 + $0x1a1] sm:$0xff]  ;;  %v13128_v20 = vpack.c.bf16 %v1503_v19, %v1502_v28  ;;  %v1513_v13 = vld [vmem:[#allocation3 + $0x158] sm:$0xff] }
 0x1ab   : > { %v4838_v48 = vld [vmem:[#allocation3 + $0x189] sm:$0xff]  ;;  %v4856_v21 = vpack.c.bf16 %v4840_v1, %v4839_v40  ;;  %v5142_v25 = vld [vmem:[#allocation3 + $0x15a] sm:$0xff]  ;;  %v5144_v49 = vld [vmem:[#allocation3 + $0x172] sm:$0xff] }
 0x1ac   : > { %v4855_v3 = vpack.c.bf16 %v4838_v48, %v4837_v39  ;;  %v1504_v1 = vld [vmem:[#allocation3 + $0xf0] sm:$0xff]  ;;  %v13134_v48 = vpack.c.bf16 %v5134_v32, %v5133_v44  ;;  %v13166_v33 = vpack.c.bf16 %v5142_v25, %v5141_v30  ;;  %v13178_v14 = vpack.c.bf16 %v5144_v49, %v5143_v22  ;;  %v5145_v18 = vld [vmem:[#allocation3 + $0x182] sm:$0xff]  ;;  %v2038_v19 = vld [vmem:[#allocation3 + $0x1a] sm:$0xff] }
 0x1ad   : > { %v13132_v39 = vpack.c.bf16 %v1505_v38, %v1504_v1  ;;  %v5138_v40 = vld [vmem:[#allocation3 + $0x12a] sm:$0xff]  ;;  %v5148_v38 = vld [vmem:[#allocation3 + $0x1a2] sm:$0xff]  ;;  %v2069_v32 = vpack.c.bf16 %v2039_v37, %v2038_v19  ;;  %v5425_v28 = vld [vmem:[#allocation3 + $0x33] sm:$0xff] }
 0x1ae   : > { %10878 = vmatprep.mubr.msk.bf16.mxu1 %vm1389_vm3, %v4855_v3  ;;  %v1509_v3 = vld [vmem:[#allocation3 + $0x128] sm:$0xff]  ;;  %v5426_v42 = vld [vmem:[#allocation3 + $0x3b] sm:$0xff]  ;;  %v5436_v30 = vld [vmem:[#allocation3 + $0xb3] sm:$0xff] }
 0x1af   : > { %10491 = vmatmul.mubr.msk.bf16.vlgmr.msra.gmra.mrb[32].mxu0 %vm1389_vm3, %v1517_v61  ;;  %10879 = vmatmul.mubr.msk.bf16.gmra.mrb[12].mxu1 %vm1389_vm3, %v4856_v21  ;;  %v1507_v61 = vld [vmem:[#allocation3 + $0x110] sm:$0xff]  ;;  %v1506_v21 = vld [vmem:[#allocation3 + $0x108] sm:$0xff]  ;;  %v5147_v1 = vld [vmem:[#allocation3 + $0x19a] sm:$0xff] }
 0x1b0   : > { %10494 = vmatprep.mubr.msk.bf16.mxu0 %vm1389_vm3, %v1518_v6  ;;  %10886 = vmatprep.mubr.msk.bf16.mxu1 %vm1389_vm3, %v13049_v7  ;;  %v13144_v5 = vpack.c.bf16 %v1507_v61, %v1506_v21  ;;  %v13146_v6 = vpack.c.bf16 %v5136_v59, %v5135_v4  ;;  %v5146_v2 = vld [vmem:[#allocation3 + $0x18a] sm:$0xff]  ;;  %v5164_v44 = vpack.c.bf16 %v5148_v38, %v5147_v1  ;;  %v5442_v62 = vld [vmem:[#allocation3 + $0xfb] sm:$0xff]  ;;  %v5449_v38 = vld [vmem:[#allocation3 + $0x153] sm:$0xff] }
 0x1b1   : > { %10523 = vmatpush3.bf16.msra.mxu0 %v12950_v0  ;;  %v1492_v0 = vld [vmem:[#allocation3 + $0x60] sm:$0xff]  ;;  %v5163_v24 = vpack.c.bf16 %v5146_v2, %v5145_v18  ;;  %v13186_v61 = vpack.c.bf16 %v5426_v42, %v5425_v28  ;;  %v12240_v59 = vld [vmem:[%s14426_s3 + $0x38] sm:$0x1f]   ;;  %v13203_v4 = vld [vmem:[%s14426_s3 + $0x40] sm:$0xff]  }
 0x1b2   : > { %12158 = vmatprep.subr.msk.bf16.mxu0 %vm1648_vm5, %v12236_v46  ;;  %v13074_v17 = vpack.c.bf16 %v1493_v12, %v1492_v0  ;;  %v1508_v46 = vld [vmem:[#allocation3 + $0x120] sm:$0xff]  ;;  %v1510_v0 = vld [vmem:[#allocation3 + $0x138] sm:$0xff]  ;;  %v2457_v21 = vsel %vm1648_vm5, %v12240_v59, 0  ;;  %v5451_v1 = vld [vmem:[#allocation3 + $0x16b] sm:$0xff] }
 0x1b3   : > { %v13148_v9 = vpack.c.bf16 %v1509_v3, %v1508_v46  ;;  %v1511_v12 = vld [vmem:[#allocation3 + $0x140] sm:$0xff]  ;;  %v5427_v3 = vld [vmem:[#allocation3 + $0x4b] sm:$0xff]  ;;  %v5441_v2 = vld [vmem:[#allocation3 + $0xf3] sm:$0xff] }
 0x1b4   : > { %v13160_v57 = vpack.c.bf16 %v1511_v12, %v1510_v0  ;;  %v5429_v46 = vld [vmem:[#allocation3 + $0x63] sm:$0xff]  ;;  %v5433_v0 = vld [vmem:[#allocation3 + $0x93] sm:$0xff] }
 0x1b5   : > { %10525 = vmatpush3.bf16.msra.mxu0 %v2149_v45  ;;  %v13150_v45 = vpack.c.bf16 %v5138_v40, %v5137_v8  ;;  %v5428_v40 = vld [vmem:[#allocation3 + $0x53] sm:$0xff]  ;;  %v5430_v8 = vld [vmem:[#allocation3 + $0x6b] sm:$0xff]  ;;  %v5432_v25 = vld [vmem:[#allocation3 + $0x83] sm:$0xff] }
 0x1b6   : > { %10558 = vmatprep.subr.bf16.mxu0 %v13065_v11  ;;  %v13205_v12 = vpack.c.bf16 %v5428_v40, %v5427_v3  ;;  %v5445_v18 = vld [vmem:[#allocation3 + $0x123] sm:$0xff]  ;;  %v5454_v3 = vld [vmem:[#allocation3 + $0x18b] sm:$0xff] }
 0x1b7   : > { %10495 = vmatmul.mubr.msk.bf16.gmra.mrb[36].mxu0 %vm1389_vm3, %v13067_v27  ;;  %10887 = vmatmul.mubr.msk.bf16.vlgmr.msra.gmra.mrb[16].mxu1 %vm1389_vm3, %v13069_v29 }
 0x1b8   : > { %10919 = vmatpush3.bf16.msra.mxu1 %v13025_v60  ;;  %10498 = vmatprep.mubr.msk.bf16.mxu0 %vm1389_vm3, %v13074_v17  ;;  %v1494_v60 = vld [vmem:[#allocation3 + $0x78] sm:$0xff] }
 0x1b9   : > { %10890 = vmatprep.mubr.msk.bf16.mxu1 %vm1389_vm3, %v13081_v50  ;;  %12170 = vmatprep.subr.msk.bf16.mxu1 %vm1648_vm5, %v12234_v47  ;;  %v13095_v51 = vpack.c.bf16 %v1495_v36, %v1494_v60  ;;  %v5139_v47 = vld [vmem:[#allocation3 + $0x13a] sm:$0xff]  ;;  %v1512_v36 = vld [vmem:[#allocation3 + $0x150] sm:$0xff]  ;;  %v2036_v60 = vld [vmem:[#allocation3 + $0x2] sm:$0xff] }
 0x1ba   : > { %v13164_v34 = vpack.c.bf16 %v1513_v13, %v1512_v36  ;;  %v2068_v23 = vpack.c.bf16 %v2037_v56, %v2036_v60  ;;  %v5431_v13 = vld [vmem:[#allocation3 + $0x7b] sm:$0xff]  ;;  %v5435_v36 = vld [vmem:[#allocation3 + $0xab] sm:$0xff]  ;;  %v5437_v60 = vld [vmem:[#allocation3 + $0xc3] sm:$0xff] }
 0x1bb   : > { %v5438_v56 = vld [vmem:[#allocation3 + $0xcb] sm:$0xff]  ;;  %v13242_v15 = vpack.c.bf16 %v5436_v30, %v5435_v36  ;;  %v5736_v30 = vld [vmem:[#allocation3 + $0x54] sm:$0xff] }
 0x1bc   : > { %10921 = vmatpush3.bf16.msra.mxu1 %v5538_v54  ;;  %v13162_v54 = vpack.c.bf16 %v5140_v52, %v5139_v47  ;;  %v5434_v47 = vld [vmem:[#allocation3 + $0x9b] sm:$0xff]  ;;  %v13244_v49 = vpack.c.bf16 %v5438_v56, %v5437_v60  ;;  %v5735_v36 = vld [vmem:[#allocation3 + $0x4c] sm:$0xff] }
 0x1bd   : > { %10954 = vmatprep.subr.bf16.mxu1 %v13093_v55  ;;  %v13315_v56 = vld [vmem:[%s14426_s3 + $0x50] sm:$0xff]  }
 0x1bf   : > { %10499 = vmatmul.mubr.msk.bf16.gmra.mrb[40].mxu0 %vm1389_vm3, %v13095_v51  ;;  %10891 = vmatmul.mubr.msk.bf16.gmra.mrb[20].mxu1 %vm1389_vm3, %v13097_v41 }
 0x1c0   : > { %10502 = vmatprep.mubr.msk.bf16.mxu0 %vm1389_vm3, %v13100_v31  ;;  %10894 = vmatprep.mubr.msk.bf16.mxu1 %vm1389_vm3, %v13102_v10 }
 0x1c7   : > { %10503 = vmatmul.mubr.msk.bf16.gmra.mrb[44].mxu0 %vm1389_vm3, %v13112_v26  ;;  %10895 = vmatmul.mubr.msk.bf16.gmra.mrb[24].mxu1 %vm1389_vm3, %v13114_v53 }
 0x1c8   : > { %10506 = vmatprep.mubr.msk.bf16.mxu0 %vm1389_vm3, %v13116_v16  ;;  %10898 = vmatprep.mubr.msk.bf16.mxu1 %vm1389_vm3, %v13118_v35 }
 0x1cf   : > { %10507 = vmatmul.mubr.msk.bf16.gmra.mrb[48].mxu0 %vm1389_vm3, %v13128_v20  ;;  %10899 = vmatmul.mubr.msk.bf16.gmra.mrb[28].mxu1 %vm1389_vm3, %v13130_v43 }
 0x1d0   : > { %10510 = vmatprep.mubr.msk.bf16.mxu0 %vm1389_vm3, %v13132_v39  ;;  %10902 = vmatprep.mubr.msk.bf16.mxu1 %vm1389_vm3, %v13134_v48 }
 0x1d7   : > { %10511 = vmatmul.mubr.msk.bf16.gmra.mrb[52].mxu0 %vm1389_vm3, %v13144_v5  ;;  %10903 = vmatmul.mubr.msk.bf16.gmra.mrb[0].mxu1 %vm1389_vm3, %v13146_v6 }
 0x1d8   : > { %10514 = vmatprep.mubr.msk.bf16.mxu0 %vm1389_vm3, %v13148_v9  ;;  %10906 = vmatprep.mubr.msk.bf16.mxu1 %vm1389_vm3, %v13150_v45 }
 0x1df   : > { %10515 = vmatmul.mubr.msk.bf16.gmra.mrb[56].mxu0 %vm1389_vm3, %v13160_v57  ;;  %10907 = vmatmul.mubr.msk.bf16.gmra.mrb[4].mxu1 %vm1389_vm3, %v13162_v54 }
 0x1e0   : > { %10518 = vmatprep.mubr.msk.bf16.mxu0 %vm1389_vm3, %v13164_v34  ;;  %10910 = vmatprep.mubr.msk.bf16.mxu1 %vm1389_vm3, %v13166_v33 }
 0x1e7   : > { %10519 = vmatmul.mubr.msk.bf16.gmra.mrb[60].mxu0 %vm1389_vm3, %v13176_v63  ;;  %10911 = vmatmul.mubr.msk.bf16.gmra.mrb[8].mxu1 %vm1389_vm3, %v13178_v14 }
 0x1e8   : > { %10914 = vmatprep.mubr.msk.bf16.mxu1 %vm1389_vm3, %v5163_v24  ;;  %10526 = vmatprep.mubr.msk.bf16.mxu0 %vm1389_vm3, %v2068_v23  ;;  %v13256_v23 = vpack.c.bf16 %v5442_v62, %v5441_v2  ;;  %v5446_v24 = vld [vmem:[#allocation3 + $0x12b] sm:$0xff]  ;;  %v13317_v2 = vpack.c.bf16 %v5736_v30, %v5735_v36 }
 0x1e9   : > { %v13268_v37 = vpack.c.bf16 %v5446_v24, %v5445_v18  ;;  %v5741_v18 = vld [vmem:[#allocation3 + $0x94] sm:$0xff]  ;;  %v5742_v24 = vld [vmem:[#allocation3 + $0x9c] sm:$0xff]  ;;  %v5762_v36 = vld [vmem:[#allocation3 + $0x18c] sm:$0xff] }
 0x1ef   : > { %10527 = vmatmul.mubr.msk.bf16.vlgmr.msra.gmra.mrb[32].mxu0 %vm1389_vm3, %v2069_v32  ;;  %10915 = vmatmul.mubr.msk.bf16.gmra.mrb[12].mxu1 %vm1389_vm3, %v5164_v44  ;;  %v5450_v32 = vld [vmem:[#allocation3 + $0x15b] sm:$0xff]  ;;  %v5452_v44 = vld [vmem:[#allocation3 + $0x173] sm:$0xff] }
 0x1f0   : > { %10530 = vmatprep.mubr.msk.bf16.mxu0 %vm1389_vm3, %v13049_v7  ;;  %10922 = vmatprep.mubr.msk.bf16.mxu1 %vm1389_vm3, %v13186_v61  ;;  %v12238_v7 = vld [vmem:[%s14426_s3 + $0xe8] sm:$0x1f]   ;;  %v13280_v42 = vpack.c.bf16 %v5450_v32, %v5449_v38  ;;  %v5745_v38 = vld [vmem:[#allocation3 + $0xc4] sm:$0xff]  ;;  %v5746_v32 = vld [vmem:[#allocation3 + $0xcc] sm:$0xff] }
 0x1f1   : > { %10559 = vmatpush3.bf16.msra.mxu0 %v13065_v11  ;;  %v13215_v11 = vpack.c.bf16 %v5430_v8, %v5429_v46  ;;  %v5846_v52 = vsel %vm1648_vm5, %v12238_v7, 0  ;;  %v5455_v8 = vld [vmem:[#allocation3 + $0x19b] sm:$0xff] }
 0x1f2   : > { %12159 = vmatprep.subr.msk.bf16.mxu0 %vm1648_vm5, %v12240_v59  ;;  %v5453_v59 = vld [vmem:[#allocation3 + $0x183] sm:$0xff] }
 0x1f3   : > { %v5471_v46 = vpack.c.bf16 %v5454_v3, %v5453_v59 }
 0x1f5   : > { %10561 = vmatpush3.bf16.msra.mxu0 %v2457_v21  ;;  %v13290_v21 = vpack.c.bf16 %v5452_v44, %v5451_v1  ;;  %v5749_v1 = vld [vmem:[#allocation3 + $0xf4] sm:$0xff]  ;;  %v5750_v44 = vld [vmem:[#allocation3 + $0xfc] sm:$0xff] }
 0x1f6   : > { %10594 = vmatprep.subr.bf16.mxu0 %v13203_v4  ;;  %v13368_v3 = vpack.c.bf16 %v5750_v44, %v5749_v1  ;;  %v2970_v1 = vld [vmem:[#allocation3 + $0x80] sm:$0xff] }
 0x1f7   : > { %10531 = vmatmul.mubr.msk.bf16.gmra.mrb[36].mxu0 %vm1389_vm3, %v13069_v29  ;;  %10923 = vmatmul.mubr.msk.bf16.vlgmr.msra.gmra.mrb[16].mxu1 %vm1389_vm3, %v13205_v12  ;;  %v13227_v29 = vld [vmem:[%s14426_s3 + $0xf0] sm:$0xff]  }
 0x1f8   : > { %10955 = vmatpush3.bf16.msra.mxu1 %v13093_v55  ;;  %10534 = vmatprep.mubr.msk.bf16.mxu0 %vm1389_vm3, %v13081_v50  ;;  %v13229_v55 = vpack.c.bf16 %v5432_v25, %v5431_v13  ;;  %v13232_v50 = vpack.c.bf16 %v5434_v47, %v5433_v0  ;;  %v5733_v13 = vld [vmem:[#allocation3 + $0x34] sm:$0xff]  ;;  %v5734_v25 = vld [vmem:[#allocation3 + $0x3c] sm:$0xff] }
 0x1f9   : > { %10926 = vmatprep.mubr.msk.bf16.mxu1 %vm1389_vm3, %v13215_v11  ;;  %12171 = vmatprep.subr.msk.bf16.mxu1 %vm1648_vm5, %v12238_v7  ;;  %v5456_v7 = vld [vmem:[#allocation3 + $0x1a3] sm:$0xff]  ;;  %v13298_v47 = vpack.c.bf16 %v5734_v25, %v5733_v13  ;;  %v5759_v25 = vld [vmem:[#allocation3 + $0x16c] sm:$0xff] }
 0x1fa   : > { %v5472_v0 = vpack.c.bf16 %v5456_v7, %v5455_v8  ;;  %v5757_v8 = vld [vmem:[#allocation3 + $0x154] sm:$0xff]  ;;  %v5758_v7 = vld [vmem:[#allocation3 + $0x15c] sm:$0xff] }
 0x1fb   : > { %v13392_v13 = vpack.c.bf16 %v5758_v7, %v5757_v8  ;;  %v2967_v44 = vld [vmem:[#allocation3 + $0x60] sm:$0xff]  ;;  %v13534_v8 = vld [vmem:[%s14426_s3 + $0x120] sm:$0xff]   ;;  %v2972_v7 = vld [vmem:[#allocation3 + $0x98] sm:$0xff] }
 0x1fc   : > { %10957 = vmatpush3.bf16.msra.mxu1 %v5846_v52 }
 0x1fd   : > { %10990 = vmatprep.subr.bf16.mxu1 %v13227_v29 }
 0x1ff   : > { %10535 = vmatmul.mubr.msk.bf16.gmra.mrb[40].mxu0 %vm1389_vm3, %v13097_v41  ;;  %10927 = vmatmul.mubr.msk.bf16.gmra.mrb[20].mxu1 %vm1389_vm3, %v13229_v55  ;;  %v5439_v41 = vld [vmem:[#allocation3 + $0xdb] sm:$0xff] }
 0x200   : > { %10538 = vmatprep.mubr.msk.bf16.mxu0 %vm1389_vm3, %v13102_v10  ;;  %10930 = vmatprep.mubr.msk.bf16.mxu1 %vm1389_vm3, %v13232_v50  ;;  %v5440_v10 = vld [vmem:[#allocation3 + $0xe3] sm:$0xff] }
 0x201   : > { %v13254_v22 = vpack.c.bf16 %v5440_v10, %v5439_v41  ;;  %v5737_v41 = vld [vmem:[#allocation3 + $0x64] sm:$0xff]  ;;  %v5738_v10 = vld [vmem:[#allocation3 + $0x6c] sm:$0xff] }
 0x207   : > { %10539 = vmatmul.mubr.msk.bf16.gmra.mrb[44].mxu0 %vm1389_vm3, %v13114_v53  ;;  %10931 = vmatmul.mubr.msk.bf16.gmra.mrb[24].mxu1 %vm1389_vm3, %v13242_v15  ;;  %v5443_v53 = vld [vmem:[#allocation3 + $0x10b] sm:$0xff] }
 0x208   : > { %10542 = vmatprep.mubr.msk.bf16.mxu0 %vm1389_vm3, %v13118_v35  ;;  %10934 = vmatprep.mubr.msk.bf16.mxu1 %vm1389_vm3, %v13244_v49  ;;  %v5444_v35 = vld [vmem:[#allocation3 + $0x113] sm:$0xff] }
 0x209   : > { %v13266_v19 = vpack.c.bf16 %v5444_v35, %v5443_v53  ;;  %v5739_v53 = vld [vmem:[#allocation3 + $0x7c] sm:$0xff]  ;;  %v5740_v35 = vld [vmem:[#allocation3 + $0x84] sm:$0xff] }
 0x20f   : > { %10543 = vmatmul.mubr.msk.bf16.gmra.mrb[48].mxu0 %vm1389_vm3, %v13130_v43  ;;  %10935 = vmatmul.mubr.msk.bf16.gmra.mrb[28].mxu1 %vm1389_vm3, %v13254_v22  ;;  %v5447_v43 = vld [vmem:[#allocation3 + $0x13b] sm:$0xff] }
 0x210   : > { %10546 = vmatprep.mubr.msk.bf16.mxu0 %vm1389_vm3, %v13134_v48  ;;  %10938 = vmatprep.mubr.msk.bf16.mxu1 %vm1389_vm3, %v13256_v23  ;;  %v5448_v48 = vld [vmem:[#allocation3 + $0x143] sm:$0xff] }
 0x211   : > { %v13278_v28 = vpack.c.bf16 %v5448_v48, %v5447_v43  ;;  %v5743_v43 = vld [vmem:[#allocation3 + $0xac] sm:$0xff]  ;;  %v5744_v48 = vld [vmem:[#allocation3 + $0xb4] sm:$0xff] }
 0x217   : > { %10547 = vmatmul.mubr.msk.bf16.gmra.mrb[52].mxu0 %vm1389_vm3, %v13146_v6  ;;  %10939 = vmatmul.mubr.msk.bf16.gmra.mrb[0].mxu1 %vm1389_vm3, %v13266_v19  ;;  %v2344_v6 = vld [vmem:[#allocation3 + $0x3] sm:$0xff] }
 0x218   : > { %10550 = vmatprep.mubr.msk.bf16.mxu0 %vm1389_vm3, %v13150_v45  ;;  %10942 = vmatprep.mubr.msk.bf16.mxu1 %vm1389_vm3, %v13268_v37  ;;  %v2345_v45 = vld [vmem:[#allocation3 + $0xb] sm:$0xff] }
 0x219   : > { %v2376_v40 = vpack.c.bf16 %v2345_v45, %v2344_v6  ;;  %v13354_v6 = vpack.c.bf16 %v5744_v48, %v5743_v43  ;;  %v13356_v45 = vpack.c.bf16 %v5746_v32, %v5745_v38  ;;  %v6350_v43 = vld [vmem:[#allocation3 + $0x49] sm:$0xff]  ;;  %v12252_v32 = vld [vmem:[%s14426_s3 + $0x68] sm:$0x1f]  }
 0x21f   : > { %10551 = vmatmul.mubr.msk.bf16.gmra.mrb[56].mxu0 %vm1389_vm3, %v13162_v54  ;;  %10943 = vmatmul.mubr.msk.bf16.gmra.mrb[4].mxu1 %vm1389_vm3, %v13278_v28  ;;  %v2346_v54 = vld [vmem:[#allocation3 + $0x1b] sm:$0xff] }
 0x220   : > { %10554 = vmatprep.mubr.msk.bf16.mxu0 %vm1389_vm3, %v13166_v33  ;;  %10946 = vmatprep.mubr.msk.bf16.mxu1 %vm1389_vm3, %v13280_v42  ;;  %v2347_v33 = vld [vmem:[#allocation3 + $0x23] sm:$0xff] }
 0x221   : > { %v2377_v52 = vpack.c.bf16 %v2347_v33, %v2346_v54 }
 0x227   : > { %10555 = vmatmul.mubr.msk.bf16.gmra.mrb[60].mxu0 %vm1389_vm3, %v13178_v14  ;;  %10947 = vmatmul.mubr.msk.bf16.gmra.mrb[8].mxu1 %vm1389_vm3, %v13290_v21  ;;  %v12244_v14 = vld [vmem:[%s14426_s3 + $0x48] sm:$0x1f]  }
 0x228   : > { %10950 = vmatprep.mubr.msk.bf16.mxu1 %vm1389_vm3, %v5471_v46  ;;  %10562 = vmatprep.mubr.msk.bf16.mxu0 %vm1389_vm3, %v2376_v40  ;;  %v2765_v60 = vsel %vm1648_vm5, %v12244_v14, 0  ;;  %v5753_v40 = vld [vmem:[#allocation3 + $0x124] sm:$0xff]  ;;  %v5754_v46 = vld [vmem:[#allocation3 + $0x12c] sm:$0xff] }
 0x229   : > { %v13380_v33 = vpack.c.bf16 %v5754_v46, %v5753_v40  ;;  %v2969_v40 = vld [vmem:[#allocation3 + $0x78] sm:$0xff]  ;;  %v12250_v46 = vld [vmem:[%s14426_s3 + $0x118] sm:$0x1f]  }
 0x22f   : > { %10563 = vmatmul.mubr.msk.bf16.vlgmr.msra.gmra.mrb[32].mxu0 %vm1389_vm3, %v2377_v52  ;;  %10951 = vmatmul.mubr.msk.bf16.gmra.mrb[12].mxu1 %vm1389_vm3, %v5472_v0  ;;  %v5760_v0 = vld [vmem:[#allocation3 + $0x174] sm:$0xff] }
 0x230   : > { %10566 = vmatprep.mubr.msk.bf16.mxu0 %vm1389_vm3, %v13186_v61  ;;  %10958 = vmatprep.mubr.msk.bf16.mxu1 %vm1389_vm3, %v13298_v47  ;;  %v12242_v61 = vld [vmem:[%s14426_s3 + $0xf8] sm:$0x1f]  }
 0x231   : > { %10595 = vmatpush3.bf16.msra.mxu0 %v13203_v4  ;;  %v13327_v4 = vpack.c.bf16 %v5738_v10, %v5737_v41  ;;  %v6155_v62 = vsel %vm1648_vm5, %v12242_v61, 0  ;;  %v5763_v10 = vld [vmem:[#allocation3 + $0x19c] sm:$0xff] }
 0x232   : > { %12160 = vmatprep.subr.msk.bf16.mxu0 %vm1648_vm5, %v12244_v14  ;;  %v5761_v14 = vld [vmem:[#allocation3 + $0x184] sm:$0xff] }
 0x233   : > { %v5779_v41 = vpack.c.bf16 %v5762_v36, %v5761_v14  ;;  %v2973_v36 = vld [vmem:[#allocation3 + $0xa8] sm:$0xff] }
 0x235   : > { %10597 = vmatpush3.bf16.msra.mxu0 %v2765_v60  ;;  %v13402_v60 = vpack.c.bf16 %v5760_v0, %v5759_v25  ;;  %v6356_v25 = vld [vmem:[#allocation3 + $0x91] sm:$0xff] }
 0x236   : > { %10630 = vmatprep.subr.bf16.mxu0 %v13315_v56 }
 0x237   : > { %10567 = vmatmul.mubr.msk.bf16.gmra.mrb[36].mxu0 %vm1389_vm3, %v13205_v12  ;;  %10959 = vmatmul.mubr.msk.bf16.vlgmr.msra.gmra.mrb[16].mxu1 %vm1389_vm3, %v13317_v2  ;;  %v13339_v12 = vld [vmem:[%s14426_s3 + $0x100] sm:$0xff]  }
 0x238   : > { %10991 = vmatpush3.bf16.msra.mxu1 %v13227_v29  ;;  %10570 = vmatprep.mubr.msk.bf16.mxu0 %vm1389_vm3, %v13215_v11  ;;  %v13341_v29 = vpack.c.bf16 %v5740_v35, %v5739_v53  ;;  %v13344_v11 = vpack.c.bf16 %v5742_v24, %v5741_v18  ;;  %v12248_v35 = vld [vmem:[%s14426_s3 + $0x58] sm:$0x1f]   ;;  %v13425_v18 = vld [vmem:[%s14426_s3 + $0x60] sm:$0xff]   ;;  %v12246_v24 = vld [vmem:[%s14426_s3 + $0x108] sm:$0x1f]  }
 0x239   : > { %10962 = vmatprep.mubr.msk.bf16.mxu1 %vm1389_vm3, %v13327_v4  ;;  %12172 = vmatprep.subr.msk.bf16.mxu1 %vm1648_vm5, %v12242_v61  ;;  %v5764_v61 = vld [vmem:[#allocation3 + $0x1a4] sm:$0xff] }
 0x23a   : > { %v5780_v53 = vpack.c.bf16 %v5764_v61, %v5763_v10  ;;  %v2978_v10 = vld [vmem:[#allocation3 + $0xe0] sm:$0xff] }
 0x23b   : > { %v6363_v61 = vld [vmem:[#allocation3 + $0xe1] sm:$0xff] }
 0x23c   : > { %10993 = vmatpush3.bf16.msra.mxu1 %v6155_v62 }
 0x23d   : > { %11026 = vmatprep.subr.bf16.mxu1 %v13339_v12 }
 0x23f   : > { %10571 = vmatmul.mubr.msk.bf16.gmra.mrb[40].mxu0 %vm1389_vm3, %v13229_v55  ;;  %10963 = vmatmul.mubr.msk.bf16.gmra.mrb[20].mxu1 %vm1389_vm3, %v13341_v29  ;;  %v5747_v55 = vld [vmem:[#allocation3 + $0xdc] sm:$0xff] }
 0x240   : > { %10574 = vmatprep.mubr.msk.bf16.mxu0 %vm1389_vm3, %v13232_v50  ;;  %10966 = vmatprep.mubr.msk.bf16.mxu1 %vm1389_vm3, %v13344_v11  ;;  %v5748_v50 = vld [vmem:[#allocation3 + $0xe4] sm:$0xff] }
 0x241   : > { %v13366_v59 = vpack.c.bf16 %v5748_v50, %v5747_v55  ;;  %v3382_v55 = vsel %vm1648_vm5, %v12252_v32, 0  ;;  %v13512_v50 = vld [vmem:[%s14426_s3 + $0x70] sm:$0xff]  }
 0x247   : > { %10575 = vmatmul.mubr.msk.bf16.gmra.mrb[44].mxu0 %vm1389_vm3, %v13242_v15  ;;  %10967 = vmatmul.mubr.msk.bf16.gmra.mrb[24].mxu1 %vm1389_vm3, %v13354_v6  ;;  %v5751_v15 = vld [vmem:[#allocation3 + $0x10c] sm:$0xff] }
 0x248   : > { %10578 = vmatprep.mubr.msk.bf16.mxu0 %vm1389_vm3, %v13244_v49  ;;  %10970 = vmatprep.mubr.msk.bf16.mxu1 %vm1389_vm3, %v13356_v45  ;;  %v5752_v49 = vld [vmem:[#allocation3 + $0x114] sm:$0xff] }
 0x249   : > { %v13378_v54 = vpack.c.bf16 %v5752_v49, %v5751_v15 }
 0x24f   : > { %10579 = vmatmul.mubr.msk.bf16.gmra.mrb[48].mxu0 %vm1389_vm3, %v13254_v22  ;;  %10971 = vmatmul.mubr.msk.bf16.gmra.mrb[28].mxu1 %vm1389_vm3, %v13366_v59  ;;  %v5755_v22 = vld [vmem:[#allocation3 + $0x13c] sm:$0xff] }
 0x250   : > { %10582 = vmatprep.mubr.msk.bf16.mxu0 %vm1389_vm3, %v13256_v23  ;;  %10974 = vmatprep.mubr.msk.bf16.mxu1 %vm1389_vm3, %v13368_v3  ;;  %v5756_v23 = vld [vmem:[#allocation3 + $0x144] sm:$0xff] }
 0x251   : > { %v13390_v52 = vpack.c.bf16 %v5756_v23, %v5755_v22  ;;  %v6771_v23 = vsel %vm1648_vm5, %v12250_v46, 0 }
 0x257   : > { %10583 = vmatmul.mubr.msk.bf16.gmra.mrb[52].mxu0 %vm1389_vm3, %v13266_v19  ;;  %10975 = vmatmul.mubr.msk.bf16.gmra.mrb[0].mxu1 %vm1389_vm3, %v13378_v54  ;;  %v2652_v19 = vld [vmem:[#allocation3 + $0x4] sm:$0xff] }
 0x258   : > { %10586 = vmatprep.mubr.msk.bf16.mxu0 %vm1389_vm3, %v13268_v37  ;;  %10978 = vmatprep.mubr.msk.bf16.mxu1 %vm1389_vm3, %v13380_v33  ;;  %v2653_v37 = vld [vmem:[#allocation3 + $0xc] sm:$0xff] }
 0x259   : > { %v2684_v30 = vpack.c.bf16 %v2653_v37, %v2652_v19  ;;  %v6359_v19 = vld [vmem:[#allocation3 + $0xb1] sm:$0xff] }
 0x25a   : > { %v2971_v37 = vld [vmem:[#allocation3 + $0x90] sm:$0xff] }
 0x25b   : > { %v2998_v0 = vpack.c.bf16 %v2972_v7, %v2971_v37  ;;  %v6374_v7 = vld [vmem:[#allocation3 + $0x169] sm:$0xff]  ;;  %v3270_v37 = vld [vmem:[#allocation3 + $0x21] sm:$0xff] }
 0x25f   : > { %10587 = vmatmul.mubr.msk.bf16.gmra.mrb[56].mxu0 %vm1389_vm3, %v13278_v28  ;;  %10979 = vmatmul.mubr.msk.bf16.gmra.mrb[4].mxu1 %vm1389_vm3, %v13390_v52  ;;  %v2654_v28 = vld [vmem:[#allocation3 + $0x1c] sm:$0xff] }
 0x260   : > { %10590 = vmatprep.mubr.msk.bf16.mxu0 %vm1389_vm3, %v13280_v42  ;;  %10982 = vmatprep.mubr.msk.bf16.mxu1 %vm1389_vm3, %v13392_v13  ;;  %v2655_v42 = vld [vmem:[#allocation3 + $0x24] sm:$0xff] }
 0x261   : > { %v2685_v62 = vpack.c.bf16 %v2655_v42, %v2654_v28  ;;  %v2976_v28 = vld [vmem:[#allocation3 + $0xc8] sm:$0xff] }
 0x262   : > { %v6361_v42 = vld [vmem:[#allocation3 + $0xc9] sm:$0xff] }
 0x267   : > { %10591 = vmatmul.mubr.msk.bf16.gmra.mrb[60].mxu0 %vm1389_vm3, %v13290_v21  ;;  %10983 = vmatmul.mubr.msk.bf16.gmra.mrb[8].mxu1 %vm1389_vm3, %v13402_v60  ;;  %v3074_v21 = vsel %vm1648_vm5, %v12248_v35, 0 }
 0x268   : > { %10986 = vmatprep.mubr.msk.bf16.mxu1 %vm1389_vm3, %v5779_v41  ;;  %10598 = vmatprep.mubr.msk.bf16.mxu0 %vm1389_vm3, %v2684_v30  ;;  %v6358_v30 = vld [vmem:[#allocation3 + $0xa9] sm:$0xff] }
 0x269   : > { %v13539_v41 = vpack.c.bf16 %v6359_v19, %v6358_v30  ;;  %v3269_v19 = vld [vmem:[#allocation3 + $0x19] sm:$0xff] }
 0x26a   : > { %v3301_v30 = vpack.c.bf16 %v3270_v37, %v3269_v19  ;;  %v6685_v37 = vld [vmem:[#allocation3 + $0x18a] sm:$0xff] }
 0x26f   : > { %10599 = vmatmul.mubr.msk.bf16.vlgmr.msra.gmra.mrb[32].mxu0 %vm1389_vm3, %v2685_v62  ;;  %10987 = vmatmul.mubr.msk.bf16.gmra.mrb[12].mxu1 %vm1389_vm3, %v5780_v53  ;;  %v2975_v62 = vld [vmem:[#allocation3 + $0xc0] sm:$0xff] }
 0x270   : > { %10602 = vmatprep.mubr.msk.bf16.mxu0 %vm1389_vm3, %v13298_v47  ;;  %10994 = vmatprep.mubr.msk.bf16.mxu1 %vm1389_vm3, %v13067_v27  ;;  %v6463_v27 = vsel %vm1648_vm5, %v12246_v24, 0  ;;  %v13445_v47 = vld [vmem:[%s14426_s3 + $0x110] sm:$0xff]  }
 0x271   : > { %10631 = vmatpush3.bf16.msra.mxu0 %v13315_v56  ;;  %v6360_v53 = vld [vmem:[#allocation3 + $0xc1] sm:$0xff] }
 0x272   : > { %12161 = vmatprep.subr.msk.bf16.mxu0 %vm1648_vm5, %v12248_v35  ;;  %v3000_v35 = vpack.c.bf16 %v2976_v28, %v2975_v62  ;;  %v6378_v28 = vld [vmem:[#allocation3 + $0x199] sm:$0xff] }
 0x273   : > { %v3272_v62 = vld [vmem:[#allocation3 + $0x39] sm:$0xff] }
 0x275   : > { %10633 = vmatpush3.bf16.msra.mxu0 %v3074_v21  ;;  %v13547_v21 = vpack.c.bf16 %v6361_v42, %v6360_v53 }
 0x276   : > { %10666 = vmatprep.subr.bf16.mxu0 %v13425_v18 }
 0x277   : > { %10603 = vmatmul.mubr.msk.bf16.gmra.mrb[36].mxu0 %vm1389_vm3, %v13317_v2  ;;  %10995 = vmatmul.mubr.msk.bf16.vlgmr.msra.gmra.mrb[16].mxu1 %vm1389_vm3, %v13074_v17  ;;  %v2961_v17 = vld [vmem:[#allocation3 + $0x18] sm:$0xff]  ;;  %v2966_v2 = vld [vmem:[#allocation3 + $0x50] sm:$0xff] }
 0x278   : > { %11027 = vmatpush3.bf16.msra.mxu1 %v13339_v12  ;;  %10606 = vmatprep.mubr.msk.bf16.mxu0 %vm1389_vm3, %v13327_v4  ;;  %v6351_v4 = vld [vmem:[#allocation3 + $0x51] sm:$0xff] }
 0x279   : > { %10998 = vmatprep.mubr.msk.bf16.mxu1 %vm1389_vm3, %v13095_v51  ;;  %12173 = vmatprep.subr.msk.bf16.mxu1 %vm1648_vm5, %v12246_v24  ;;  %v2962_v51 = vld [vmem:[#allocation3 + $0x20] sm:$0xff]  ;;  %v2963_v12 = vld [vmem:[#allocation3 + $0x30] sm:$0xff]  ;;  %v13496_v38 = vpack.c.bf16 %v6351_v4, %v6350_v43 }
 0x27a   : > { %v6362_v24 = vld [vmem:[#allocation3 + $0xd9] sm:$0xff]  ;;  %v6369_v4 = vld [vmem:[#allocation3 + $0x129] sm:$0xff]  ;;  %v6368_v43 = vld [vmem:[#allocation3 + $0x121] sm:$0xff] }
 0x27c   : > { %11029 = vmatpush3.bf16.msra.mxu1 %v6463_v27 }
 0x27d   : > { %11062 = vmatprep.subr.bf16.mxu1 %v13445_v47 }
 0x27f   : > { %10607 = vmatmul.mubr.msk.bf16.gmra.mrb[40].mxu0 %vm1389_vm3, %v13341_v29  ;;  %10999 = vmatmul.mubr.msk.bf16.gmra.mrb[20].mxu1 %vm1389_vm3, %v13100_v31  ;;  %v6069_v31 = vld [vmem:[#allocation3 + $0x188] sm:$0xff] }
 0x280   : > { %10610 = vmatprep.mubr.msk.bf16.mxu0 %vm1389_vm3, %v13344_v11  ;;  %11002 = vmatprep.mubr.msk.bf16.mxu1 %vm1389_vm3, %v13112_v26  ;;  %v6071_v26 = vld [vmem:[#allocation3 + $0x1a0] sm:$0xff]  ;;  %v2965_v11 = vld [vmem:[#allocation3 + $0x48] sm:$0xff] }
 0x281   : > { %v2995_v48 = vpack.c.bf16 %v2966_v2, %v2965_v11  ;;  %v2984_v2 = vld [vmem:[#allocation3 + $0x128] sm:$0xff]  ;;  %v2983_v11 = vld [vmem:[#allocation3 + $0x120] sm:$0xff] }
 0x287   : > { %10611 = vmatmul.mubr.msk.bf16.gmra.mrb[44].mxu0 %vm1389_vm3, %v13354_v6  ;;  %11003 = vmatmul.mubr.msk.bf16.gmra.mrb[24].mxu1 %vm1389_vm3, %v13116_v16  ;;  %v6068_v16 = vld [vmem:[#allocation3 + $0x180] sm:$0xff]  ;;  %v2968_v6 = vld [vmem:[#allocation3 + $0x68] sm:$0xff] }
 0x288   : > { %10614 = vmatprep.mubr.msk.bf16.mxu0 %vm1389_vm3, %v13356_v45  ;;  %11006 = vmatprep.mubr.msk.bf16.mxu1 %vm1389_vm3, %v13128_v20  ;;  %v2993_v20 = vpack.c.bf16 %v2962_v51, %v2961_v17  ;;  %v6353_v45 = vld [vmem:[#allocation3 + $0x69] sm:$0xff]  ;;  %v2996_v15 = vpack.c.bf16 %v2968_v6, %v2967_v44  ;;  %v2980_v17 = vld [vmem:[#allocation3 + $0xf8] sm:$0xff] }
 0x289   : > { %v6365_v51 = vld [vmem:[#allocation3 + $0xf9] sm:$0xff] }
 0x28a   : > { %v2985_v6 = vld [vmem:[#allocation3 + $0x138] sm:$0xff] }
 0x28b   : > { %v2988_v44 = vld [vmem:[#allocation3 + $0x158] sm:$0xff] }
 0x28f   : > { %10615 = vmatmul.mubr.msk.bf16.gmra.mrb[48].mxu0 %vm1389_vm3, %v13366_v59  ;;  %11007 = vmatmul.mubr.msk.bf16.gmra.mrb[28].mxu1 %vm1389_vm3, %v13132_v39  ;;  %v13488_v39 = vpack.c.bf16 %v6069_v31, %v6068_v16  ;;  %v6352_v59 = vld [vmem:[#allocation3 + $0x61] sm:$0xff]  ;;  %v2982_v31 = vld [vmem:[#allocation3 + $0x110] sm:$0xff] }
 0x290   : > { %10618 = vmatprep.mubr.msk.bf16.mxu0 %vm1389_vm3, %v13368_v3  ;;  %11010 = vmatprep.mubr.msk.bf16.mxu1 %vm1389_vm3, %v13144_v5  ;;  %v6070_v5 = vld [vmem:[#allocation3 + $0x198] sm:$0xff]  ;;  %v6355_v3 = vld [vmem:[#allocation3 + $0x81] sm:$0xff]  ;;  %v13514_v49 = vpack.c.bf16 %v6353_v45, %v6352_v59  ;;  %v2979_v16 = vld [vmem:[#allocation3 + $0xf0] sm:$0xff] }
 0x291   : > { %v6370_v45 = vld [vmem:[#allocation3 + $0x139] sm:$0xff] }
 0x292   : > { %v6373_v59 = vld [vmem:[#allocation3 + $0x159] sm:$0xff] }
 0x297   : > { %10619 = vmatmul.mubr.msk.bf16.gmra.mrb[52].mxu0 %vm1389_vm3, %v13378_v54  ;;  %11011 = vmatmul.mubr.msk.bf16.gmra.mrb[0].mxu1 %vm1389_vm3, %v13148_v9  ;;  %v6088_v9 = vpack.c.bf16 %v6071_v26, %v6070_v5  ;;  %v2997_v54 = vpack.c.bf16 %v2970_v1, %v2969_v40  ;;  %v6367_v26 = vld [vmem:[#allocation3 + $0x111] sm:$0xff]  ;;  %v3002_v5 = vpack.c.bf16 %v2980_v17, %v2979_v16  ;;  %v6660_v16 = vld [vmem:[#allocation3 + $0x62] sm:$0xff] }
 0x298   : > { %10622 = vmatprep.mubr.msk.bf16.mxu0 %vm1389_vm3, %v13380_v33  ;;  %11014 = vmatprep.mubr.msk.bf16.mxu1 %vm1389_vm3, %v13160_v57  ;;  %v6072_v57 = vld [vmem:[#allocation3 + $0x1b0] sm:$0xff]  ;;  %v6354_v33 = vld [vmem:[#allocation3 + $0x79] sm:$0xff] }
 0x299   : > { %v13523_v22 = vpack.c.bf16 %v6355_v3, %v6354_v33  ;;  %v2990_v3 = vld [vmem:[#allocation3 + $0x170] sm:$0xff] }
 0x29a   : > { %v2987_v40 = vld [vmem:[#allocation3 + $0x150] sm:$0xff] }
 0x29f   : > { %10623 = vmatmul.mubr.msk.bf16.gmra.mrb[56].mxu0 %vm1389_vm3, %v13390_v52  ;;  %11015 = vmatmul.mubr.msk.bf16.gmra.mrb[4].mxu1 %vm1389_vm3, %v13164_v34  ;;  %v6073_v34 = vld [vmem:[#allocation3 + $0x1b8] sm:$0xff] }
 0x2a0   : > { %10626 = vmatprep.mubr.msk.bf16.mxu0 %vm1389_vm3, %v13392_v13  ;;  %11018 = vmatprep.mubr.msk.bf16.mxu1 %vm1389_vm3, %v13176_v63  ;;  %v2964_v63 = vld [vmem:[#allocation3 + $0x38] sm:$0xff]  ;;  %v6089_v56 = vpack.c.bf16 %v6073_v34, %v6072_v57  ;;  %v2974_v13 = vld [vmem:[#allocation3 + $0xb0] sm:$0xff]  ;;  %v2981_v57 = vld [vmem:[#allocation3 + $0x108] sm:$0xff] }
 0x2a1   : > { %v2994_v29 = vpack.c.bf16 %v2964_v63, %v2963_v12  ;;  %v6357_v52 = vld [vmem:[#allocation3 + $0x99] sm:$0xff]  ;;  %v6366_v34 = vld [vmem:[#allocation3 + $0x109] sm:$0xff]  ;;  %v3003_v63 = vpack.c.bf16 %v2982_v31, %v2981_v57 }
 0x2a2   : > { %v13536_v14 = vpack.c.bf16 %v6357_v52, %v6356_v25  ;;  %v2986_v12 = vld [vmem:[#allocation3 + $0x140] sm:$0xff]  ;;  %v6377_v25 = vld [vmem:[#allocation3 + $0x189] sm:$0xff] }
 0x2a7   : > { %10627 = vmatmul.mubr.msk.bf16.gmra.mrb[60].mxu0 %vm1389_vm3, %v13402_v60  ;;  %11019 = vmatmul.mubr.msk.bf16.gmra.mrb[8].mxu1 %vm1389_vm3, %v13488_v39  ;;  %v2999_v60 = vpack.c.bf16 %v2974_v13, %v2973_v36  ;;  %v6376_v36 = vld [vmem:[#allocation3 + $0x181] sm:$0xff] }
 0x2a8   : > { %11022 = vmatprep.mubr.msk.bf16.mxu1 %vm1389_vm3, %v6088_v9  ;;  %10634 = vmatprep.mubr.msk.bf16.mxu0 %vm1389_vm3, %v2993_v20  ;;  %v6364_v20 = vld [vmem:[#allocation3 + $0xf1] sm:$0xff] }
 0x2a9   : > { %v13557_v9 = vpack.c.bf16 %v6365_v51, %v6364_v20  ;;  %v6661_v51 = vld [vmem:[#allocation3 + $0x6a] sm:$0xff]  ;;  %v6663_v20 = vld [vmem:[#allocation3 + $0x82] sm:$0xff] }
 0x2af   : > { %10635 = vmatmul.mubr.msk.bf16.vlgmr.msra.gmra.mrb[32].mxu0 %vm1389_vm3, %v2994_v29  ;;  %11023 = vmatmul.mubr.msk.bf16.gmra.mrb[12].mxu1 %vm1389_vm3, %v6089_v56  ;;  %v13559_v56 = vpack.c.bf16 %v6367_v26, %v6366_v34  ;;  %v6371_v29 = vld [vmem:[#allocation3 + $0x141] sm:$0xff]  ;;  %v13612_v26 = vld [vmem:[%s14426_s3 + $0x80] sm:$0xff]  }
 0x2b0   : > { %10638 = vmatprep.mubr.msk.bf16.mxu0 %vm1389_vm3, %v2995_v48  ;;  %11030 = vmatprep.mubr.msk.bf16.mxu1 %vm1389_vm3, %v13496_v38  ;;  %v3004_v48 = vpack.c.bf16 %v2984_v2, %v2983_v11  ;;  %v13569_v1 = vpack.c.bf16 %v6371_v29, %v6370_v45  ;;  %v6667_v2 = vld [vmem:[#allocation3 + $0xb2] sm:$0xff]  ;;  %v6669_v29 = vld [vmem:[#allocation3 + $0xca] sm:$0xff]  ;;  %v6671_v11 = vld [vmem:[#allocation3 + $0xe2] sm:$0xff] }
 0x2b1   : > { %10667 = vmatpush3.bf16.msra.mxu0 %v13425_v18  ;;  %v2977_v18 = vld [vmem:[#allocation3 + $0xd8] sm:$0xff] }
 0x2b2   : > { %12162 = vmatprep.subr.msk.bf16.mxu0 %vm1648_vm5, %v12252_v32  ;;  %v3001_v27 = vpack.c.bf16 %v2978_v10, %v2977_v18  ;;  %v13567_v32 = vpack.c.bf16 %v6369_v4, %v6368_v43  ;;  %v6380_v10 = vld [vmem:[#allocation3 + $0x1b1] sm:$0xff]  ;;  %v6668_v43 = vld [vmem:[#allocation3 + $0xc2] sm:$0xff] }
 0x2b3   : > { %v3271_v18 = vld [vmem:[#allocation3 + $0x31] sm:$0xff] }
 0x2b4   : > { %v6664_v4 = vld [vmem:[#allocation3 + $0x92] sm:$0xff] }
 0x2b5   : > { %10669 = vmatpush3.bf16.msra.mxu0 %v3382_v55  ;;  %v3005_v55 = vpack.c.bf16 %v2986_v12, %v2985_v6  ;;  %v6666_v12 = vld [vmem:[#allocation3 + $0xaa] sm:$0xff]  ;;  %v6670_v6 = vld [vmem:[#allocation3 + $0xda] sm:$0xff] }
 0x2b6   : > { %10702 = vmatprep.subr.bf16.mxu0 %v13512_v50  ;;  %v13653_v45 = vpack.c.bf16 %v6671_v11, %v6670_v6  ;;  %v6978_v11 = vld [vmem:[#allocation3 + $0xdb] sm:$0xff] }
 0x2b7   : > { %10639 = vmatmul.mubr.msk.bf16.gmra.mrb[36].mxu0 %vm1389_vm3, %v2996_v15  ;;  %11031 = vmatmul.mubr.msk.bf16.vlgmr.msra.gmra.mrb[16].mxu1 %vm1389_vm3, %v13514_v49  ;;  %v6375_v15 = vld [vmem:[#allocation3 + $0x171] sm:$0xff] }
 0x2b8   : > { %11063 = vmatpush3.bf16.msra.mxu1 %v13445_v47  ;;  %10642 = vmatprep.mubr.msk.bf16.mxu0 %vm1389_vm3, %v2997_v54  ;;  %v13549_v47 = vpack.c.bf16 %v6363_v61, %v6362_v24  ;;  %v3006_v54 = vpack.c.bf16 %v2988_v44, %v2987_v40  ;;  %v13579_v13 = vpack.c.bf16 %v6375_v15, %v6374_v7  ;;  %v6381_v61 = vld [vmem:[#allocation3 + $0x1b9] sm:$0xff]  ;;  %v6676_v15 = vld [vmem:[#allocation3 + $0x122] sm:$0xff] }
 0x2b9   : > { %11034 = vmatprep.mubr.msk.bf16.mxu1 %vm1389_vm3, %v13523_v22  ;;  %12174 = vmatprep.subr.msk.bf16.mxu1 %vm1648_vm5, %v12250_v46  ;;  %v6372_v46 = vld [vmem:[#allocation3 + $0x151] sm:$0xff]  ;;  %v6397_v53 = vpack.c.bf16 %v6381_v61, %v6380_v10  ;;  %v3302_v24 = vpack.c.bf16 %v3272_v62, %v3271_v18  ;;  %v3580_v10 = vld [vmem:[#allocation3 + $0x3a] sm:$0xff] }
 0x2ba   : > { %v13577_v33 = vpack.c.bf16 %v6373_v59, %v6372_v46  ;;  %v6674_v59 = vld [vmem:[#allocation3 + $0x10a] sm:$0xff]  ;;  %v6678_v46 = vld [vmem:[#allocation3 + $0x13a] sm:$0xff] }
 0x2bb   : > { %v6966_v62 = vld [vmem:[#allocation3 + $0x4b] sm:$0xff] }
 0x2bc   : > { %11065 = vmatpush3.bf16.msra.mxu1 %v6771_v23  ;;  %v2989_v23 = vld [vmem:[#allocation3 + $0x168] sm:$0xff] }
 0x2bd   : > { %11098 = vmatprep.subr.bf16.mxu1 %v13534_v8  ;;  %v3007_v52 = vpack.c.bf16 %v2990_v3, %v2989_v23  ;;  %v6680_v23 = vld [vmem:[#allocation3 + $0x152] sm:$0xff] }
 0x2bf   : > { %10643 = vmatmul.mubr.msk.bf16.gmra.mrb[40].mxu0 %vm1389_vm3, %v2998_v0  ;;  %11035 = vmatmul.mubr.msk.bf16.gmra.mrb[20].mxu1 %vm1389_vm3, %v13536_v14  ;;  %v6379_v0 = vld [vmem:[#allocation3 + $0x1a1] sm:$0xff] }
 0x2c0   : > { %10646 = vmatprep.mubr.msk.bf16.mxu0 %vm1389_vm3, %v2999_v60  ;;  %11038 = vmatprep.mubr.msk.bf16.mxu1 %vm1389_vm3, %v13539_v41  ;;  %v13587_v60 = vpack.c.bf16 %v6377_v25, %v6376_v36  ;;  %v6396_v42 = vpack.c.bf16 %v6379_v0, %v6378_v28  ;;  %v6687_v25 = vld [vmem:[#allocation3 + $0x1a2] sm:$0xff]  ;;  %v6686_v28 = vld [vmem:[#allocation3 + $0x19a] sm:$0xff] }
 0x2c1   : > { %v6684_v0 = vld [vmem:[#allocation3 + $0x182] sm:$0xff] }
 0x2c7   : > { %10647 = vmatmul.mubr.msk.bf16.gmra.mrb[44].mxu0 %vm1389_vm3, %v3000_v35  ;;  %11039 = vmatmul.mubr.msk.bf16.gmra.mrb[24].mxu1 %vm1389_vm3, %v13547_v21  ;;  %v6659_v35 = vld [vmem:[#allocation3 + $0x52] sm:$0xff] }
 0x2c8   : > { %10650 = vmatprep.mubr.msk.bf16.mxu0 %vm1389_vm3, %v3001_v27  ;;  %11042 = vmatprep.mubr.msk.bf16.mxu1 %vm1389_vm3, %v13549_v47  ;;  %v6658_v27 = vld [vmem:[#allocation3 + $0x4a] sm:$0xff] }
 0x2c9   : > { %v13595_v17 = vpack.c.bf16 %v6659_v35, %v6658_v27  ;;  %v3579_v35 = vld [vmem:[#allocation3 + $0x32] sm:$0xff]  ;;  %v6968_v27 = vld [vmem:[#allocation3 + $0x63] sm:$0xff] }
 0x2ca   : > { %v3610_v18 = vpack.c.bf16 %v3580_v10, %v3579_v35 }
 0x2cf   : > { %10651 = vmatmul.mubr.msk.bf16.gmra.mrb[48].mxu0 %vm1389_vm3, %v3002_v5  ;;  %11043 = vmatmul.mubr.msk.bf16.gmra.mrb[28].mxu1 %vm1389_vm3, %v13557_v9  ;;  %v13614_v5 = vpack.c.bf16 %v6661_v51, %v6660_v16  ;;  %v6970_v16 = vld [vmem:[#allocation3 + $0x7b] sm:$0xff] }
 0x2d0   : > { %10654 = vmatprep.mubr.msk.bf16.mxu0 %vm1389_vm3, %v3003_v63  ;;  %11046 = vmatprep.mubr.msk.bf16.mxu1 %vm1389_vm3, %v13559_v56  ;;  %v6665_v63 = vld [vmem:[#allocation3 + $0x9a] sm:$0xff] }
 0x2d7   : > { %10655 = vmatmul.mubr.msk.bf16.gmra.mrb[52].mxu0 %vm1389_vm3, %v3004_v48  ;;  %11047 = vmatmul.mubr.msk.bf16.gmra.mrb[0].mxu1 %vm1389_vm3, %v13567_v32  ;;  %v13651_v48 = vpack.c.bf16 %v6669_v29, %v6668_v43  ;;  %v6977_v29 = vld [vmem:[#allocation3 + $0xcb] sm:$0xff]  ;;  %v6979_v43 = vld [vmem:[#allocation3 + $0xe3] sm:$0xff] }
 0x2d8   : > { %10658 = vmatprep.mubr.msk.bf16.mxu0 %vm1389_vm3, %v3005_v55  ;;  %11050 = vmatprep.mubr.msk.bf16.mxu1 %vm1389_vm3, %v13569_v1  ;;  %v6672_v55 = vld [vmem:[#allocation3 + $0xf2] sm:$0xff] }
 0x2df   : > { %10659 = vmatmul.mubr.msk.bf16.gmra.mrb[56].mxu0 %vm1389_vm3, %v3006_v54  ;;  %11051 = vmatmul.mubr.msk.bf16.gmra.mrb[4].mxu1 %vm1389_vm3, %v13577_v33 }
 0x2e0   : > { %10662 = vmatprep.mubr.msk.bf16.mxu0 %vm1389_vm3, %v3007_v52  ;;  %11054 = vmatprep.mubr.msk.bf16.mxu1 %vm1389_vm3, %v13579_v13  ;;  %v6682_v52 = vld [vmem:[#allocation3 + $0x16a] sm:$0xff] }
 0x2e7   : > { %10663 = vmatmul.mubr.msk.bf16.gmra.mrb[60].mxu0 %vm1389_vm3, %v13488_v39  ;;  %11055 = vmatmul.mubr.msk.bf16.gmra.mrb[8].mxu1 %vm1389_vm3, %v13587_v60  ;;  %v12256_v39 = vld [vmem:[%s14426_s3 + $0x78] sm:$0x1f]  }
 0x2e8   : > { %11058 = vmatprep.mubr.msk.bf16.mxu1 %vm1389_vm3, %v6396_v42  ;;  %10670 = vmatprep.mubr.msk.bf16.mxu0 %vm1389_vm3, %v3301_v30  ;;  %v3690_v31 = vsel %vm1648_vm5, %v12256_v39, 0  ;;  %v13699_v30 = vpack.c.bf16 %v6685_v37, %v6684_v0  ;;  %v6704_v42 = vpack.c.bf16 %v6687_v25, %v6686_v28  ;;  %v6993_v37 = vld [vmem:[#allocation3 + $0x18b] sm:$0xff]  ;;  %v6994_v25 = vld [vmem:[#allocation3 + $0x19b] sm:$0xff]  ;;  %v6995_v0 = vld [vmem:[#allocation3 + $0x1a3] sm:$0xff] }
 0x2ef   : > { %10671 = vmatmul.mubr.msk.bf16.vlgmr.msra.gmra.mrb[32].mxu0 %vm1389_vm3, %v3302_v24  ;;  %11059 = vmatmul.mubr.msk.bf16.gmra.mrb[12].mxu1 %vm1389_vm3, %v6397_v53  ;;  %v6967_v53 = vld [vmem:[#allocation3 + $0x53] sm:$0xff] }
 0x2f0   : > { %10674 = vmatprep.mubr.msk.bf16.mxu0 %vm1389_vm3, %v13496_v38  ;;  %11066 = vmatprep.mubr.msk.bf16.mxu1 %vm1389_vm3, %v13595_v17  ;;  %v12254_v38 = vld [vmem:[%s14426_s3 + $0x128] sm:$0x1f]   ;;  %v13707_v24 = vpack.c.bf16 %v6967_v53, %v6966_v62 }
 0x2f1   : > { %10703 = vmatpush3.bf16.msra.mxu0 %v13512_v50  ;;  %v6662_v50 = vld [vmem:[#allocation3 + $0x7a] sm:$0xff]  ;;  %v7079_v34 = vsel %vm1648_vm5, %v12254_v38, 0 }
 0x2f2   : > { %12163 = vmatprep.subr.msk.bf16.mxu0 %vm1648_vm5, %v12256_v39  ;;  %v13624_v57 = vpack.c.bf16 %v6663_v20, %v6662_v50  ;;  %v6969_v39 = vld [vmem:[#allocation3 + $0x6b] sm:$0xff]  ;;  %v6971_v20 = vld [vmem:[#allocation3 + $0x83] sm:$0xff]  ;;  %v7275_v62 = vld [vmem:[#allocation3 + $0x54] sm:$0xff] }
 0x2f5   : > { %10705 = vmatpush3.bf16.msra.mxu0 %v3690_v31  ;;  %v13724_v31 = vld [vmem:[%s14426_s3 + $0x90] sm:$0xff]  }
 0x2f6   : > { %10738 = vmatprep.subr.bf16.mxu0 %v13612_v26 }
 0x2f7   : > { %10675 = vmatmul.mubr.msk.bf16.gmra.mrb[36].mxu0 %vm1389_vm3, %v13514_v49  ;;  %11067 = vmatmul.mubr.msk.bf16.vlgmr.msra.gmra.mrb[16].mxu1 %vm1389_vm3, %v13614_v5  ;;  %v13636_v49 = vld [vmem:[%s14426_s3 + $0x130] sm:$0xff]  }
 0x2f8   : > { %11099 = vmatpush3.bf16.msra.mxu1 %v13534_v8  ;;  %10678 = vmatprep.mubr.msk.bf16.mxu0 %vm1389_vm3, %v13523_v22  ;;  %v13638_v8 = vpack.c.bf16 %v6665_v63, %v6664_v4  ;;  %v13641_v22 = vpack.c.bf16 %v6667_v2, %v6666_v12  ;;  %v6973_v63 = vld [vmem:[#allocation3 + $0x9b] sm:$0xff]  ;;  %v6974_v2 = vld [vmem:[#allocation3 + $0xab] sm:$0xff]  ;;  %v6975_v4 = vld [vmem:[#allocation3 + $0xb3] sm:$0xff] }
 0x2f9   : > { %11070 = vmatprep.mubr.msk.bf16.mxu1 %vm1389_vm3, %v13624_v57  ;;  %12175 = vmatprep.subr.msk.bf16.mxu1 %vm1648_vm5, %v12254_v38  ;;  %v13726_v38 = vpack.c.bf16 %v6969_v39, %v6968_v27  ;;  %v6976_v12 = vld [vmem:[#allocation3 + $0xc3] sm:$0xff]  ;;  %v13836_v39 = vld [vmem:[%s14426_s3 + $0xa0] sm:$0xff]  }
 0x2fa   : > { %v13763_v6 = vpack.c.bf16 %v6977_v29, %v6976_v12  ;;  %v7285_v12 = vld [vmem:[#allocation3 + $0xcc] sm:$0xff]  ;;  %v7286_v29 = vld [vmem:[#allocation3 + $0xdc] sm:$0xff] }
 0x2fc   : > { %11101 = vmatpush3.bf16.msra.mxu1 %v7079_v34  ;;  %v6972_v34 = vld [vmem:[#allocation3 + $0x93] sm:$0xff] }
 0x2fd   : > { %11134 = vmatprep.subr.bf16.mxu1 %v13636_v49 }
 0x2ff   : > { %10679 = vmatmul.mubr.msk.bf16.gmra.mrb[40].mxu0 %vm1389_vm3, %v13536_v14  ;;  %11071 = vmatmul.mubr.msk.bf16.gmra.mrb[20].mxu1 %vm1389_vm3, %v13638_v8  ;;  %v6673_v14 = vld [vmem:[#allocation3 + $0xfa] sm:$0xff] }
 0x300   : > { %10682 = vmatprep.mubr.msk.bf16.mxu0 %vm1389_vm3, %v13539_v41  ;;  %11074 = vmatprep.mubr.msk.bf16.mxu1 %vm1389_vm3, %v13641_v22  ;;  %v6675_v41 = vld [vmem:[#allocation3 + $0x112] sm:$0xff]  ;;  %v13663_v44 = vpack.c.bf16 %v6673_v14, %v6672_v55  ;;  %v13765_v14 = vpack.c.bf16 %v6979_v43, %v6978_v11  ;;  %v7287_v11 = vld [vmem:[#allocation3 + $0xe4] sm:$0xff] }
 0x301   : > { %v13665_v3 = vpack.c.bf16 %v6675_v41, %v6674_v59  ;;  %v6982_v41 = vld [vmem:[#allocation3 + $0x10b] sm:$0xff]  ;;  %v6983_v55 = vld [vmem:[#allocation3 + $0x113] sm:$0xff] }
 0x307   : > { %10683 = vmatmul.mubr.msk.bf16.gmra.mrb[44].mxu0 %vm1389_vm3, %v13547_v21  ;;  %11075 = vmatmul.mubr.msk.bf16.gmra.mrb[24].mxu1 %vm1389_vm3, %v13651_v48  ;;  %v6677_v21 = vld [vmem:[#allocation3 + $0x12a] sm:$0xff] }
 0x308   : > { %10686 = vmatprep.mubr.msk.bf16.mxu0 %vm1389_vm3, %v13549_v47  ;;  %11078 = vmatprep.mubr.msk.bf16.mxu1 %vm1389_vm3, %v13653_v45  ;;  %v6679_v47 = vld [vmem:[#allocation3 + $0x142] sm:$0xff]  ;;  %v13675_v40 = vpack.c.bf16 %v6677_v21, %v6676_v15  ;;  %v13777_v21 = vpack.c.bf16 %v6983_v55, %v6982_v41  ;;  %v7291_v41 = vld [vmem:[#allocation3 + $0x114] sm:$0xff] }
 0x309   : > { %v13677_v54 = vpack.c.bf16 %v6679_v47, %v6678_v46  ;;  %v6986_v47 = vld [vmem:[#allocation3 + $0x13b] sm:$0xff]  ;;  %v6987_v15 = vld [vmem:[#allocation3 + $0x143] sm:$0xff] }
 0x30f   : > { %10687 = vmatmul.mubr.msk.bf16.gmra.mrb[48].mxu0 %vm1389_vm3, %v13557_v9  ;;  %11079 = vmatmul.mubr.msk.bf16.gmra.mrb[28].mxu1 %vm1389_vm3, %v13663_v44  ;;  %v6681_v9 = vld [vmem:[#allocation3 + $0x15a] sm:$0xff] }
 0x310   : > { %10690 = vmatprep.mubr.msk.bf16.mxu0 %vm1389_vm3, %v13559_v56  ;;  %11082 = vmatprep.mubr.msk.bf16.mxu1 %vm1389_vm3, %v13665_v3  ;;  %v6683_v56 = vld [vmem:[#allocation3 + $0x172] sm:$0xff]  ;;  %v13687_v7 = vpack.c.bf16 %v6681_v9, %v6680_v23  ;;  %v13789_v9 = vpack.c.bf16 %v6987_v15, %v6986_v47  ;;  %v7295_v47 = vld [vmem:[#allocation3 + $0x144] sm:$0xff] }
 0x311   : > { %v13689_v19 = vpack.c.bf16 %v6683_v56, %v6682_v52  ;;  %v6990_v56 = vld [vmem:[#allocation3 + $0x16b] sm:$0xff]  ;;  %v6991_v23 = vld [vmem:[#allocation3 + $0x173] sm:$0xff] }
 0x317   : > { %10691 = vmatmul.mubr.msk.bf16.gmra.mrb[52].mxu0 %vm1389_vm3, %v13567_v32  ;;  %11083 = vmatmul.mubr.msk.bf16.gmra.mrb[0].mxu1 %vm1389_vm3, %v13675_v40  ;;  %v3577_v32 = vld [vmem:[#allocation3 + $0x1a] sm:$0xff] }
 0x318   : > { %10694 = vmatprep.mubr.msk.bf16.mxu0 %vm1389_vm3, %v13569_v1  ;;  %11086 = vmatprep.mubr.msk.bf16.mxu1 %vm1389_vm3, %v13677_v54  ;;  %v3578_v1 = vld [vmem:[#allocation3 + $0x22] sm:$0xff] }
 0x319   : > { %v3609_v36 = vpack.c.bf16 %v3578_v1, %v3577_v32  ;;  %v13801_v32 = vpack.c.bf16 %v6991_v23, %v6990_v56  ;;  %v6992_v1 = vld [vmem:[#allocation3 + $0x183] sm:$0xff]  ;;  %v7299_v56 = vld [vmem:[#allocation3 + $0x174] sm:$0xff] }
 0x31a   : > { %v13811_v28 = vpack.c.bf16 %v6993_v37, %v6992_v1  ;;  %v7301_v1 = vld [vmem:[#allocation3 + $0x18c] sm:$0xff]  ;;  %v7302_v37 = vld [vmem:[#allocation3 + $0x19c] sm:$0xff] }
 0x31f   : > { %10695 = vmatmul.mubr.msk.bf16.gmra.mrb[56].mxu0 %vm1389_vm3, %v13577_v33  ;;  %11087 = vmatmul.mubr.msk.bf16.gmra.mrb[4].mxu1 %vm1389_vm3, %v13687_v7  ;;  %v6688_v33 = vld [vmem:[#allocation3 + $0x1b2] sm:$0xff] }
 0x320   : > { %10698 = vmatprep.mubr.msk.bf16.mxu0 %vm1389_vm3, %v13579_v13  ;;  %11090 = vmatprep.mubr.msk.bf16.mxu1 %vm1389_vm3, %v13689_v19  ;;  %v6689_v13 = vld [vmem:[#allocation3 + $0x1ba] sm:$0xff] }
 0x321   : > { %v6705_v61 = vpack.c.bf16 %v6689_v13, %v6688_v33  ;;  %v3887_v33 = vld [vmem:[#allocation3 + $0x33] sm:$0xff]  ;;  %v3888_v13 = vld [vmem:[#allocation3 + $0x3b] sm:$0xff] }
 0x322   : > { %v3918_v53 = vpack.c.bf16 %v3888_v13, %v3887_v33  ;;  %v7584_v13 = vld [vmem:[#allocation3 + $0x68] sm:$0xff] }
 0x327   : > { %10699 = vmatmul.mubr.msk.bf16.gmra.mrb[60].mxu0 %vm1389_vm3, %v13587_v60  ;;  %11091 = vmatmul.mubr.msk.bf16.gmra.mrb[8].mxu1 %vm1389_vm3, %v13699_v30  ;;  %v12260_v60 = vld [vmem:[%s14426_s3 + $0x88] sm:$0x1f]  }
 0x328   : > { %11094 = vmatprep.mubr.msk.bf16.mxu1 %vm1389_vm3, %v6704_v42  ;;  %10706 = vmatprep.mubr.msk.bf16.mxu0 %vm1389_vm3, %v3609_v36  ;;  %v3998_v51 = vsel %vm1648_vm5, %v12260_v60, 0  ;;  %v7012_v42 = vpack.c.bf16 %v6995_v0, %v6994_v25  ;;  %v7303_v25 = vld [vmem:[#allocation3 + $0x1a4] sm:$0xff] }
 0x32f   : > { %10707 = vmatmul.mubr.msk.bf16.vlgmr.msra.gmra.mrb[32].mxu0 %vm1389_vm3, %v3610_v18  ;;  %11095 = vmatmul.mubr.msk.bf16.gmra.mrb[12].mxu1 %vm1389_vm3, %v6705_v61  ;;  %v7274_v61 = vld [vmem:[#allocation3 + $0x4c] sm:$0xff]  ;;  %v7276_v18 = vld [vmem:[#allocation3 + $0x64] sm:$0xff] }
 0x330   : > { %10710 = vmatprep.mubr.msk.bf16.mxu0 %vm1389_vm3, %v13595_v17  ;;  %11102 = vmatprep.mubr.msk.bf16.mxu1 %vm1389_vm3, %v13707_v24  ;;  %v12258_v17 = vld [vmem:[%s14426_s3 + $0x138] sm:$0x1f]   ;;  %v13819_v35 = vpack.c.bf16 %v7275_v62, %v7274_v61  ;;  %v7583_v61 = vld [vmem:[#allocation3 + $0x60] sm:$0xff] }
 0x331   : > { %10739 = vmatpush3.bf16.msra.mxu0 %v13612_v26  ;;  %v13736_v26 = vpack.c.bf16 %v6971_v20, %v6970_v16  ;;  %v7387_v50 = vsel %vm1648_vm5, %v12258_v17, 0  ;;  %v7279_v16 = vld [vmem:[#allocation3 + $0x84] sm:$0xff]  ;;  %v13931_v62 = vpack.c.bf16 %v7584_v13, %v7583_v61 }
 0x332   : > { %12164 = vmatprep.subr.msk.bf16.mxu0 %vm1648_vm5, %v12260_v60  ;;  %v7277_v60 = vld [vmem:[#allocation3 + $0x6c] sm:$0xff]  ;;  %v7891_v13 = vld [vmem:[#allocation3 + $0x61] sm:$0xff] }
 0x333   : > { %v13838_v20 = vpack.c.bf16 %v7277_v60, %v7276_v18  ;;  %v7585_v18 = vld [vmem:[#allocation3 + $0x78] sm:$0xff]  ;;  %v12276_v61 = vld [vmem:[%s14426_s3 + $0xb8] sm:$0x1f]  }
 0x334   : > { %v7588_v60 = vld [vmem:[#allocation3 + $0x98] sm:$0xff] }
 0x335   : > { %10741 = vmatpush3.bf16.msra.mxu0 %v3998_v51  ;;  %v7278_v51 = vld [vmem:[#allocation3 + $0x7c] sm:$0xff] }
 0x336   : > { %10774 = vmatprep.subr.bf16.mxu0 %v13724_v31 }
 0x337   : > { %10711 = vmatmul.mubr.msk.bf16.gmra.mrb[36].mxu0 %vm1389_vm3, %v13614_v5  ;;  %11103 = vmatmul.mubr.msk.bf16.vlgmr.msra.gmra.mrb[16].mxu1 %vm1389_vm3, %v13726_v38  ;;  %v13748_v5 = vld [vmem:[%s14426_s3 + $0x140] sm:$0xff]  }
 0x338   : > { %11135 = vmatpush3.bf16.msra.mxu1 %v13636_v49  ;;  %10714 = vmatprep.mubr.msk.bf16.mxu0 %vm1389_vm3, %v13624_v57  ;;  %v13750_v49 = vpack.c.bf16 %v6973_v63, %v6972_v34  ;;  %v13753_v57 = vpack.c.bf16 %v6975_v4, %v6974_v2  ;;  %v7281_v34 = vld [vmem:[#allocation3 + $0x9c] sm:$0xff]  ;;  %v7282_v63 = vld [vmem:[#allocation3 + $0xac] sm:$0xff]  ;;  %v7283_v2 = vld [vmem:[#allocation3 + $0xb4] sm:$0xff] }
 0x339   : > { %11106 = vmatprep.mubr.msk.bf16.mxu1 %vm1389_vm3, %v13736_v26  ;;  %12176 = vmatprep.subr.msk.bf16.mxu1 %vm1648_vm5, %v12258_v17  ;;  %v7284_v4 = vld [vmem:[#allocation3 + $0xc4] sm:$0xff] }
 0x33a   : > { %v13875_v43 = vpack.c.bf16 %v7285_v12, %v7284_v4  ;;  %v7596_v4 = vld [vmem:[#allocation3 + $0xf8] sm:$0xff] }
 0x33b   : > { %v7593_v12 = vld [vmem:[#allocation3 + $0xd8] sm:$0xff] }
 0x33c   : > { %11137 = vmatpush3.bf16.msra.mxu1 %v7387_v50  ;;  %v7280_v50 = vld [vmem:[#allocation3 + $0x94] sm:$0xff] }
 0x33d   : > { %11170 = vmatprep.subr.bf16.mxu1 %v13748_v5 }
 0x33f   : > { %10715 = vmatmul.mubr.msk.bf16.gmra.mrb[40].mxu0 %vm1389_vm3, %v13638_v8  ;;  %11107 = vmatmul.mubr.msk.bf16.gmra.mrb[20].mxu1 %vm1389_vm3, %v13750_v49  ;;  %v6980_v8 = vld [vmem:[#allocation3 + $0xf3] sm:$0xff] }
 0x340   : > { %10718 = vmatprep.mubr.msk.bf16.mxu0 %vm1389_vm3, %v13641_v22  ;;  %11110 = vmatprep.mubr.msk.bf16.mxu1 %vm1389_vm3, %v13753_v57  ;;  %v6981_v22 = vld [vmem:[#allocation3 + $0xfb] sm:$0xff] }
 0x341   : > { %v13775_v59 = vpack.c.bf16 %v6981_v22, %v6980_v8  ;;  %v13877_v8 = vpack.c.bf16 %v7287_v11, %v7286_v29  ;;  %v7290_v22 = vld [vmem:[#allocation3 + $0x10c] sm:$0xff] }
 0x342   : > { %v7595_v11 = vld [vmem:[#allocation3 + $0xf0] sm:$0xff] }
 0x347   : > { %10719 = vmatmul.mubr.msk.bf16.gmra.mrb[44].mxu0 %vm1389_vm3, %v13651_v48  ;;  %11111 = vmatmul.mubr.msk.bf16.gmra.mrb[24].mxu1 %vm1389_vm3, %v13763_v6  ;;  %v6984_v48 = vld [vmem:[#allocation3 + $0x123] sm:$0xff] }
 0x348   : > { %10722 = vmatprep.mubr.msk.bf16.mxu0 %vm1389_vm3, %v13653_v45  ;;  %11114 = vmatprep.mubr.msk.bf16.mxu1 %vm1389_vm3, %v13765_v14  ;;  %v6985_v45 = vld [vmem:[#allocation3 + $0x12b] sm:$0xff] }
 0x349   : > { %v13787_v46 = vpack.c.bf16 %v6985_v45, %v6984_v48  ;;  %v13889_v48 = vpack.c.bf16 %v7291_v41, %v7290_v22  ;;  %v7294_v45 = vld [vmem:[#allocation3 + $0x13c] sm:$0xff] }
 0x34a   : > { %v7599_v41 = vld [vmem:[#allocation3 + $0x120] sm:$0xff] }
 0x34f   : > { %10723 = vmatmul.mubr.msk.bf16.gmra.mrb[48].mxu0 %vm1389_vm3, %v13663_v44  ;;  %11115 = vmatmul.mubr.msk.bf16.gmra.mrb[28].mxu1 %vm1389_vm3, %v13775_v59  ;;  %v6988_v44 = vld [vmem:[#allocation3 + $0x153] sm:$0xff] }
 0x350   : > { %10726 = vmatprep.mubr.msk.bf16.mxu0 %vm1389_vm3, %v13665_v3  ;;  %11118 = vmatprep.mubr.msk.bf16.mxu1 %vm1389_vm3, %v13777_v21  ;;  %v6989_v3 = vld [vmem:[#allocation3 + $0x15b] sm:$0xff] }
 0x351   : > { %v13799_v52 = vpack.c.bf16 %v6989_v3, %v6988_v44  ;;  %v13901_v44 = vpack.c.bf16 %v7295_v47, %v7294_v45  ;;  %v7298_v3 = vld [vmem:[#allocation3 + $0x16c] sm:$0xff] }
 0x352   : > { %v7603_v47 = vld [vmem:[#allocation3 + $0x150] sm:$0xff] }
 0x357   : > { %10727 = vmatmul.mubr.msk.bf16.gmra.mrb[52].mxu0 %vm1389_vm3, %v13675_v40  ;;  %11119 = vmatmul.mubr.msk.bf16.gmra.mrb[0].mxu1 %vm1389_vm3, %v13787_v46  ;;  %v3885_v40 = vld [vmem:[#allocation3 + $0x1b] sm:$0xff] }
 0x358   : > { %10730 = vmatprep.mubr.msk.bf16.mxu0 %vm1389_vm3, %v13677_v54  ;;  %11122 = vmatprep.mubr.msk.bf16.mxu1 %vm1389_vm3, %v13789_v9  ;;  %v3886_v54 = vld [vmem:[#allocation3 + $0x23] sm:$0xff] }
 0x359   : > { %v3917_v36 = vpack.c.bf16 %v3886_v54, %v3885_v40  ;;  %v13913_v40 = vpack.c.bf16 %v7299_v56, %v7298_v3  ;;  %v7300_v54 = vld [vmem:[#allocation3 + $0x184] sm:$0xff] }
 0x35a   : > { %v7607_v56 = vld [vmem:[#allocation3 + $0x180] sm:$0xff] }
 0x35f   : > { %10731 = vmatmul.mubr.msk.bf16.gmra.mrb[56].mxu0 %vm1389_vm3, %v13687_v7  ;;  %11123 = vmatmul.mubr.msk.bf16.gmra.mrb[4].mxu1 %vm1389_vm3, %v13799_v52  ;;  %v6996_v7 = vld [vmem:[#allocation3 + $0x1b3] sm:$0xff] }
 0x360   : > { %10734 = vmatprep.mubr.msk.bf16.mxu0 %vm1389_vm3, %v13689_v19  ;;  %11126 = vmatprep.mubr.msk.bf16.mxu1 %vm1389_vm3, %v13801_v32  ;;  %v6997_v19 = vld [vmem:[#allocation3 + $0x1bb] sm:$0xff] }
 0x361   : > { %v7013_v10 = vpack.c.bf16 %v6997_v19, %v6996_v7  ;;  %v4195_v7 = vld [vmem:[#allocation3 + $0x34] sm:$0xff]  ;;  %v4196_v19 = vld [vmem:[#allocation3 + $0x3c] sm:$0xff] }
 0x367   : > { %10735 = vmatmul.mubr.msk.bf16.gmra.mrb[60].mxu0 %vm1389_vm3, %v13699_v30  ;;  %11127 = vmatmul.mubr.msk.bf16.gmra.mrb[8].mxu1 %vm1389_vm3, %v13811_v28  ;;  %v12264_v30 = vld [vmem:[%s14426_s3 + $0x98] sm:$0x1f]  }
 0x368   : > { %11130 = vmatprep.mubr.msk.bf16.mxu1 %vm1389_vm3, %v7012_v42  ;;  %10742 = vmatprep.mubr.msk.bf16.mxu0 %vm1389_vm3, %v3917_v36  ;;  %v4306_v27 = vsel %vm1648_vm5, %v12264_v30, 0  ;;  %v13923_v36 = vpack.c.bf16 %v7301_v1, %v7300_v54  ;;  %v7320_v42 = vpack.c.bf16 %v7303_v25, %v7302_v37  ;;  %v4502_v54 = vld [vmem:[#allocation3 + $0x38] sm:$0xff] }
 0x369   : > { %v7609_v1 = vld [vmem:[#allocation3 + $0x198] sm:$0xff] }
 0x36f   : > { %10743 = vmatmul.mubr.msk.bf16.vlgmr.msra.gmra.mrb[32].mxu0 %vm1389_vm3, %v3918_v53  ;;  %11131 = vmatmul.mubr.msk.bf16.gmra.mrb[12].mxu1 %vm1389_vm3, %v7013_v10  ;;  %v4226_v10 = vpack.c.bf16 %v4196_v19, %v4195_v7  ;;  %v7586_v53 = vld [vmem:[#allocation3 + $0x80] sm:$0xff]  ;;  %v7892_v7 = vld [vmem:[#allocation3 + $0x69] sm:$0xff] }
 0x370   : > { %10746 = vmatprep.mubr.msk.bf16.mxu0 %vm1389_vm3, %v13707_v24  ;;  %11138 = vmatprep.mubr.msk.bf16.mxu1 %vm1389_vm3, %v13819_v35  ;;  %v12262_v24 = vld [vmem:[%s14426_s3 + $0x148] sm:$0x1f]   ;;  %v4503_v19 = vld [vmem:[#allocation3 + $0x48] sm:$0xff] }
 0x371   : > { %10775 = vmatpush3.bf16.msra.mxu0 %v13724_v31  ;;  %v13848_v31 = vpack.c.bf16 %v7279_v16, %v7278_v51  ;;  %v7696_v17 = vsel %vm1648_vm5, %v12262_v24, 0  ;;  %v12266_v51 = vld [vmem:[%s14426_s3 + $0x158] sm:$0x1f]   ;;  %v13953_v16 = vld [vmem:[%s14426_s3 + $0xb0] sm:$0xff]  }
 0x372   : > { %12165 = vmatprep.subr.msk.bf16.mxu0 %vm1648_vm5, %v12264_v30 }
 0x375   : > { %10777 = vmatpush3.bf16.msra.mxu0 %v4306_v27  ;;  %v13945_v27 = vpack.c.bf16 %v7586_v53, %v7585_v18  ;;  %v7896_v53 = vld [vmem:[#allocation3 + $0x99] sm:$0xff]  ;;  %v7895_v18 = vld [vmem:[#allocation3 + $0x91] sm:$0xff] }
 0x376   : > { %10810 = vmatprep.subr.bf16.mxu0 %v13836_v39 }
 0x377   : > { %10747 = vmatmul.mubr.msk.bf16.gmra.mrb[36].mxu0 %vm1389_vm3, %v13726_v38  ;;  %11139 = vmatmul.mubr.msk.bf16.vlgmr.msra.gmra.mrb[16].mxu1 %vm1389_vm3, %v13838_v20  ;;  %v13860_v38 = vld [vmem:[%s14426_s3 + $0x150] sm:$0xff]  }
 0x378   : > { %11171 = vmatpush3.bf16.msra.mxu1 %v13748_v5  ;;  %10750 = vmatprep.mubr.msk.bf16.mxu0 %vm1389_vm3, %v13736_v26  ;;  %v13862_v5 = vpack.c.bf16 %v7281_v34, %v7280_v50  ;;  %v13865_v26 = vpack.c.bf16 %v7283_v2, %v7282_v63  ;;  %v7592_v50 = vld [vmem:[#allocation3 + $0xc8] sm:$0xff]  ;;  %v7591_v63 = vld [vmem:[#allocation3 + $0xc0] sm:$0xff] }
 0x379   : > { %11142 = vmatprep.mubr.msk.bf16.mxu1 %vm1389_vm3, %v13848_v31  ;;  %12177 = vmatprep.subr.msk.bf16.mxu1 %vm1648_vm5, %v12262_v24  ;;  %v8004_v24 = vsel %vm1648_vm5, %v12266_v51, 0  ;;  %v7589_v34 = vld [vmem:[#allocation3 + $0xa8] sm:$0xff]  ;;  %v7594_v2 = vld [vmem:[#allocation3 + $0xe0] sm:$0xff] }
 0x37a   : > { %v13987_v29 = vpack.c.bf16 %v7594_v2, %v7593_v12  ;;  %v7903_v2 = vld [vmem:[#allocation3 + $0xf1] sm:$0xff]  ;;  %v7905_v12 = vld [vmem:[#allocation3 + $0x109] sm:$0xff] }
 0x37c   : > { %11173 = vmatpush3.bf16.msra.mxu1 %v7696_v17  ;;  %v7590_v17 = vld [vmem:[#allocation3 + $0xb0] sm:$0xff] }
 0x37d   : > { %11206 = vmatprep.subr.bf16.mxu1 %v13860_v38 }
 0x37f   : > { %10751 = vmatmul.mubr.msk.bf16.gmra.mrb[40].mxu0 %vm1389_vm3, %v13750_v49  ;;  %11143 = vmatmul.mubr.msk.bf16.gmra.mrb[20].mxu1 %vm1389_vm3, %v13862_v5  ;;  %v7288_v49 = vld [vmem:[#allocation3 + $0xf4] sm:$0xff] }
 0x380   : > { %10754 = vmatprep.mubr.msk.bf16.mxu0 %vm1389_vm3, %v13753_v57  ;;  %11146 = vmatprep.mubr.msk.bf16.mxu1 %vm1389_vm3, %v13865_v26  ;;  %v7289_v57 = vld [vmem:[#allocation3 + $0xfc] sm:$0xff] }
 0x381   : > { %v13887_v55 = vpack.c.bf16 %v7289_v57, %v7288_v49  ;;  %v13989_v49 = vpack.c.bf16 %v7596_v4, %v7595_v11  ;;  %v7597_v57 = vld [vmem:[#allocation3 + $0x108] sm:$0xff] }
 0x387   : > { %10755 = vmatmul.mubr.msk.bf16.gmra.mrb[44].mxu0 %vm1389_vm3, %v13763_v6  ;;  %11147 = vmatmul.mubr.msk.bf16.gmra.mrb[24].mxu1 %vm1389_vm3, %v13875_v43  ;;  %v7292_v6 = vld [vmem:[#allocation3 + $0x124] sm:$0xff] }
 0x388   : > { %10758 = vmatprep.mubr.msk.bf16.mxu0 %vm1389_vm3, %v13765_v14  ;;  %11150 = vmatprep.mubr.msk.bf16.mxu1 %vm1389_vm3, %v13877_v8  ;;  %v7293_v14 = vld [vmem:[#allocation3 + $0x12c] sm:$0xff] }
 0x389   : > { %v13899_v15 = vpack.c.bf16 %v7293_v14, %v7292_v6  ;;  %v7601_v14 = vld [vmem:[#allocation3 + $0x138] sm:$0xff] }
 0x38f   : > { %10759 = vmatmul.mubr.msk.bf16.gmra.mrb[48].mxu0 %vm1389_vm3, %v13775_v59  ;;  %11151 = vmatmul.mubr.msk.bf16.gmra.mrb[28].mxu1 %vm1389_vm3, %v13887_v55  ;;  %v7296_v59 = vld [vmem:[#allocation3 + $0x154] sm:$0xff] }
 0x390   : > { %10762 = vmatprep.mubr.msk.bf16.mxu0 %vm1389_vm3, %v13777_v21  ;;  %11154 = vmatprep.mubr.msk.bf16.mxu1 %vm1389_vm3, %v13889_v48  ;;  %v7297_v21 = vld [vmem:[#allocation3 + $0x15c] sm:$0xff] }
 0x391   : > { %v13911_v23 = vpack.c.bf16 %v7297_v21, %v7296_v59  ;;  %v7605_v21 = vld [vmem:[#allocation3 + $0x168] sm:$0xff] }
 0x397   : > { %10763 = vmatmul.mubr.msk.bf16.gmra.mrb[52].mxu0 %vm1389_vm3, %v13787_v46  ;;  %11155 = vmatmul.mubr.msk.bf16.gmra.mrb[0].mxu1 %vm1389_vm3, %v13899_v15  ;;  %v4193_v46 = vld [vmem:[#allocation3 + $0x1c] sm:$0xff] }
 0x398   : > { %10766 = vmatprep.mubr.msk.bf16.mxu0 %vm1389_vm3, %v13789_v9  ;;  %11158 = vmatprep.mubr.msk.bf16.mxu1 %vm1389_vm3, %v13901_v44  ;;  %v4194_v9 = vld [vmem:[#allocation3 + $0x24] sm:$0xff] }
 0x399   : > { %v4225_v0 = vpack.c.bf16 %v4194_v9, %v4193_v46  ;;  %v7610_v9 = vld [vmem:[#allocation3 + $0x1a0] sm:$0xff] }
 0x39a   : > { %v14035_v25 = vpack.c.bf16 %v7610_v9, %v7609_v1 }
 0x39f   : > { %10767 = vmatmul.mubr.msk.bf16.gmra.mrb[56].mxu0 %vm1389_vm3, %v13799_v52  ;;  %11159 = vmatmul.mubr.msk.bf16.gmra.mrb[4].mxu1 %vm1389_vm3, %v13911_v23  ;;  %v7304_v52 = vld [vmem:[#allocation3 + $0x1b4] sm:$0xff] }
 0x3a0   : > { %10770 = vmatprep.mubr.msk.bf16.mxu0 %vm1389_vm3, %v13801_v32  ;;  %11162 = vmatprep.mubr.msk.bf16.mxu1 %vm1389_vm3, %v13913_v40  ;;  %v7305_v32 = vld [vmem:[#allocation3 + $0x1bc] sm:$0xff] }
 0x3a1   : > { %v7321_v33 = vpack.c.bf16 %v7305_v32, %v7304_v52  ;;  %v4504_v52 = vld [vmem:[#allocation3 + $0x50] sm:$0xff] }
 0x3a7   : > { %10771 = vmatmul.mubr.msk.bf16.gmra.mrb[60].mxu0 %vm1389_vm3, %v13811_v28  ;;  %11163 = vmatmul.mubr.msk.bf16.gmra.mrb[8].mxu1 %vm1389_vm3, %v13923_v36  ;;  %v12268_v28 = vld [vmem:[%s14426_s3 + $0xa8] sm:$0x1f]  }
 0x3a8   : > { %11166 = vmatprep.mubr.msk.bf16.mxu1 %vm1389_vm3, %v7320_v42  ;;  %10778 = vmatprep.mubr.msk.bf16.mxu0 %vm1389_vm3, %v4225_v0  ;;  %v4614_v30 = vsel %vm1648_vm5, %v12268_v28, 0  ;;  %v4501_v0 = vld [vmem:[#allocation3 + $0x30] sm:$0xff] }
 0x3a9   : > { %v4533_v42 = vpack.c.bf16 %v4502_v54, %v4501_v0  ;;  %v4809_v54 = vld [vmem:[#allocation3 + $0x31] sm:$0xff] }
 0x3af   : > { %10779 = vmatmul.mubr.msk.bf16.vlgmr.msra.gmra.mrb[32].mxu0 %vm1389_vm3, %v4226_v10  ;;  %11167 = vmatmul.mubr.msk.bf16.gmra.mrb[12].mxu1 %vm1389_vm3, %v7321_v33  ;;  %v4534_v33 = vpack.c.bf16 %v4504_v52, %v4503_v19  ;;  %v14043_v10 = vpack.c.bf16 %v7892_v7, %v7891_v13  ;;  %v8199_v52 = vld [vmem:[#allocation3 + $0x62] sm:$0xff]  ;;  %v8201_v7 = vld [vmem:[#allocation3 + $0x7a] sm:$0xff] }
 0x3b0   : > { %10782 = vmatprep.mubr.msk.bf16.mxu0 %vm1389_vm3, %v13819_v35  ;;  %11174 = vmatprep.mubr.msk.bf16.mxu1 %vm1389_vm3, %v13931_v62  ;;  %v7587_v35 = vld [vmem:[#allocation3 + $0x90] sm:$0xff]  ;;  %v8204_v19 = vld [vmem:[#allocation3 + $0x9a] sm:$0xff]  ;;  %v12272_v13 = vld [vmem:[%s14426_s3 + $0x178] sm:$0x1f]  }
 0x3b1   : > { %10811 = vmatpush3.bf16.msra.mxu0 %v13836_v39  ;;  %v13960_v39 = vpack.c.bf16 %v7588_v60, %v7587_v35  ;;  %v14066_v60 = vpack.c.bf16 %v7896_v53, %v7895_v18  ;;  %v7900_v35 = vld [vmem:[#allocation3 + $0xc9] sm:$0xff]  ;;  %v8206_v53 = vld [vmem:[#allocation3 + $0xb2] sm:$0xff] }
 0x3b2   : > { %12166 = vmatprep.subr.msk.bf16.mxu0 %vm1648_vm5, %v12268_v28  ;;  %v7893_v28 = vld [vmem:[#allocation3 + $0x79] sm:$0xff] }
 0x3b5   : > { %10813 = vmatpush3.bf16.msra.mxu0 %v4614_v30 }
 0x3b6   : > { %10846 = vmatprep.subr.bf16.mxu0 %v13953_v16 }
 0x3b7   : > { %10783 = vmatmul.mubr.msk.bf16.gmra.mrb[36].mxu0 %vm1389_vm3, %v13838_v20  ;;  %11175 = vmatmul.mubr.msk.bf16.vlgmr.msra.gmra.mrb[16].mxu1 %vm1389_vm3, %v13945_v27  ;;  %v13972_v20 = vld [vmem:[%s14426_s3 + $0x160] sm:$0xff]  }
 0x3b8   : > { %11207 = vmatpush3.bf16.msra.mxu1 %v13860_v38  ;;  %10786 = vmatprep.mubr.msk.bf16.mxu0 %vm1389_vm3, %v13848_v31  ;;  %v13974_v38 = vpack.c.bf16 %v7590_v17, %v7589_v34  ;;  %v13977_v31 = vpack.c.bf16 %v7592_v50, %v7591_v63  ;;  %v7902_v17 = vld [vmem:[#allocation3 + $0xe1] sm:$0xff]  ;;  %v7904_v50 = vld [vmem:[#allocation3 + $0xf9] sm:$0xff] }
 0x3b9   : > { %11178 = vmatprep.mubr.msk.bf16.mxu1 %vm1389_vm3, %v13960_v39  ;;  %12178 = vmatprep.subr.msk.bf16.mxu1 %vm1648_vm5, %v12266_v51  ;;  %v7898_v51 = vld [vmem:[#allocation3 + $0xb1] sm:$0xff]  ;;  %v7901_v34 = vld [vmem:[#allocation3 + $0xd9] sm:$0xff]  ;;  %v7929_v4 = vpack.c.bf16 %v7904_v50, %v7903_v2 }
 0x3ba   : > { %v14093_v63 = vpack.c.bf16 %v7902_v17, %v7901_v34  ;;  %v8216_v50 = vld [vmem:[#allocation3 + $0x12a] sm:$0xff] }
 0x3bb   : > { %v8213_v34 = vld [vmem:[#allocation3 + $0x10a] sm:$0xff] }
 0x3bc   : > { %11209 = vmatpush3.bf16.msra.mxu1 %v8004_v24 }
 0x3bd   : > { %11242 = vmatprep.subr.bf16.mxu1 %v13972_v20 }
 0x3bf   : > { %10787 = vmatmul.mubr.msk.bf16.gmra.mrb[40].mxu0 %vm1389_vm3, %v13862_v5  ;;  %11179 = vmatmul.mubr.msk.bf16.gmra.mrb[20].mxu1 %vm1389_vm3, %v13974_v38  ;;  %v7598_v5 = vld [vmem:[#allocation3 + $0x110] sm:$0xff] }
 0x3c0   : > { %10790 = vmatprep.mubr.msk.bf16.mxu0 %vm1389_vm3, %v13865_v26  ;;  %11182 = vmatprep.mubr.msk.bf16.mxu1 %vm1389_vm3, %v13977_v31  ;;  %v7600_v26 = vld [vmem:[#allocation3 + $0x128] sm:$0xff]  ;;  %v13999_v22 = vpack.c.bf16 %v7598_v5, %v7597_v57  ;;  %v7909_v57 = vld [vmem:[#allocation3 + $0x139] sm:$0xff] }
 0x3c1   : > { %v14001_v6 = vpack.c.bf16 %v7600_v26, %v7599_v41  ;;  %v7907_v5 = vld [vmem:[#allocation3 + $0x121] sm:$0xff] }
 0x3c7   : > { %10791 = vmatmul.mubr.msk.bf16.gmra.mrb[44].mxu0 %vm1389_vm3, %v13875_v43  ;;  %11183 = vmatmul.mubr.msk.bf16.gmra.mrb[24].mxu1 %vm1389_vm3, %v13987_v29  ;;  %v7602_v43 = vld [vmem:[#allocation3 + $0x140] sm:$0xff] }
 0x3c8   : > { %10794 = vmatprep.mubr.msk.bf16.mxu0 %vm1389_vm3, %v13877_v8  ;;  %11186 = vmatprep.mubr.msk.bf16.mxu1 %vm1389_vm3, %v13989_v49  ;;  %v7604_v8 = vld [vmem:[#allocation3 + $0x158] sm:$0xff]  ;;  %v14011_v45 = vpack.c.bf16 %v7602_v43, %v7601_v14  ;;  %v7913_v14 = vld [vmem:[#allocation3 + $0x169] sm:$0xff] }
 0x3c9   : > { %v14013_v59 = vpack.c.bf16 %v7604_v8, %v7603_v47  ;;  %v7911_v43 = vld [vmem:[#allocation3 + $0x151] sm:$0xff] }
 0x3cf   : > { %10795 = vmatmul.mubr.msk.bf16.gmra.mrb[48].mxu0 %vm1389_vm3, %v13887_v55  ;;  %11187 = vmatmul.mubr.msk.bf16.gmra.mrb[28].mxu1 %vm1389_vm3, %v13999_v22  ;;  %v7606_v55 = vld [vmem:[#allocation3 + $0x170] sm:$0xff] }
 0x3d0   : > { %10798 = vmatprep.mubr.msk.bf16.mxu0 %vm1389_vm3, %v13889_v48  ;;  %11190 = vmatprep.mubr.msk.bf16.mxu1 %vm1389_vm3, %v14001_v6  ;;  %v7608_v48 = vld [vmem:[#allocation3 + $0x188] sm:$0xff]  ;;  %v14023_v3 = vpack.c.bf16 %v7606_v55, %v7605_v21 }
 0x3d1   : > { %v14025_v46 = vpack.c.bf16 %v7608_v48, %v7607_v56  ;;  %v7915_v55 = vld [vmem:[#allocation3 + $0x181] sm:$0xff]  ;;  %v4810_v56 = vld [vmem:[#allocation3 + $0x39] sm:$0xff] }
 0x3d2   : > { %v7918_v21 = vld [vmem:[#allocation3 + $0x1a1] sm:$0xff]  ;;  %v4841_v1 = vpack.c.bf16 %v4810_v56, %v4809_v54  ;;  %v8508_v56 = vld [vmem:[#allocation3 + $0x6b] sm:$0xff]  ;;  %v8511_v54 = vld [vmem:[#allocation3 + $0x93] sm:$0xff] }
 0x3d7   : > { %10799 = vmatmul.mubr.msk.bf16.gmra.mrb[52].mxu0 %vm1389_vm3, %v13899_v15  ;;  %11191 = vmatmul.mubr.msk.bf16.gmra.mrb[0].mxu1 %vm1389_vm3, %v14011_v45  ;;  %v7611_v15 = vld [vmem:[#allocation3 + $0x1b0] sm:$0xff] }
 0x3d8   : > { %10802 = vmatprep.mubr.msk.bf16.mxu0 %vm1389_vm3, %v13901_v44  ;;  %11194 = vmatprep.mubr.msk.bf16.mxu1 %vm1389_vm3, %v14013_v59  ;;  %v7612_v44 = vld [vmem:[#allocation3 + $0x1b8] sm:$0xff] }
 0x3d9   : > { %v7629_v37 = vpack.c.bf16 %v7612_v44, %v7611_v15  ;;  %v7917_v15 = vld [vmem:[#allocation3 + $0x199] sm:$0xff] }
 0x3da   : > { %v7936_v9 = vpack.c.bf16 %v7918_v21, %v7917_v15  ;;  %v8507_v21 = vld [vmem:[#allocation3 + $0x63] sm:$0xff] }
 0x3db   : > { %v8539_v15 = vpack.c.bf16 %v8508_v56, %v8507_v21  ;;  %v8825_v56 = vld [vmem:[#allocation3 + $0xdc] sm:$0xff] }
 0x3df   : > { %10803 = vmatmul.mubr.msk.bf16.gmra.mrb[56].mxu0 %vm1389_vm3, %v13911_v23  ;;  %11195 = vmatmul.mubr.msk.bf16.gmra.mrb[4].mxu1 %vm1389_vm3, %v14023_v3  ;;  %v7613_v23 = vld [vmem:[#allocation3 + $0x1c8] sm:$0xff] }
 0x3e0   : > { %10806 = vmatprep.mubr.msk.bf16.mxu0 %vm1389_vm3, %v13913_v40  ;;  %11198 = vmatprep.mubr.msk.bf16.mxu1 %vm1389_vm3, %v14025_v46  ;;  %v7614_v40 = vld [vmem:[#allocation3 + $0x1d0] sm:$0xff] }
 0x3e1   : > { %v7630_v32 = vpack.c.bf16 %v7614_v40, %v7613_v23  ;;  %v4811_v23 = vld [vmem:[#allocation3 + $0x49] sm:$0xff] }
 0x3e7   : > { %10807 = vmatmul.mubr.msk.bf16.gmra.mrb[60].mxu0 %vm1389_vm3, %v13923_v36  ;;  %11199 = vmatmul.mubr.msk.bf16.gmra.mrb[8].mxu1 %vm1389_vm3, %v14035_v25  ;;  %v7894_v36 = vld [vmem:[#allocation3 + $0x81] sm:$0xff] }
 0x3e8   : > { %10814 = vmatprep.mubr.msk.bf16.mxu0 %vm1389_vm3, %v4533_v42  ;;  %11202 = vmatprep.mubr.msk.bf16.mxu1 %vm1389_vm3, %v7629_v37  ;;  %v14056_v30 = vpack.c.bf16 %v7894_v36, %v7893_v28  ;;  %v4812_v37 = vld [vmem:[#allocation3 + $0x51] sm:$0xff] }
 0x3e9   : > { %v8200_v42 = vld [vmem:[#allocation3 + $0x6a] sm:$0xff]  ;;  %v4842_v40 = vpack.c.bf16 %v4812_v37, %v4811_v23  ;;  %v8203_v36 = vld [vmem:[#allocation3 + $0x92] sm:$0xff] }
 0x3ea   : > { %v14145_v28 = vld [vmem:[%s14426_s3 + $0x180] sm:$0xff]  }
 0x3eb   : > { %v8514_v23 = vld [vmem:[#allocation3 + $0xb3] sm:$0xff] }
 0x3ef   : > { %10815 = vmatmul.mubr.msk.bf16.vlgmr.msra.gmra.mrb[32].mxu0 %vm1389_vm3, %v4534_v33  ;;  %11203 = vmatmul.mubr.msk.bf16.gmra.mrb[12].mxu1 %vm1389_vm3, %v7630_v32  ;;  %v8231_v32 = vpack.c.bf16 %v8200_v42, %v8199_v52  ;;  %v8513_v42 = vld [vmem:[#allocation3 + $0xab] sm:$0xff] }
 0x3f0   : > { %10818 = vmatprep.mubr.msk.bf16.mxu0 %vm1389_vm3, %v13931_v62  ;;  %11210 = vmatprep.mubr.msk.bf16.mxu1 %vm1389_vm3, %v14043_v10  ;;  %v12270_v62 = vld [vmem:[%s14426_s3 + $0x168] sm:$0x1f]   ;;  %v8516_v52 = vld [vmem:[#allocation3 + $0xcb] sm:$0xff] }
 0x3f1   : > { %10847 = vmatpush3.bf16.msra.mxu0 %v13953_v16  ;;  %v7897_v16 = vld [vmem:[#allocation3 + $0xa9] sm:$0xff] }
 0x3f2   : > { %12167 = vmatprep.subr.msk.bf16.mxu0 %vm1648_vm5, %v12276_v61  ;;  %v14080_v24 = vpack.c.bf16 %v7898_v51, %v7897_v16  ;;  %v8233_v61 = vpack.c.bf16 %v8204_v19, %v8203_v36  ;;  %v8212_v51 = vld [vmem:[#allocation3 + $0xfa] sm:$0xff]  ;;  %v8518_v19 = vld [vmem:[#allocation3 + $0xe3] sm:$0xff] }
 0x3f5   : > { %10849 = vmatpush3.bf16.msra.mxu0 %v12923_v58  ;;  %v8312_v58 = vsel %vm1648_vm5, %v12270_v62, 0 }
 0x3f7   : > { %10819 = vmatmul.mubr.msk.bf16.gmra.mrb[36].mxu0 %vm1389_vm3, %v13945_v27  ;;  %11211 = vmatmul.mubr.msk.bf16.vlgmr.msra.gmra.mrb[16].mxu1 %vm1389_vm3, %v14056_v30  ;;  %v14078_v27 = vld [vmem:[%s14426_s3 + $0x170] sm:$0xff]  }
 0x3f8   : > { %11243 = vmatpush3.bf16.msra.mxu1 %v13972_v20  ;;  %10822 = vmatprep.mubr.msk.bf16.mxu0 %vm1389_vm3, %v13960_v39  ;;  %v7899_v20 = vld [vmem:[#allocation3 + $0xc1] sm:$0xff] }
 0x3f9   : > { %11214 = vmatprep.mubr.msk.bf16.mxu1 %vm1389_vm3, %v14066_v60  ;;  %12179 = vmatprep.subr.msk.bf16.mxu1 %vm1648_vm5, %v12270_v62  ;;  %v14083_v39 = vpack.c.bf16 %v7900_v35, %v7899_v20  ;;  %v8205_v62 = vld [vmem:[#allocation3 + $0xaa] sm:$0xff]  ;;  %v8209_v35 = vld [vmem:[#allocation3 + $0xda] sm:$0xff]  ;;  %v8211_v20 = vld [vmem:[#allocation3 + $0xf2] sm:$0xff] }
 0x3fa   : > { %v8234_v18 = vpack.c.bf16 %v8206_v53, %v8205_v62  ;;  %v8237_v17 = vpack.c.bf16 %v8212_v51, %v8211_v20  ;;  %v8523_v53 = vld [vmem:[#allocation3 + $0x123] sm:$0xff]  ;;  %v8528_v51 = vld [vmem:[#allocation3 + $0x15b] sm:$0xff]  ;;  %v8529_v20 = vld [vmem:[#allocation3 + $0x16b] sm:$0xff] }
 0x3fc   : > { %11245 = vmatpush3.bf16.msra.mxu1 %v8312_v58  ;;  %v8207_v58 = vld [vmem:[#allocation3 + $0xc2] sm:$0xff] }
 0x3fd   : > { %11278 = vmatprep.subr.bf16.mxu1 %v14078_v27 }
 0x3ff   : > { %10823 = vmatmul.mubr.msk.bf16.gmra.mrb[40].mxu0 %vm1389_vm3, %v13974_v38  ;;  %11215 = vmatmul.mubr.msk.bf16.gmra.mrb[20].mxu1 %vm1389_vm3, %v14080_v24  ;;  %v7906_v38 = vld [vmem:[#allocation3 + $0x111] sm:$0xff] }
 0x400   : > { %10826 = vmatprep.mubr.msk.bf16.mxu0 %vm1389_vm3, %v13977_v31  ;;  %11218 = vmatprep.mubr.msk.bf16.mxu1 %vm1389_vm3, %v14083_v39  ;;  %v7908_v31 = vld [vmem:[#allocation3 + $0x129] sm:$0xff]  ;;  %v7930_v11 = vpack.c.bf16 %v7906_v38, %v7905_v12  ;;  %v8217_v12 = vld [vmem:[#allocation3 + $0x13a] sm:$0xff] }
 0x401   : > { %v7931_v26 = vpack.c.bf16 %v7908_v31, %v7907_v5  ;;  %v8218_v38 = vld [vmem:[#allocation3 + $0x142] sm:$0xff]  ;;  %v8220_v31 = vld [vmem:[#allocation3 + $0x15a] sm:$0xff]  ;;  %v8219_v5 = vld [vmem:[#allocation3 + $0x152] sm:$0xff] }
 0x407   : > { %10827 = vmatmul.mubr.msk.bf16.gmra.mrb[44].mxu0 %vm1389_vm3, %v13987_v29  ;;  %11219 = vmatmul.mubr.msk.bf16.gmra.mrb[24].mxu1 %vm1389_vm3, %v14093_v63  ;;  %v7910_v29 = vld [vmem:[#allocation3 + $0x141] sm:$0xff] }
 0x408   : > { %10830 = vmatprep.mubr.msk.bf16.mxu0 %vm1389_vm3, %v13989_v49  ;;  %11222 = vmatprep.mubr.msk.bf16.mxu1 %vm1389_vm3, %v7929_v4  ;;  %v7912_v49 = vld [vmem:[#allocation3 + $0x159] sm:$0xff]  ;;  %v7932_v41 = vpack.c.bf16 %v7910_v29, %v7909_v57  ;;  %v8224_v29 = vld [vmem:[#allocation3 + $0x18a] sm:$0xff] }
 0x409   : > { %v7933_v8 = vpack.c.bf16 %v7912_v49, %v7911_v43  ;;  %v8221_v49 = vld [vmem:[#allocation3 + $0x16a] sm:$0xff] }
 0x40f   : > { %10831 = vmatmul.mubr.msk.bf16.gmra.mrb[48].mxu0 %vm1389_vm3, %v13999_v22  ;;  %11223 = vmatmul.mubr.msk.bf16.gmra.mrb[28].mxu1 %vm1389_vm3, %v7930_v11  ;;  %v7914_v22 = vld [vmem:[#allocation3 + $0x171] sm:$0xff]  ;;  %v8240_v11 = vpack.c.bf16 %v8218_v38, %v8217_v12  ;;  %v8533_v38 = vld [vmem:[#allocation3 + $0x19b] sm:$0xff] }
 0x410   : > { %10834 = vmatprep.mubr.msk.bf16.mxu0 %vm1389_vm3, %v14001_v6  ;;  %11226 = vmatprep.mubr.msk.bf16.mxu1 %vm1389_vm3, %v7931_v26  ;;  %v7916_v6 = vld [vmem:[#allocation3 + $0x189] sm:$0xff]  ;;  %v7934_v47 = vpack.c.bf16 %v7914_v22, %v7913_v14  ;;  %v8222_v26 = vld [vmem:[#allocation3 + $0x172] sm:$0xff]  ;;  %v8228_v22 = vld [vmem:[#allocation3 + $0x1ba] sm:$0xff] }
 0x411   : > { %v7935_v48 = vpack.c.bf16 %v7916_v6, %v7915_v55  ;;  %v8242_v57 = vpack.c.bf16 %v8222_v26, %v8221_v49  ;;  %v8226_v6 = vld [vmem:[#allocation3 + $0x1a2] sm:$0xff]  ;;  %v8225_v14 = vld [vmem:[#allocation3 + $0x19a] sm:$0xff]  ;;  %v8816_v49 = vld [vmem:[#allocation3 + $0x6c] sm:$0xff] }
 0x412   : > { %v8244_v55 = vpack.c.bf16 %v8226_v6, %v8225_v14 }
 0x417   : > { %10835 = vmatmul.mubr.msk.bf16.gmra.mrb[52].mxu0 %vm1389_vm3, %v14011_v45  ;;  %11227 = vmatmul.mubr.msk.bf16.gmra.mrb[0].mxu1 %vm1389_vm3, %v7932_v41  ;;  %v7919_v45 = vld [vmem:[#allocation3 + $0x1b1] sm:$0xff]  ;;  %v8223_v41 = vld [vmem:[#allocation3 + $0x182] sm:$0xff] }
 0x418   : > { %10838 = vmatprep.mubr.msk.bf16.mxu0 %vm1389_vm3, %v14013_v59  ;;  %11230 = vmatprep.mubr.msk.bf16.mxu1 %vm1389_vm3, %v7933_v8  ;;  %v7920_v59 = vld [vmem:[#allocation3 + $0x1b9] sm:$0xff]  ;;  %v8243_v43 = vpack.c.bf16 %v8224_v29, %v8223_v41  ;;  %v8815_v29 = vld [vmem:[#allocation3 + $0x64] sm:$0xff] }
 0x419   : > { %v7937_v44 = vpack.c.bf16 %v7920_v59, %v7919_v45  ;;  %v8227_v8 = vld [vmem:[#allocation3 + $0x1b2] sm:$0xff]  ;;  %v8817_v41 = vld [vmem:[#allocation3 + $0x7c] sm:$0xff] }
 0x41a   : > { %v8230_v45 = vld [vmem:[#allocation3 + $0x1d2] sm:$0xff] }
 0x41f   : > { %10839 = vmatmul.mubr.msk.bf16.gmra.mrb[56].mxu0 %vm1389_vm3, %v14023_v3  ;;  %11231 = vmatmul.mubr.msk.bf16.gmra.mrb[4].mxu1 %vm1389_vm3, %v7934_v47  ;;  %v7921_v3 = vld [vmem:[#allocation3 + $0x1c9] sm:$0xff]  ;;  %v8245_v47 = vpack.c.bf16 %v8228_v22, %v8227_v8  ;;  %v8819_v8 = vld [vmem:[#allocation3 + $0x94] sm:$0xff]  ;;  %v8820_v22 = vld [vmem:[#allocation3 + $0x9c] sm:$0xff] }
 0x420   : > { %10842 = vmatprep.mubr.msk.bf16.mxu0 %vm1389_vm3, %v14025_v46  ;;  %11234 = vmatprep.mubr.msk.bf16.mxu1 %vm1389_vm3, %v7935_v48  ;;  %v7922_v46 = vld [vmem:[#allocation3 + $0x1d1] sm:$0xff]  ;;  %v8849_v14 = vpack.c.bf16 %v8820_v22, %v8819_v8 }
 0x421   : > { %v7938_v0 = vpack.c.bf16 %v7922_v46, %v7921_v3  ;;  %v8229_v48 = vld [vmem:[#allocation3 + $0x1ca] sm:$0xff]  ;;  %v12274_v46 = vld [vmem:[%s14426_s3 + $0x188] sm:$0x1f]  }
 0x422   : > { %v8246_v59 = vpack.c.bf16 %v8230_v45, %v8229_v48  ;;  %v8823_v48 = vld [vmem:[#allocation3 + $0xc4] sm:$0xff]  ;;  %v8824_v45 = vld [vmem:[#allocation3 + $0xcc] sm:$0xff] }
 0x423   : > { %v8851_v21 = vpack.c.bf16 %v8824_v45, %v8823_v48 }
 0x427   : > { %10843 = vmatmul.mubr.msk.bf16.gmra.mrb[60].mxu0 %vm1389_vm3, %v14035_v25  ;;  %11235 = vmatmul.mubr.msk.bf16.gmra.mrb[8].mxu1 %vm1389_vm3, %v7936_v9  ;;  %v8202_v25 = vld [vmem:[#allocation3 + $0x82] sm:$0xff] }
 0x428   : > { %10850 = vmatprep.mubr.msk.bf16.mxu0 %vm1389_vm3, %v4841_v1  ;;  %11238 = vmatprep.mubr.msk.bf16.mxu1 %vm1389_vm3, %v7937_v44  ;;  %v8232_v33 = vpack.c.bf16 %v8202_v25, %v8201_v7  ;;  %v8509_v44 = vld [vmem:[#allocation3 + $0x7b] sm:$0xff]  ;;  %v8510_v9 = vld [vmem:[#allocation3 + $0x83] sm:$0xff] }
 0x429   : > { %v8512_v1 = vld [vmem:[#allocation3 + $0x9b] sm:$0xff]  ;;  %v8540_v3 = vpack.c.bf16 %v8510_v9, %v8509_v44 }
 0x42a   : > { %v8541_v37 = vpack.c.bf16 %v8512_v1, %v8511_v54  ;;  %v8517_v7 = vld [vmem:[#allocation3 + $0xdb] sm:$0xff] }
 0x42b   : > { %v8544_v36 = vpack.c.bf16 %v8518_v19, %v8517_v7  ;;  %v8827_v44 = vld [vmem:[#allocation3 + $0xf4] sm:$0xff]  ;;  %v8828_v9 = vld [vmem:[#allocation3 + $0xfc] sm:$0xff] }
 0x42c   : > { %v8853_v1 = vpack.c.bf16 %v8828_v9, %v8827_v44  ;;  %v14249_v44 = vld [vmem:[%s14427_s4] ss:$0 sm:$0xff] }
 0x42f   : > { %10851 = vmatmul.mubr.msk.bf16.vlgmr.msra.gmra.mrb[32].mxu0 %vm1389_vm3, %v4842_v40  ;;  %11239 = vmatmul.mubr.msk.bf16.gmra.mrb[12].mxu1 %vm1389_vm3, %v7938_v0  ;;  %v8928_v0 = vsel %vm1648_vm5, %v12274_v46, 0  ;;  %v8515_v40 = vld [vmem:[#allocation3 + $0xc3] sm:$0xff] }
 0x430   : > { %10854 = vmatprep.mubr.msk.bf16.mxu0 %vm1389_vm3, %v14043_v10  ;;  %11246 = vmatprep.mubr.msk.bf16.mxu1 %vm1389_vm3, %v8231_v32  ;;  %v8620_v10 = vsel %vm1648_vm5, %v12272_v13, 0  ;;  %v8542_v32 = vpack.c.bf16 %v8514_v23, %v8513_v42  ;;  %v8543_v25 = vpack.c.bf16 %v8516_v52, %v8515_v40  ;;  %v8833_v40 = vld [vmem:[#allocation3 + $0x13c] sm:$0xff]  ;;  %v8834_v52 = vld [vmem:[#allocation3 + $0x144] sm:$0xff] }
 0x431   : > { %v8856_v7 = vpack.c.bf16 %v8834_v52, %v8833_v40 }
 0x437   : > { %10855 = vmatmul.mubr.msk.bf16.gmra.mrb[36].mxu0 %vm1389_vm3, %v14056_v30  ;;  %11247 = vmatmul.mubr.msk.bf16.vlgmr.msra.gmra.mrb[16].mxu1 %vm1389_vm3, %v8232_v33  ;;  %v8208_v30 = vld [vmem:[#allocation3 + $0xca] sm:$0xff]  ;;  %v8519_v33 = vld [vmem:[#allocation3 + $0xf3] sm:$0xff] }
 0x438   : > { %11279 = vmatpush3.bf16.msra.mxu1 %v14078_v27  ;;  %10858 = vmatprep.mubr.msk.bf16.mxu0 %vm1389_vm3, %v14066_v60  ;;  %v8235_v60 = vpack.c.bf16 %v8208_v30, %v8207_v58  ;;  %v8210_v27 = vld [vmem:[#allocation3 + $0xe2] sm:$0xff]  ;;  %v8524_v30 = vld [vmem:[#allocation3 + $0x12b] sm:$0xff] }
 0x439   : > { %11250 = vmatprep.mubr.msk.bf16.mxu1 %vm1389_vm3, %v8233_v61  ;;  %12180 = vmatprep.subr.msk.bf16.mxu1 %vm1648_vm5, %v12272_v13  ;;  %v8236_v16 = vpack.c.bf16 %v8210_v27, %v8209_v35  ;;  %v8520_v13 = vld [vmem:[#allocation3 + $0xfb] sm:$0xff]  ;;  %v8527_v27 = vld [vmem:[#allocation3 + $0x153] sm:$0xff] }
 0x43a   : > { %v8545_v61 = vpack.c.bf16 %v8520_v13, %v8519_v33  ;;  %v8525_v58 = vld [vmem:[#allocation3 + $0x13b] sm:$0xff]  ;;  %v8837_v33 = vld [vmem:[#allocation3 + $0x16c] sm:$0xff] }
 0x43b   : > { %v8838_v13 = vld [vmem:[#allocation3 + $0x174] sm:$0xff] }
 0x43c   : > { %11281 = vmatpush3.bf16.msra.mxu1 %v8620_v10  ;;  %v8521_v10 = vld [vmem:[#allocation3 + $0x10b] sm:$0xff] }
 0x43d   : > { %11314 = vmatprep.subr.bf16.mxu1 %v14145_v28 }
 0x43f   : > { %10859 = vmatmul.mubr.msk.bf16.gmra.mrb[40].mxu0 %vm1389_vm3, %v14080_v24  ;;  %11251 = vmatmul.mubr.msk.bf16.gmra.mrb[20].mxu1 %vm1389_vm3, %v8234_v18  ;;  %v8214_v24 = vld [vmem:[#allocation3 + $0x112] sm:$0xff]  ;;  %v8547_v18 = vpack.c.bf16 %v8524_v30, %v8523_v53  ;;  %v8844_v30 = vld [vmem:[#allocation3 + $0x1bc] sm:$0xff] }
 0x440   : > { %10862 = vmatprep.mubr.msk.bf16.mxu0 %vm1389_vm3, %v14083_v39  ;;  %11254 = vmatprep.mubr.msk.bf16.mxu1 %vm1389_vm3, %v8235_v60  ;;  %v8238_v2 = vpack.c.bf16 %v8214_v24, %v8213_v34  ;;  %v8215_v39 = vld [vmem:[#allocation3 + $0x122] sm:$0xff]  ;;  %v8843_v53 = vld [vmem:[#allocation3 + $0x1b4] sm:$0xff] }
 0x441   : > { %v8239_v4 = vpack.c.bf16 %v8216_v50, %v8215_v39  ;;  %v8526_v60 = vld [vmem:[#allocation3 + $0x143] sm:$0xff]  ;;  %v8532_v50 = vld [vmem:[#allocation3 + $0x18b] sm:$0xff]  ;;  %v8535_v39 = vld [vmem:[#allocation3 + $0x1b3] sm:$0xff] }
 0x442   : > { %v8548_v35 = vpack.c.bf16 %v8526_v60, %v8525_v58  ;;  %v8531_v24 = vld [vmem:[#allocation3 + $0x183] sm:$0xff] }
 0x443   : > { %v8842_v58 = vld [vmem:[#allocation3 + $0x1a4] sm:$0xff] }
 0x447   : > { %10863 = vmatmul.mubr.msk.bf16.gmra.mrb[44].mxu0 %vm1389_vm3, %v14093_v63  ;;  %11255 = vmatmul.mubr.msk.bf16.gmra.mrb[24].mxu1 %vm1389_vm3, %v8236_v16  ;;  %v8241_v63 = vpack.c.bf16 %v8220_v31, %v8219_v5  ;;  %v8549_v16 = vpack.c.bf16 %v8528_v51, %v8527_v27  ;;  %v8534_v31 = vld [vmem:[#allocation3 + $0x1a3] sm:$0xff]  ;;  %v8537_v5 = vld [vmem:[#allocation3 + $0x1cb] sm:$0xff]  ;;  %v8861_v51 = vpack.c.bf16 %v8844_v30, %v8843_v53 }
 0x448   : > { %11258 = vmatprep.mubr.msk.bf16.mxu1 %vm1389_vm3, %v8237_v17  ;;  %v8530_v17 = vld [vmem:[#allocation3 + $0x173] sm:$0xff] }
 0x449   : > { %v8550_v34 = vpack.c.bf16 %v8530_v17, %v8529_v20  ;;  %v8845_v20 = vld [vmem:[#allocation3 + $0x1cc] sm:$0xff]  ;;  %v8846_v17 = vld [vmem:[#allocation3 + $0x1d4] sm:$0xff] }
 0x44f   : > { %11259 = vmatmul.mubr.msk.bf16.gmra.mrb[28].mxu1 %vm1389_vm3, %v8238_v2  ;;  %v8551_v2 = vpack.c.bf16 %v8532_v50, %v8531_v24 }
 0x450   : > { %11262 = vmatprep.mubr.msk.bf16.mxu1 %vm1389_vm3, %v8239_v4  ;;  %v8536_v4 = vld [vmem:[#allocation3 + $0x1bb] sm:$0xff] }
 0x451   : > { %v8553_v12 = vpack.c.bf16 %v8536_v4, %v8535_v39 }
 0x457   : > { %11263 = vmatmul.mubr.msk.bf16.gmra.mrb[0].mxu1 %vm1389_vm3, %v8240_v11  ;;  %v8552_v11 = vpack.c.bf16 %v8534_v31, %v8533_v38 }
 0x458   : > { %11266 = vmatprep.mubr.msk.bf16.mxu1 %vm1389_vm3, %v8241_v63  ;;  %v8538_v63 = vld [vmem:[#allocation3 + $0x1d3] sm:$0xff] }
 0x459   : > { %v8554_v26 = vpack.c.bf16 %v8538_v63, %v8537_v5 }
 0x45f   : > { %11267 = vmatmul.mubr.msk.bf16.gmra.mrb[4].mxu1 %vm1389_vm3, %v8242_v57  ;;  %v8847_v57 = vpack.c.bf16 %v8816_v49, %v8815_v29 }
 0x460   : > { %11270 = vmatprep.mubr.msk.bf16.mxu1 %vm1389_vm3, %v8243_v43  ;;  %v8818_v43 = vld [vmem:[#allocation3 + $0x84] sm:$0xff] }
 0x461   : > { %v8848_v6 = vpack.c.bf16 %v8818_v43, %v8817_v41 }
 0x467   : > { %11271 = vmatmul.mubr.msk.bf16.gmra.mrb[8].mxu1 %vm1389_vm3, %v8244_v55  ;;  %v8822_v55 = vld [vmem:[#allocation3 + $0xb4] sm:$0xff] }
 0x468   : > { %11274 = vmatprep.mubr.msk.bf16.mxu1 %vm1389_vm3, %v8245_v47  ;;  %v8821_v47 = vld [vmem:[#allocation3 + $0xac] sm:$0xff] }
 0x46f   : > { %11275 = vmatmul.mubr.msk.bf16.gmra.mrb[12].mxu1 %vm1389_vm3, %v8246_v59  ;;  %v8850_v59 = vpack.c.bf16 %v8822_v55, %v8821_v47 }
 0x470   : > { %11282 = vmatprep.mubr.msk.bf16.mxu1 %vm1389_vm3, %v8539_v15  ;;  %v8826_v15 = vld [vmem:[#allocation3 + $0xe4] sm:$0xff] }
 0x471   : > { %v8852_v54 = vpack.c.bf16 %v8826_v15, %v8825_v56 }
 0x477   : > { %11283 = vmatmul.mubr.msk.bf16.vlgmr.msra.gmra.mrb[16].mxu1 %vm1389_vm3, %v8540_v3  ;;  %v8829_v3 = vld [vmem:[#allocation3 + $0x10c] sm:$0xff] }
 0x478   : > { %11315 = vmatpush3.bf16.msra.mxu1 %v14145_v28  ;;  %11286 = vmatprep.mubr.msk.bf16.mxu1 %vm1389_vm3, %v8541_v37  ;;  %v8522_v28 = vld [vmem:[#allocation3 + $0x113] sm:$0xff]  ;;  %v8831_v37 = vld [vmem:[#allocation3 + $0x124] sm:$0xff] }
 0x479   : > { %12181 = vmatprep.subr.msk.bf16.mxu1 %vm1648_vm5, %v12274_v46  ;;  %v8546_v62 = vpack.c.bf16 %v8522_v28, %v8521_v10  ;;  %v8830_v46 = vld [vmem:[#allocation3 + $0x114] sm:$0xff]  ;;  %v8858_v10 = vpack.c.bf16 %v8838_v13, %v8837_v33 }
 0x47a   : > { %v8854_v42 = vpack.c.bf16 %v8830_v46, %v8829_v3 }
 0x47c   : > { %11317 = vmatpush3.bf16.msra.mxu1 %v8928_v0  ;;  %v8832_v0 = vld [vmem:[#allocation3 + $0x12c] sm:$0xff] }
 0x47d   : > { %v8855_v23 = vpack.c.bf16 %v8832_v0, %v8831_v37 }
 0x47f   : > { %11287 = vmatmul.mubr.msk.bf16.gmra.mrb[20].mxu1 %vm1389_vm3, %v8542_v32  ;;  %v8835_v32 = vld [vmem:[#allocation3 + $0x154] sm:$0xff] }
 0x480   : > { %11290 = vmatprep.mubr.msk.bf16.mxu1 %vm1389_vm3, %v8543_v25  ;;  %v8836_v25 = vld [vmem:[#allocation3 + $0x15c] sm:$0xff] }
 0x481   : > { %v8857_v19 = vpack.c.bf16 %v8836_v25, %v8835_v32 }
 0x487   : > { %11291 = vmatmul.mubr.msk.bf16.gmra.mrb[24].mxu1 %vm1389_vm3, %v8544_v36  ;;  %v8839_v36 = vld [vmem:[#allocation3 + $0x184] sm:$0xff] }
 0x488   : > { %11294 = vmatprep.mubr.msk.bf16.mxu1 %vm1389_vm3, %v8545_v61  ;;  %v8840_v61 = vld [vmem:[#allocation3 + $0x18c] sm:$0xff] }
 0x489   : > { %v8859_v28 = vpack.c.bf16 %v8840_v61, %v8839_v36 }
 0x48f   : > { %11295 = vmatmul.mubr.msk.bf16.gmra.mrb[28].mxu1 %vm1389_vm3, %v8546_v62 }
 0x490   : > { %11298 = vmatprep.mubr.msk.bf16.mxu1 %vm1389_vm3, %v8547_v18  ;;  %v8841_v18 = vld [vmem:[#allocation3 + $0x19c] sm:$0xff] }
 0x497   : > { %11299 = vmatmul.mubr.msk.bf16.gmra.mrb[0].mxu1 %vm1389_vm3, %v8548_v35 }
 0x498   : > { %11302 = vmatprep.mubr.msk.bf16.mxu1 %vm1389_vm3, %v8549_v16  ;;  %v8860_v16 = vpack.c.bf16 %v8842_v58, %v8841_v18 }
 0x49f   : > { %11303 = vmatmul.mubr.msk.bf16.gmra.mrb[4].mxu1 %vm1389_vm3, %v8550_v34  ;;  %v8862_v34 = vpack.c.bf16 %v8846_v17, %v8845_v20 }
 0x4a0   : > { %11306 = vmatprep.mubr.msk.bf16.mxu1 %vm1389_vm3, %v8551_v2 }
 0x4a7   : > { %11307 = vmatmul.mubr.msk.bf16.gmra.mrb[8].mxu1 %vm1389_vm3, %v8552_v11 }
 0x4a8   : > { %11310 = vmatprep.mubr.msk.bf16.mxu1 %vm1389_vm3, %v8553_v12 }
 0x4af   : > { %11311 = vmatmul.mubr.msk.bf16.gmra.mrb[12].mxu1 %vm1389_vm3, %v8554_v26 }
 0x4b0   : > { %11318 = vmatprep.mubr.msk.bf16.mxu1 %vm1389_vm3, %v8847_v57 }
 0x4b7   : > { %11319 = vmatmul.mubr.msk.bf16.vlgmr.msra.gmra.mrb[16].mxu1 %vm1389_vm3, %v8848_v6 }
 0x4b8   : > { %11322 = vmatprep.mubr.msk.bf16.mxu1 %vm1389_vm3, %v8849_v14 }
 0x4bf   : > { %11323 = vmatmul.mubr.msk.bf16.gmra.mrb[20].mxu1 %vm1389_vm3, %v8850_v59 }
 0x4c0   : > { %11326 = vmatprep.mubr.msk.bf16.mxu1 %vm1389_vm3, %v8851_v21 }
 0x4c7   : > { %11327 = vmatmul.mubr.msk.bf16.gmra.mrb[24].mxu1 %vm1389_vm3, %v8852_v54 }
 0x4c8   : > { %11330 = vmatprep.mubr.msk.bf16.mxu1 %vm1389_vm3, %v8853_v1 }
 0x4cf   : > { %11331 = vmatmul.mubr.msk.bf16.gmra.mrb[28].mxu1 %vm1389_vm3, %v8854_v42 }
 0x4d0   : > { %11334 = vmatprep.mubr.msk.bf16.mxu1 %vm1389_vm3, %v8855_v23 }
 0x4d7   : > { %11335 = vmatmul.mubr.msk.bf16.gmra.mrb[0].mxu1 %vm1389_vm3, %v8856_v7 }
 0x4d8   : > { %11338 = vmatprep.mubr.msk.bf16.mxu1 %vm1389_vm3, %v8857_v19 }
 0x4df   : > { %11339 = vmatmul.mubr.msk.bf16.gmra.mrb[4].mxu1 %vm1389_vm3, %v8858_v10 }
 0x4e0   : > { %11342 = vmatprep.mubr.msk.bf16.mxu1 %vm1389_vm3, %v8859_v28 }
 0x4e2   : > { %v14202_v62 = vpop.f32.mrb[48].mxu0 }
 0x4e3   : > { %v14204_v60 = vpop.f32.mrb[49].mxu0 }
 0x4e4   : > { %v14206_v27 = vpop.f32.mrb[50].mxu0 }
 0x4e5   : > { %v14208_v35 = vpop.f32.mrb[51].mxu0 }
 0x4e7   : > { %11343 = vmatmul.mubr.msk.bf16.gmra.mrb[8].mxu1 %vm1389_vm3, %v8860_v16 }
 0x4e8   : > { %11346 = vmatprep.mubr.msk.bf16.mxu1 %vm1389_vm3, %v8861_v51 }
 0x4ea   : > { %v14212_v24 = vpop.f32.mrb[52].mxu0 }
 0x4eb   : > { %v14214_v50 = vpop.f32.mrb[53].mxu0 }
 0x4ec   : > { %v14216_v2 = vpop.f32.mrb[54].mxu0 }
 0x4ed   : > { %v14218_v39 = vpop.f32.mrb[55].mxu0 }
 0x4ef   : > { %11347 = vmatmul.mubr.msk.bf16.gmra.mrb[12].mxu1 %vm1389_vm3, %v8862_v34 }
 0x4f2   : > { %v14221_v4 = vpop.f32.mrb[56].mxu0 }
 0x4f3   : > { %v14223_v38 = vpop.f32.mrb[57].mxu0 }
 0x4f4   : > { %v14225_v31 = vpop.f32.mrb[58].mxu0 }
 0x4f5   : > { %v14227_v12 = vpop.f32.mrb[59].mxu0 }
 0x4fa   : > { %v14229_v11 = vpop.f32.mrb[60].mxu0 }
 0x4fb   : > { %v14231_v5 = vpop.f32.mrb[61].mxu0 }
 0x4fc   : > { %v14233_v63 = vpop.f32.mrb[62].mxu0 }
 0x4fd   : > { %v14235_v26 = vpop.f32.mrb[63].mxu0 }
 0x502   : > { %v10852_v29 = vpop.f32.mrb[32].mxu0 }
 0x503   : > { %v4958_v49 = vpop.f32.mrb[33].mxu0 }
 0x504   : > { %v10853_v57 = vpop.f32.mrb[34].mxu0 }
 0x505   : > { %v4961_v41 = vpop.f32.mrb[35].mxu0 }
 0x50a   : > { %v10856_v43 = vpop.f32.mrb[36].mxu0 }
 0x50b   : > { %v4974_v8 = vpop.f32.mrb[37].mxu0 }
 0x50c   : > { %v10857_v22 = vpop.f32.mrb[38].mxu0 }
 0x50d   : > { %v4977_v6 = vpop.f32.mrb[39].mxu0 }
 0x512   : > { %v10860_v14 = vpop.f32.mrb[40].mxu0 }
 0x513   : > { %v4990_v47 = vpop.f32.mrb[41].mxu0 }
 0x514   : > { %v10861_v55 = vpop.f32.mrb[42].mxu0 }
 0x515   : > { %v4993_v48 = vpop.f32.mrb[43].mxu0 }
 0x51a   : > { %v14237_v45 = vpop.f32.mrb[44].mxu0 }
 0x51b   : > { %v14239_v59 = vpop.f32.mrb[45].mxu0 }
 0x51c   : > { %v14241_v21 = vpop.f32.mrb[46].mxu0 }
 0x51d   : > { %v14243_v56 = vpop.f32.mrb[47].mxu0 }
 0x58a   : > { %v11320_v15 = vpop.f32.mrb[16].mxu1 }
 0x58b   : > { %v11354_v9 = vadd.f32 %v11320_v15, %v10852_v29  ;;  %v8964_v54 = vpop.f32.mrb[17].mxu1 }
 0x58c   : > { %v11355_v1 = vadd.f32 %v8964_v54, %v4958_v49  ;;  %v11321_v3 = vpop.f32.mrb[18].mxu1 }
 0x58d   : > { %v9132_v46 = vadd.f32 %v11354_v9, %v14249_v44  ;;  %v11356_v37 = vadd.f32 %v11321_v3, %v10853_v57  ;;  %v8967_v0 = vpop.f32.mrb[19].mxu1 }
 0x58e   : > { %v9130_v42 = vadd.f32 %v11355_v1, %v14249_v44  ;;  %v11357_v23 = vadd.f32 %v8967_v0, %v4961_v41 }
 0x58f   : > { %v9164_v40 = vmax.f32 %v9132_v46, 0.0  ;;  %v9133_v52 = vadd.f32 %v11356_v37, %v14249_v44 }
 0x590   : > { %v9162_v32 = vmax.f32 %v9130_v42, 0.0  ;;  %v9131_v25 = vadd.f32 %v11357_v23, %v14249_v44 }
 0x591   : > { %9197 = vst.msk [vmem:[%s14257_s12 + $0x10] sm:$0xff] %vm9194_vm6, %v9164_v40  ;;  %v9165_v7 = vmax.f32 %v9133_v52, 0.0 }
 0x592   : > { %9195 = vst.msk [vmem:[%s14257_s12] sm:$0xff] %vm9194_vm6, %v9162_v32  ;;  %v9163_v19 = vmax.f32 %v9131_v25, 0.0  ;;  %v11324_v33 = vpop.f32.mrb[20].mxu1 }
 0x593   : > { %9198 = vst.msk [vmem:[%s14257_s12 + $0x18] sm:$0xff] %vm9194_vm6, %v9165_v7  ;;  %v11358_v13 = vadd.f32 %v11324_v33, %v10856_v43  ;;  %v8980_v36 = vpop.f32.mrb[21].mxu1 }
 0x594   : > { %9196 = vst.msk [vmem:[%s14257_s12 + $0x8] sm:$0xff] %vm9194_vm6, %v9163_v19  ;;  %v11359_v61 = vadd.f32 %v8980_v36, %v4974_v8  ;;  %v11325_v10 = vpop.f32.mrb[22].mxu1 }
 0x595   : > { %v9136_v28 = vadd.f32 %v11358_v13, %v14249_v44  ;;  %v11360_v53 = vadd.f32 %v11325_v10, %v10857_v22  ;;  %v8983_v30 = vpop.f32.mrb[23].mxu1 }
 0x596   : > { %v9134_v18 = vadd.f32 %v11359_v61, %v14249_v44  ;;  %v11361_v58 = vadd.f32 %v8983_v30, %v4977_v6 }
 0x597   : > { %v9168_v51 = vmax.f32 %v9136_v28, 0.0  ;;  %v9137_v16 = vadd.f32 %v11360_v53, %v14249_v44 }
 0x598   : > { %v9166_v20 = vmax.f32 %v9134_v18, 0.0  ;;  %v9135_v17 = vadd.f32 %v11361_v58, %v14249_v44 }
 0x599   : > { %9201 = vst.msk [vmem:[%s14257_s12 + $0x30] sm:$0xff] %vm9194_vm6, %v9168_v51  ;;  %v9169_v34 = vmax.f32 %v9137_v16, 0.0 }
 0x59a   : > { %9199 = vst.msk [vmem:[%s14257_s12 + $0x20] sm:$0xff] %vm9194_vm6, %v9166_v20  ;;  %v9167_v29 = vmax.f32 %v9135_v17, 0.0  ;;  %v11328_v49 = vpop.f32.mrb[24].mxu1 }
 0x59b   : > { %9202 = vst.msk [vmem:[%s14257_s12 + $0x38] sm:$0xff] %vm9194_vm6, %v9169_v34  ;;  %v11362_v57 = vadd.f32 %v11328_v49, %v10860_v14  ;;  %v8996_v41 = vpop.f32.mrb[25].mxu1 }
 0x59c   : > { %9200 = vst.msk [vmem:[%s14257_s12 + $0x28] sm:$0xff] %vm9194_vm6, %v9167_v29  ;;  %v11363_v43 = vadd.f32 %v8996_v41, %v4990_v47  ;;  %v11329_v8 = vpop.f32.mrb[26].mxu1 }
 0x59d   : > { %v9140_v22 = vadd.f32 %v11362_v57, %v14249_v44  ;;  %v11364_v6 = vadd.f32 %v11329_v8, %v10861_v55  ;;  %v8999_v15 = vpop.f32.mrb[27].mxu1 }
 0x59e   : > { %v9138_v9 = vadd.f32 %v11363_v43, %v14249_v44  ;;  %v11365_v54 = vadd.f32 %v8999_v15, %v4993_v48 }
 0x59f   : > { %v9172_v1 = vmax.f32 %v9140_v22, 0.0  ;;  %v9141_v3 = vadd.f32 %v11364_v6, %v14249_v44 }
 0x5a0   : > { %v9170_v46 = vmax.f32 %v9138_v9, 0.0  ;;  %v9139_v14 = vadd.f32 %v11365_v54, %v14249_v44 }
 0x5a1   : > { %9205 = vst.msk [vmem:[%s14257_s12 + $0x50] sm:$0xff] %vm9194_vm6, %v9172_v1  ;;  %v9173_v37 = vmax.f32 %v9141_v3, 0.0 }
 0x5a2   : > { %9203 = vst.msk [vmem:[%s14257_s12 + $0x40] sm:$0xff] %vm9194_vm6, %v9170_v46  ;;  %v9171_v47 = vmax.f32 %v9139_v14, 0.0  ;;  %v11332_v0 = vpop.f32.mrb[28].mxu1 }
 0x5a3   : > { %9206 = vst.msk [vmem:[%s14257_s12 + $0x58] sm:$0xff] %vm9194_vm6, %v9173_v37  ;;  %v11366_v55 = vadd.f32 %v11332_v0, %v14237_v45  ;;  %v9012_v48 = vpop.f32.mrb[29].mxu1 }
 0x5a4   : > { %9204 = vst.msk [vmem:[%s14257_s12 + $0x48] sm:$0xff] %vm9194_vm6, %v9171_v47  ;;  %v11367_v42 = vadd.f32 %v9012_v48, %v14239_v59  ;;  %v11333_v23 = vpop.f32.mrb[30].mxu1 }
 0x5a5   : > { %v9144_v40 = vadd.f32 %v11366_v55, %v14249_v44  ;;  %v11368_v52 = vadd.f32 %v11333_v23, %v14241_v21  ;;  %v9015_v32 = vpop.f32.mrb[31].mxu1 }
 0x5a6   : > { %v9142_v25 = vadd.f32 %v11367_v42, %v14249_v44  ;;  %v11369_v7 = vadd.f32 %v9015_v32, %v14243_v56 }
 0x5a7   : > { %v9176_v19 = vmax.f32 %v9144_v40, 0.0  ;;  %v9145_v45 = vadd.f32 %v11368_v52, %v14249_v44 }
 0x5a8   : > { %v9174_v33 = vmax.f32 %v9142_v25, 0.0  ;;  %v9143_v13 = vadd.f32 %v11369_v7, %v14249_v44 }
 0x5a9   : > { %9209 = vst.msk [vmem:[%s14257_s12 + $0x70] sm:$0xff] %vm9194_vm6, %v9176_v19  ;;  %v9177_v59 = vmax.f32 %v9145_v45, 0.0 }
 0x5aa   : > { %9207 = vst.msk [vmem:[%s14257_s12 + $0x60] sm:$0xff] %vm9194_vm6, %v9174_v33  ;;  %v9175_v36 = vmax.f32 %v9143_v13, 0.0  ;;  %v11336_v61 = vpop.f32.mrb[0].mxu1 }
 0x5ab   : > { %9210 = vst.msk [vmem:[%s14257_s12 + $0x78] sm:$0xff] %vm9194_vm6, %v9177_v59  ;;  %v11370_v21 = vadd.f32 %v11336_v61, %v14202_v62  ;;  %v9028_v56 = vpop.f32.mrb[1].mxu1 }
 0x5ac   : > { %9208 = vst.msk [vmem:[%s14257_s12 + $0x68] sm:$0xff] %vm9194_vm6, %v9175_v36  ;;  %v11371_v10 = vadd.f32 %v9028_v56, %v14204_v60  ;;  %v11337_v28 = vpop.f32.mrb[2].mxu1 }
 0x5ad   : > { %v9148_v53 = vadd.f32 %v11370_v21, %v14249_v44  ;;  %v11372_v30 = vadd.f32 %v11337_v28, %v14206_v27  ;;  %v9031_v18 = vpop.f32.mrb[3].mxu1 }
 0x5ae   : > { %v9146_v58 = vadd.f32 %v11371_v10, %v14249_v44  ;;  %v11373_v51 = vadd.f32 %v9031_v18, %v14208_v35 }
 0x5af   : > { %v9180_v16 = vmax.f32 %v9148_v53, 0.0  ;;  %v9149_v62 = vadd.f32 %v11372_v30, %v14249_v44 }
 0x5b0   : > { %v9178_v20 = vmax.f32 %v9146_v58, 0.0  ;;  %v9147_v17 = vadd.f32 %v11373_v51, %v14249_v44 }
 0x5b1   : > { %9213 = vst.msk [vmem:[%s14257_s12 + $0x90] sm:$0xff] %vm9194_vm6, %v9180_v16  ;;  %v9181_v60 = vmax.f32 %v9149_v62, 0.0 }
 0x5b2   : > { %9211 = vst.msk [vmem:[%s14257_s12 + $0x80] sm:$0xff] %vm9194_vm6, %v9178_v20  ;;  %v9179_v34 = vmax.f32 %v9147_v17, 0.0  ;;  %v11340_v29 = vpop.f32.mrb[4].mxu1 }
 0x5b3   : > { %9214 = vst.msk [vmem:[%s14257_s12 + $0x98] sm:$0xff] %vm9194_vm6, %v9181_v60  ;;  %v11374_v27 = vadd.f32 %v11340_v29, %v14212_v24  ;;  %v9044_v35 = vpop.f32.mrb[5].mxu1 }
 0x5b4   : > { %9212 = vst.msk [vmem:[%s14257_s12 + $0x88] sm:$0xff] %vm9194_vm6, %v9179_v34  ;;  %v11375_v49 = vadd.f32 %v9044_v35, %v14214_v50  ;;  %v11341_v57 = vpop.f32.mrb[6].mxu1 }
 0x5b5   : > { %v9152_v41 = vadd.f32 %v11374_v27, %v14249_v44  ;;  %v11376_v43 = vadd.f32 %v11341_v57, %v14216_v2  ;;  %v9047_v8 = vpop.f32.mrb[7].mxu1 }
 0x5b6   : > { %v9150_v22 = vadd.f32 %v11375_v49, %v14249_v44  ;;  %v11377_v6 = vadd.f32 %v9047_v8, %v14218_v39 }
 0x5b7   : > { %v9184_v15 = vmax.f32 %v9152_v41, 0.0  ;;  %v9153_v24 = vadd.f32 %v11376_v43, %v14249_v44 }
 0x5b8   : > { %v9182_v9 = vmax.f32 %v9150_v22, 0.0  ;;  %v9151_v54 = vadd.f32 %v11377_v6, %v14249_v44 }
 0x5b9   : > { %9217 = vst.msk [vmem:[%s14257_s12 + $0xb0] sm:$0xff] %vm9194_vm6, %v9184_v15  ;;  %v9185_v50 = vmax.f32 %v9153_v24, 0.0 }
 0x5ba   : > { %9215 = vst.msk [vmem:[%s14257_s12 + $0xa0] sm:$0xff] %vm9194_vm6, %v9182_v9  ;;  %v9183_v1 = vmax.f32 %v9151_v54, 0.0  ;;  %v11344_v3 = vpop.f32.mrb[8].mxu1 }
 0x5bb   : > { %9218 = vst.msk [vmem:[%s14257_s12 + $0xb8] sm:$0xff] %vm9194_vm6, %v9185_v50  ;;  %v11378_v2 = vadd.f32 %v11344_v3, %v14221_v4  ;;  %v9060_v39 = vpop.f32.mrb[9].mxu1 }
 0x5bc   : > { %9216 = vst.msk [vmem:[%s14257_s12 + $0xa8] sm:$0xff] %vm9194_vm6, %v9183_v1  ;;  %v11379_v46 = vadd.f32 %v9060_v39, %v14223_v38  ;;  %v11345_v14 = vpop.f32.mrb[10].mxu1 }
 0x5bd   : > { %v9156_v37 = vadd.f32 %v11378_v2, %v14249_v44  ;;  %v11380_v47 = vadd.f32 %v11345_v14, %v14225_v31  ;;  %v9063_v0 = vpop.f32.mrb[11].mxu1 }
 0x5be   : > { %v9154_v55 = vadd.f32 %v11379_v46, %v14249_v44  ;;  %v11381_v48 = vadd.f32 %v9063_v0, %v14227_v12 }
 0x5bf   : > { %v9188_v42 = vmax.f32 %v9156_v37, 0.0  ;;  %v9157_v4 = vadd.f32 %v11380_v47, %v14249_v44 }
 0x5c0   : > { %v9186_v23 = vmax.f32 %v9154_v55, 0.0  ;;  %v9155_v40 = vadd.f32 %v11381_v48, %v14249_v44 }
 0x5c1   : > { %9221 = vst.msk [vmem:[%s14257_s12 + $0xd0] sm:$0xff] %vm9194_vm6, %v9188_v42  ;;  %v9189_v38 = vmax.f32 %v9157_v4, 0.0 }
 0x5c2   : > { %9219 = vst.msk [vmem:[%s14257_s12 + $0xc0] sm:$0xff] %vm9194_vm6, %v9186_v23  ;;  %v9187_v31 = vmax.f32 %v9155_v40, 0.0  ;;  %v11348_v52 = vpop.f32.mrb[12].mxu1 }
 0x5c3   : > { %9222 = vst.msk [vmem:[%s14257_s12 + $0xd8] sm:$0xff] %vm9194_vm6, %v9189_v38  ;;  %v11382_v32 = vadd.f32 %v11348_v52, %v14229_v11  ;;  %v9076_v12 = vpop.f32.mrb[13].mxu1 }
 0x5c4   : > { %9220 = vst.msk [vmem:[%s14257_s12 + $0xc8] sm:$0xff] %vm9194_vm6, %v9187_v31  ;;  %v11383_v25 = vadd.f32 %v9076_v12, %v14231_v5  ;;  %v11349_v7 = vpop.f32.mrb[14].mxu1 }
 0x5c5   : > { %v9160_v19 = vadd.f32 %v11382_v32, %v14249_v44  ;;  %v11384_v45 = vadd.f32 %v11349_v7, %v14233_v63  ;;  %v9079_v33 = vpop.f32.mrb[15].mxu1 }
 0x5c6   : > { %v9158_v13 = vadd.f32 %v11383_v25, %v14249_v44  ;;  %v11385_v11 = vadd.f32 %v9079_v33, %v14235_v26 }
 0x5c7   : > { %v9192_v59 = vmax.f32 %v9160_v19, 0.0  ;;  %v9161_v5 = vadd.f32 %v11384_v45, %v14249_v44 }
 0x5c8   : > { %v9190_v36 = vmax.f32 %v9158_v13, 0.0  ;;  %v9159_v61 = vadd.f32 %v11385_v11, %v14249_v44 }
 0x5c9   : > { %9225 = vst.msk [vmem:[%s14257_s12 + $0xf0] sm:$0xff] %vm9194_vm6, %v9192_v59  ;;  %v9193_v63 = vmax.f32 %v9161_v5, 0.0 }
 0x5ca   : > { %9223 = vst.msk [vmem:[%s14257_s12 + $0xe0] sm:$0xff] %vm9194_vm6, %v9190_v36  ;;  %v9191_v26 = vmax.f32 %v9159_v61, 0.0 }
 0x5cb   : > { %9226 = vst.msk [vmem:[%s14257_s12 + $0xf8] sm:$0xff] %vm9194_vm6, %v9193_v63 }
 0x5cc   : > { %9224 = vst.msk [vmem:[%s14257_s12 + $0xe8] sm:$0xff] %vm9194_vm6, %v9191_v26 }
 0x5cd   : > { %12290 = shalt.err (!%p12287_p3)
}
 0x5ce   : > { %s12291_s6 = scalar_lea.hbm %s14370_s17, 4096  ;;  %s12295_s9 = scalar_lea.hbm %s14428_s5, 8192 }
 0x5cf   : > { %p12292_p4 = scmp.ne.s32.totalorder %s14370_s17, %s12291_s6  ;;  %p12296_p9 = scmp.lt.u32.totalorder %s14370_s17, %s14428_s5 }
 0x5d0   : > { %p12297_p10 = scmp.lt.u32.totalorder %s12295_s9, %s12291_s6  ;;  %p12299_p12 = scmp.lt.u32.totalorder %s12291_s6, %s14370_s17 }
 0x5d1   : > { %p12293_p7 = pnand %p12292_p4, %p12414_p5 }
 0x5d2   : > { %p12298_p11 = por %p12297_p10, %p12296_p9 }
 0x5d3   : > { %p12294_p8 = pneg %p12293_p7 }
 0x5d4   : > { %p12300_p13 = por %p12299_p12, %p12298_p11 }
 0x5d6   : > { %p12301_p0 = pnand %p12300_p13, %p12294_p8 }
 0x5d8   : > { %12304 = shalt.err (!%p12301_p0)
}
 0x5d9   : > { %s12344_s12 = smov 128   ;;  %s12345_s13 = smov 8  }
 0x5da   : > { %12182 = dma.vmem_to_hbm [thread:$0]  (%p12414_p5), %s14372_s14, 4096, %s14370_s17, %s14382_s22, %s12344_s12, %s12344_s12, %s12345_s13  }
 0x5db PF: > { %p12188_p1 = scmp.ge.s32.totalorder %s12339_s21, 2  ;;  %s9256_s15 = sand.u32 1, %s12327_s18  }
 0x5dc   : > { %s9257_s16 = scalar_lea.sflag [#allocation5], %s9256_s15 }
 0x5dd   : > { %p12185_p2 = pnand %p12188_p1, %p12418_p6 }
 0x5df   : > { %12322 = dma.done.wait (!%p12185_p2), %s9257_s16, 4096  }
 0x5e0   : > { %12324 = vsyncadd (!%p12185_p2), %s9257_s16, 4294963200  ;;  %p15_p3 = scmp.ge.s32.totalorder %s12401_s24, 4   ;;  %s14461_s18 = smov %s12331_s19 }
 0x5e1   : > { %s14462_s19 = smov %s12335_s20  ;;  %s14463_s20 = smov %s12412_s27 }
 0x5e2   : > { %s14464_s21 = smov %s12401_s24  ;;  %17 = sbr.rel (!%p15_p3) target bundleno = 3 (0x3), region = 106 }
 0x5e9   :  { %9262 = vsyncpa [#allocation5], 1 }
 0x5ea   :  { %9264 = vsyncpa [#allocation5 + $0x1], 1 }

</bundles_post_ra>
